<compile_context>
chip_gen: v7x
topology: tpu7x:2x2x1
jax: 0.10.0
libtpu: 0.0.40
codegen_flags: <defaults>
</compile_context>

<pallas_src>
import jax
import jax.numpy as jnp
import numpy as np
from jax import lax
from jax.experimental import pallas as pl
from jax.experimental.pallas import tpu as pltpu

# ------------------------- model configuration -------------------------
INPUT_SIZE = 31      # config['input_size']
HIDDEN_SIZE = 32     # config['hidden_size'] (small demo size; must be even)
NUM_LAYERS = 2       # config['num_layers'] (kernel is specialized to 2)
STAT_SIZE = 47       # config['stat_features_size']
OUTPUT_SIZE = 2      # config['output_size']
LN_EPS = 1e-5        # nn.LayerNorm default eps

_H = HIDDEN_SIZE // 2          # per-direction GRU hidden size
_S2 = STAT_SIZE // 2           # stat_fc hidden
_S4 = STAT_SIZE // 4           # stat_fc output
_FUS = _H + _S4                # fusion_fc input
_F2 = _FUS // 2                # fusion_fc hidden
_LANES = 128


def _r8(n):
    return (n + 7) // 8 * 8


# -------- packed-parameter slab layout (compile-time row offsets) --------
_W_SHAPES = {
    'wih0':   (INPUT_SIZE, 6 * _H),
    'whh0_f': (_H, 3 * _H),
    'whh0_b': (_H, 3 * _H),
    'wih1':   (HIDDEN_SIZE, 6 * _H),
    'whh1_f': (_H, 3 * _H),
    'whh1_b': (_H, 3 * _H),
    'wg':     (HIDDEN_SIZE, _H),
    'ws1':    (STAT_SIZE, _S2),
    'ws2':    (_S2, _S4),
    'wf1':    (_FUS, _F2),
    'wf2':    (_F2, OUTPUT_SIZE),
}
_W_OFF = {}
_off = 0
for _name, (_rows, _cols) in _W_SHAPES.items():
    _W_OFF[_name] = _off
    _off += _r8(_rows)          # sublane-aligned start for every matrix

_V_COLS = {                      # one row per bias / LN vector
    'bih0': 6 * _H, 'bhn0': 2 * _H, 'bih1': 6 * _H, 'bhn1': 2 * _H,
    'g0': HIDDEN_SIZE, 'be0': HIDDEN_SIZE, 'g1': HIDDEN_SIZE, 'be1': HIDDEN_SIZE,
    'bg': _H, 'bs1': _S2, 'bs2': _S4, 'bf1': _F2, 'bf2': OUTPUT_SIZE,
}
_V_ROW = {name: _off + i for i, name in enumerate(_V_COLS)}
_SLAB_ROWS = _r8(_off + len(_V_COLS))


# ------------------------------ kernel ---------------------------------

def fused_forward_kernel(x_ref, stat_ref, p_ref, o_ref):
    """Entire BiGRULateFusionModel forward (eval mode), fully VMEM resident.

    x_ref    : (B*T, INPUT_SIZE) f32, batch-major rows (row = b*T + t).
    stat_ref : (B, STAT_SIZE)    f32.
    p_ref    : (_SLAB_ROWS, 128) f32 packed parameter slab (see _W_OFF/_V_ROW).
    o_ref    : (B, OUTPUT_SIZE)  f32.
    """
    B = o_ref.shape[0]
    T = x_ref.shape[0] // B
    H = _H
    f32 = jnp.float32

    # -- static views into the packed parameter slab (single DMA for all params) --
    def w(name):
        r0 = _W_OFF[name]
        rows, cols = _W_SHAPES[name]
        return p_ref[r0:r0 + rows, :cols]

    def v(name):
        r = _V_ROW[name]
        return p_ref[r:r + 1, :_V_COLS[name]]

    def norm_rows(u, gamma=None, beta=None):
        mean = jnp.mean(u, axis=-1, keepdims=True)
        cent = u - mean
        var = jnp.mean(cent * cent, axis=-1, keepdims=True)
        y = cent * lax.rsqrt(var + LN_EPS)
        if gamma is not None:
            y = y * gamma + beta
        return y

    def gru_step(gi, gh, bhn_d, h_prev):
        # PyTorch GRU, gate order [r, z, n]; b_hh(r,z) already folded into gi.
        r = jax.nn.sigmoid(gi[:, :H] + gh[:, :H])
        z = jax.nn.sigmoid(gi[:, H:2 * H] + gh[:, H:2 * H])
        n = jnp.tanh(gi[:, 2 * H:] + r * (gh[:, 2 * H:] + bhn_d))
        return (1.0 - z) * n + z * h_prev

    def run_bigru(gi_f_at, gi_b_at, whh_f, whh_b, bhn_f, bhn_b):
        """Fused fwd+bwd recurrence.  h_f / h_b carried separately (two small
        independent matmuls per step, no concat) so the two serial chains can
        interleave.  Outputs stay in registers (Python lists; loop unrolled)."""
        h_f = jnp.zeros((B, H), f32)
        h_b = jnp.zeros((B, H), f32)
        out_f = [None] * T
        out_b = [None] * T
        for step in range(T):
            tb = T - 1 - step
            gh_f = jnp.dot(h_f, whh_f, preferred_element_type=f32)
            gh_b = jnp.dot(h_b, whh_b, preferred_element_type=f32)
            h_f = gru_step(gi_f_at(step), gh_f, bhn_f, h_f)
            h_b = gru_step(gi_b_at(tb), gh_b, bhn_b, h_b)
            out_f[step] = h_f      # fwd output at time t = step
            out_b[tb] = h_b        # bwd output at time t = tb
        return out_f, out_b

    # ---------------- BiGRU layer 0 ----------------
    # Hoisted input projection: one matmul for all timesteps & both directions.
    gi0 = jnp.dot(x_ref[...], w('wih0'), preferred_element_type=f32) + v('bih0')
    gi0_f, gi0_b = gi0[:, :3 * H], gi0[:, 3 * H:]        # per-direction split, hoisted
    bhn0 = v('bhn0')
    bhn0_f, bhn0_b = bhn0[:, :H], bhn0[:, H:]

    def bm_rows(a, t):
        # gather the B rows of timestep t from a batch-major (B*T, C) array
        return jnp.concatenate([a[b * T + t:b * T + t + 1] for b in range(B)], axis=0)

    f0, b0 = run_bigru(lambda t: bm_rows(gi0_f, t), lambda t: bm_rows(gi0_b, t),
                       w('whh0_f'), w('whh0_b'), bhn0_f, bhn0_b)

    # Layer-0 sequence assembled from registers (time-major rows, row = t*B + b).
    out0 = jnp.concatenate(
        [jnp.concatenate([f0[t], b0[t]], axis=-1) for t in range(T)], axis=0)
    # LayerNorm-0 *without* affine: gamma0/beta0 are pre-folded into wih1/bih1.
    norm0 = norm_rows(out0)

    # ---------------- BiGRU layer 1 ----------------
    gi1 = jnp.dot(norm0, w('wih1'), preferred_element_type=f32) + v('bih1')
    gi1_f, gi1_b = gi1[:, :3 * H], gi1[:, 3 * H:]
    bhn1 = v('bhn1')
    bhn1_f, bhn1_b = bhn1[:, :H], bhn1[:, H:]

    f1_seq, b1_seq = run_bigru(lambda t: gi1_f[t * B:(t + 1) * B],
                               lambda t: gi1_b[t * B:(t + 1) * B],
                               w('whh1_f'), w('whh1_b'), bhn1_f, bhn1_b)

    # Only the last timestep of layer 1 is consumed downstream.
    gru1_last = jnp.concatenate([f1_seq[T - 1], b1_seq[T - 1]], axis=-1)      # (B, 2H)
    ln0_last = norm0[(T - 1) * B:, :] * v('g0') + v('be0')                    # residual (affine here)
    g_last = norm_rows(gru1_last + ln0_last, v('g1'), v('be1'))

    # ---------- late-fusion heads (torch.cat folded into a split matmul) ----------
    relu = lambda u: jnp.maximum(u, 0.0)
    gf = relu(jnp.dot(g_last, w('wg'), preferred_element_type=f32) + v('bg'))
    s1 = relu(jnp.dot(stat_ref[...], w('ws1'), preferred_element_type=f32) + v('bs1'))
    s2 = relu(jnp.dot(s1, w('ws2'), preferred_element_type=f32) + v('bs2'))
    wf1 = w('wf1')
    fz = relu(jnp.dot(gf, wf1[:H, :], preferred_element_type=f32)
              + jnp.dot(s2, wf1[H:, :], preferred_element_type=f32) + v('bf1'))
    o_ref[...] = jnp.dot(fz, w('wf2'), preferred_element_type=f32) + v('bf2')
    # TODO(synk): attention_layer is dead code in the module's forward(); omitted.


# ------------------------------ wrapper ---------------------------------

@jax.jit
def forward(pslab, x, stat_features):
    """x: (B, T, INPUT_SIZE), stat_features: (B, STAT_SIZE) -> (B, OUTPUT_SIZE)."""
    B, T, F = x.shape
    # Batch-major flatten (row = b*T + t): layout-preserving reshape, no transpose.
    x2 = x.astype(jnp.float32).reshape(B * T, F)
    return pl.pallas_call(
        fused_forward_kernel,
        out_shape=jax.ShapeDtypeStruct((B, OUTPUT_SIZE), jnp.float32),
        in_specs=[pl.BlockSpec(memory_space=pltpu.MemorySpace.VMEM)] * 3,
        out_specs=pl.BlockSpec(memory_space=pltpu.MemorySpace.VMEM),
    )(x2, stat_features.astype(jnp.float32), pslab)


# -------------------------- parameter handling ---------------------------

def _xavier(key, fan_in, fan_out, gain=1.0):
    limit = gain * float(np.sqrt(6.0 / (fan_in + fan_out)))
    return jax.random.uniform(key, (fan_in, fan_out), jnp.float32, -limit, limit)


def init_params(key):
    """PyTorch-layout params (weights stored transposed as (in, out)).

    Note: the module's _init_weights zero-inits all biases (and, due to its
    name matching, the LayerNorm gammas). Small random values are used here
    instead so the numerical check exercises every term of the forward pass;
    forward semantics are unchanged.
    """
    H = _H
    keys = iter(jax.random.split(key, 48))
    params = {'gru': [], 'ln': []}
    for i in range(NUM_LAYERS):
        din = INPUT_SIZE if i == 0 else HIDDEN_SIZE
        lp = {}
        for d in ('f', 'b'):
            # weight_ih: xavier_uniform on torch (3H, din), stored as (din, 3H)
            lp[f'wih_{d}'] = _xavier(next(keys), din, 3 * H)
            # weight_hh: orthogonal on torch (3H, H), stored as (H, 3H)
            lp[f'whh_{d}'] = jax.nn.initializers.orthogonal()(
                next(keys), (3 * H, H), jnp.float32).T
            lp[f'bih_{d}'] = 0.1 * jax.random.normal(next(keys), (1, 3 * H), jnp.float32)
            lp[f'bhh_{d}'] = 0.1 * jax.random.normal(next(keys), (1, 3 * H), jnp.float32)
        params['gru'].append(lp)
        params['ln'].append({
            'gamma': 1.0 + 0.1 * jax.random.normal(next(keys), (1, HIDDEN_SIZE), jnp.float32),
            'beta': 0.1 * jax.random.normal(next(keys), (1, HIDDEN_SIZE), jnp.float32)})

    params['wg'] = _xavier(next(keys), HIDDEN_SIZE, H)                  # gru_fc
    params['bg'] = 0.1 * jax.random.normal(next(keys), (1, H), jnp.float32)
    params['ws1'] = _xavier(next(keys), STAT_SIZE, _S2)                 # stat_fc[0]
    params['bs1'] = 0.1 * jax.random.normal(next(keys), (1, _S2), jnp.float32)
    params['ws2'] = _xavier(next(keys), _S2, _S4)                       # stat_fc[3]
    params['bs2'] = 0.1 * jax.random.normal(next(keys), (1, _S4), jnp.float32)
    wf1 = _xavier(next(keys), _FUS, _F2)                                # fusion_fc[0]
    params['wf1g'] = wf1[:H]          # rows multiplying gru_features
    params['wf1s'] = wf1[H:]          # rows multiplying stat_out
    params['bf1'] = 0.1 * jax.random.normal(next(keys), (1, _F2), jnp.float32)
    params['wf2'] = _xavier(next(keys), _F2, OUTPUT_SIZE)               # fusion_fc[3]
    params['bf2'] = 0.1 * jax.random.normal(next(keys), (1, OUTPUT_SIZE), jnp.float32)
    return params


def prepare_params(params):
    """Pack all PyTorch-layout params into ONE (rows, 128) f32 slab (1 DMA).

    Folds done here (forward semantics unchanged, exact algebra):
      * b_hh of the r/z gates folded into b_ih; n-gate b_hh kept separate.
      * LayerNorm-0 affine (gamma0/beta0) folded into wih1/bih1; the kernel
        applies it explicitly only for the last-timestep residual rows.
    """
    H = _H
    slab = np.zeros((_SLAB_ROWS, _LANES), np.float32)

    def put_w(name, arr):
        arr = np.asarray(arr, np.float32)
        assert arr.shape == _W_SHAPES[name], (name, arr.shape)
        r0 = _W_OFF[name]
        slab[r0:r0 + arr.shape[0], :arr.shape[1]] = arr

    def put_v(name, vec):
        vec = np.asarray(vec, np.float32).reshape(-1)
        assert vec.shape[0] == _V_COLS[name], (name, vec.shape)
        slab[_V_ROW[name], :vec.shape[0]] = vec

    mask_rz = np.concatenate([np.ones(2 * H, np.float32), np.zeros(H, np.float32)])

    def fused_ih_bias(lp):
        bf = (np.asarray(lp['bih_f'], np.float32).reshape(-1)
              + np.asarray(lp['bhh_f'], np.float32).reshape(-1) * mask_rz)
        bb = (np.asarray(lp['bih_b'], np.float32).reshape(-1)
              + np.asarray(lp['bhh_b'], np.float32).reshape(-1) * mask_rz)
        return np.concatenate([bf, bb])

    def n_gate_bias(lp):
        return np.concatenate([np.asarray(lp['bhh_f'], np.float32).reshape(-1)[2 * H:],
                               np.asarray(lp['bhh_b'], np.float32).reshape(-1)[2 * H:]])

    # ---- layer 0 ----
    lp0 = params['gru'][0]
    put_w('wih0', np.concatenate([np.asarray(lp0['wih_f']), np.asarray(lp0['wih_b'])], axis=1))
    put_w('whh0_f', lp0['whh_f'])
    put_w('whh0_b', lp0['whh_b'])
    put_v('bih0', fused_ih_bias(lp0))
    put_v('bhn0', n_gate_bias(lp0))

    # ---- layer 1 (LayerNorm-0 affine folded into its input projection) ----
    lp1 = params['gru'][1]
    g0 = np.asarray(params['ln'][0]['gamma'], np.float32).reshape(-1)
    be0 = np.asarray(params['ln'][0]['beta'], np.float32).reshape(-1)
    wih1_full = np.concatenate([np.asarray(lp1['wih_f']), np.asarray(lp1['wih_b'])], axis=1)
    put_w('wih1', g0[:, None] * wih1_full)
    put_v('bih1', fused_ih_bias(lp1) + be0 @ wih1_full)
    put_w('whh1_f', lp1['whh_f'])
    put_w('whh1_b', lp1['whh_b'])
    put_v('bhn1', n_gate_bias(lp1))

    # ---- LayerNorm vectors (g0/be0 still needed for the last-step residual) ----
    put_v('g0', g0)
    put_v('be0', be0)
    put_v('g1', params['ln'][1]['gamma'])
    put_v('be1', params['ln'][1]['beta'])

    # ---- heads ----
    put_w('wg', params['wg']);   put_v('bg', params['bg'])
    put_w('ws1', params['ws1']); put_v('bs1', params['bs1'])
    put_w('ws2', params['ws2']); put_v('bs2', params['bs2'])
    put_w('wf1', np.concatenate([np.asarray(params['wf1g']),
                                 np.asarray(params['wf1s'])], axis=0))
    put_v('bf1', params['bf1'])
    put_w('wf2', params['wf2']); put_v('bf2', params['bf2'])
    return jnp.asarray(slab)


# -------------------------- pure-JAX reference ---------------------------

def reference_forward(params, x, stat):
    """Pure-JAX/XLA reference mirroring the PyTorch module (eval mode)."""
    B, T, _ = x.shape
    H = _H
    hidden = x.astype(jnp.float32)
    residual = None
    for i in range(NUM_LAYERS):
        lp = params['gru'][i]

        def run_dir(wih, whh, bih, bhh, reverse, inp):
            h = jnp.zeros((B, H), jnp.float32)
            outs = [None] * T
            ts = range(T - 1, -1, -1) if reverse else range(T)
            for t in ts:
                x_t = inp[:, t, :]
                gi = x_t @ wih + bih
                gh = h @ whh + bhh
                r = jax.nn.sigmoid(gi[:, :H] + gh[:, :H])
                z = jax.nn.sigmoid(gi[:, H:2 * H] + gh[:, H:2 * H])
                n = jnp.tanh(gi[:, 2 * H:] + r * gh[:, 2 * H:])
                h = (1.0 - z) * n + z * h
                outs[t] = h
            return jnp.stack(outs, axis=1)

        of = run_dir(lp['wih_f'], lp['whh_f'], lp['bih_f'], lp['bhh_f'], False, hidden)
        ob = run_dir(lp['wih_b'], lp['whh_b'], lp['bih_b'], lp['bhh_b'], True, hidden)
        gru_out = jnp.concatenate([of, ob], axis=-1)
        if i > 0 and residual is not None:
            gru_out = gru_out + residual
        g, be = params['ln'][i]['gamma'], params['ln'][i]['beta']
        mean = jnp.mean(gru_out, axis=-1, keepdims=True)
        var = jnp.mean((gru_out - mean) ** 2, axis=-1, keepdims=True)
        gru_out = (gru_out - mean) / jnp.sqrt(var + LN_EPS) * g + be
        residual = gru_out
        hidden = gru_out

    g_last = hidden[:, -1, :]
    relu = lambda v: jnp.maximum(v, 0.0)
    gf = relu(g_last @ params['wg'] + params['bg'])
    s1 = relu(stat.astype(jnp.float32) @ params['ws1'] + params['bs1'])
    s2 = relu(s1 @ params['ws2'] + params['bs2'])
    fused = jnp.concatenate([gf, s2], axis=1)
    wf1 = jnp.concatenate([params['wf1g'], params['wf1s']], axis=0)
    f1 = relu(fused @ wf1 + params['bf1'])
    return f1 @ params['wf2'] + params['bf2']


# --------------------------------- main ----------------------------------

if __name__ == "__main__":
    key = jax.random.PRNGKey(0)
    k_params, k_x, k_stat = jax.random.split(key, 3)
    params = init_params(k_params)
    pslab = prepare_params(params)

    B, T = 2, 8
    x = jax.random.normal(k_x, (B, T, INPUT_SIZE), jnp.float32)
    stat = jax.random.normal(k_stat, (B, STAT_SIZE), jnp.float32)

    out = jax.block_until_ready(forward(pslab, x, stat))

    ref = reference_forward(params, x, stat)
    np.testing.assert_allclose(np.asarray(out), np.asarray(ref),
                               rtol=1e-4, atol=1e-4)
    print("KERNEL_OK")
</pallas_src>

<mosaic_0001>
module attributes {stable_mosaic.version = 11 : i64} {
  func.func @fused_forward_kernel(%arg0: memref<16x31xf32, #tpu.memory_space<vmem>>, %arg1: memref<2x47xf32, #tpu.memory_space<vmem>>, %arg2: memref<296x128xf32, #tpu.memory_space<vmem>>, %arg3: memref<2x2xf32, #tpu.memory_space<vmem>>) attributes {dimension_semantics = [], scalar_prefetch = 0 : i64, scratch_operands = 0 : i64, tpu.core_type = #tpu.core_type<tc>} {
    %c0 = arith.constant 0 : index
    %c0_0 = arith.constant 0 : index
    %0 = vector.load %arg0[%c0, %c0_0] : memref<16x31xf32, #tpu.memory_space<vmem>>, vector<16x31xf32>
    %c0_1 = arith.constant 0 : index
    %c0_2 = arith.constant 0 : index
    %1 = vector.load %arg2[%c0_1, %c0_2] : memref<296x128xf32, #tpu.memory_space<vmem>>, vector<31x96xf32>
    %cst = arith.constant dense<0.000000e+00> : vector<16x96xf32>
    %2 = tpu.matmul %0, %1, %cst {dimension_numbers = #tpu.dot_dimension_numbers<[1], [0], [0], [1], [0, 0, 1, 1], [], []>} : vector<16x31xf32>, vector<31x96xf32>, vector<16x96xf32> -> vector<16x96xf32>
    %c280 = arith.constant 280 : index
    %c0_3 = arith.constant 0 : index
    %3 = vector.load %arg2[%c280, %c0_3] : memref<296x128xf32, #tpu.memory_space<vmem>>, vector<1x96xf32>
    %4 = vector.broadcast %3 : vector<1x96xf32> to vector<16x96xf32>
    %5 = arith.addf %2, %4 : vector<16x96xf32>
    %6 = vector.extract_strided_slice %5 {offsets = [0, 0], sizes = [16, 48], strides = [1, 1]} : vector<16x96xf32> to vector<16x48xf32>
    %7 = vector.extract_strided_slice %5 {offsets = [0, 48], sizes = [16, 48], strides = [1, 1]} : vector<16x96xf32> to vector<16x48xf32>
    %c281 = arith.constant 281 : index
    %c0_4 = arith.constant 0 : index
    %8 = vector.load %arg2[%c281, %c0_4] : memref<296x128xf32, #tpu.memory_space<vmem>>, vector<1x32xf32>
    %9 = vector.extract_strided_slice %8 {offsets = [0, 0], sizes = [1, 16], strides = [1, 1]} : vector<1x32xf32> to vector<1x16xf32>
    %10 = vector.extract_strided_slice %8 {offsets = [0, 16], sizes = [1, 16], strides = [1, 1]} : vector<1x32xf32> to vector<1x16xf32>
    %c32 = arith.constant 32 : index
    %c0_5 = arith.constant 0 : index
    %11 = vector.load %arg2[%c32, %c0_5] : memref<296x128xf32, #tpu.memory_space<vmem>>, vector<16x48xf32>
    %c48 = arith.constant 48 : index
    %c0_6 = arith.constant 0 : index
    %12 = vector.load %arg2[%c48, %c0_6] : memref<296x128xf32, #tpu.memory_space<vmem>>, vector<16x48xf32>
    %cst_7 = arith.constant 0.000000e+00 : f32
    %13 = vector.broadcast %cst_7 : f32 to vector<2x16xf32>
    %cst_8 = arith.constant 0.000000e+00 : f32
    %14 = vector.broadcast %cst_8 : f32 to vector<2x16xf32>
    %cst_9 = arith.constant dense<0.000000e+00> : vector<2x48xf32>
    %15 = tpu.matmul %13, %11, %cst_9 {dimension_numbers = #tpu.dot_dimension_numbers<[1], [0], [0], [1], [0, 0, 1, 1], [], []>} : vector<2x16xf32>, vector<16x48xf32>, vector<2x48xf32> -> vector<2x48xf32>
    %cst_10 = arith.constant dense<0.000000e+00> : vector<2x48xf32>
    %16 = tpu.matmul %14, %12, %cst_10 {dimension_numbers = #tpu.dot_dimension_numbers<[1], [0], [0], [1], [0, 0, 1, 1], [], []>} : vector<2x16xf32>, vector<16x48xf32>, vector<2x48xf32> -> vector<2x48xf32>
    %17 = vector.extract_strided_slice %6 {offsets = [0, 0], sizes = [1, 48], strides = [1, 1]} : vector<16x48xf32> to vector<1x48xf32>
    %18 = vector.extract_strided_slice %6 {offsets = [8, 0], sizes = [1, 48], strides = [1, 1]} : vector<16x48xf32> to vector<1x48xf32>
    %19 = tpu.concatenate %17, %18 in 0 : vector<1x48xf32>, vector<1x48xf32> -> vector<2x48xf32>
    %20 = vector.extract_strided_slice %19 {offsets = [0, 0], sizes = [2, 16], strides = [1, 1]} : vector<2x48xf32> to vector<2x16xf32>
    %21 = vector.extract_strided_slice %15 {offsets = [0, 0], sizes = [2, 16], strides = [1, 1]} : vector<2x48xf32> to vector<2x16xf32>
    %22 = arith.addf %20, %21 : vector<2x16xf32>
    %23 = arith.negf %22 : vector<2x16xf32>
    %24 = math.exp %23 : vector<2x16xf32>
    %cst_11 = arith.constant 1.000000e+00 : f32
    %25 = vector.broadcast %cst_11 : f32 to vector<2x16xf32>
    %26 = arith.addf %25, %24 : vector<2x16xf32>
    %27 = arith.divf %25, %26 : vector<2x16xf32>
    %28 = vector.extract_strided_slice %19 {offsets = [0, 16], sizes = [2, 16], strides = [1, 1]} : vector<2x48xf32> to vector<2x16xf32>
    %29 = vector.extract_strided_slice %15 {offsets = [0, 16], sizes = [2, 16], strides = [1, 1]} : vector<2x48xf32> to vector<2x16xf32>
    %30 = arith.addf %28, %29 : vector<2x16xf32>
    %31 = arith.negf %30 : vector<2x16xf32>
    %32 = math.exp %31 : vector<2x16xf32>
    %cst_12 = arith.constant 1.000000e+00 : f32
    %33 = vector.broadcast %cst_12 : f32 to vector<2x16xf32>
    %34 = arith.addf %33, %32 : vector<2x16xf32>
    %35 = arith.divf %33, %34 : vector<2x16xf32>
    %36 = vector.extract_strided_slice %19 {offsets = [0, 32], sizes = [2, 16], strides = [1, 1]} : vector<2x48xf32> to vector<2x16xf32>
    %37 = vector.extract_strided_slice %15 {offsets = [0, 32], sizes = [2, 16], strides = [1, 1]} : vector<2x48xf32> to vector<2x16xf32>
    %38 = vector.broadcast %9 : vector<1x16xf32> to vector<2x16xf32>
    %39 = arith.addf %37, %38 : vector<2x16xf32>
    %40 = arith.mulf %27, %39 : vector<2x16xf32>
    %41 = arith.addf %36, %40 : vector<2x16xf32>
    %42 = math.tanh %41 : vector<2x16xf32>
    %cst_13 = arith.constant 1.000000e+00 : f32
    %43 = vector.broadcast %cst_13 : f32 to vector<2x16xf32>
    %44 = arith.subf %43, %35 : vector<2x16xf32>
    %45 = arith.mulf %44, %42 : vector<2x16xf32>
    %46 = arith.mulf %35, %13 : vector<2x16xf32>
    %47 = arith.addf %45, %46 : vector<2x16xf32>
    %48 = vector.extract_strided_slice %7 {offsets = [7, 0], sizes = [1, 48], strides = [1, 1]} : vector<16x48xf32> to vector<1x48xf32>
    %49 = vector.extract_strided_slice %7 {offsets = [15, 0], sizes = [1, 48], strides = [1, 1]} : vector<16x48xf32> to vector<1x48xf32>
    %50 = tpu.concatenate %48, %49 in 0 : vector<1x48xf32>, vector<1x48xf32> -> vector<2x48xf32>
    %51 = vector.extract_strided_slice %50 {offsets = [0, 0], sizes = [2, 16], strides = [1, 1]} : vector<2x48xf32> to vector<2x16xf32>
    %52 = vector.extract_strided_slice %16 {offsets = [0, 0], sizes = [2, 16], strides = [1, 1]} : vector<2x48xf32> to vector<2x16xf32>
    %53 = arith.addf %51, %52 : vector<2x16xf32>
    %54 = arith.negf %53 : vector<2x16xf32>
    %55 = math.exp %54 : vector<2x16xf32>
    %cst_14 = arith.constant 1.000000e+00 : f32
    %56 = vector.broadcast %cst_14 : f32 to vector<2x16xf32>
    %57 = arith.addf %56, %55 : vector<2x16xf32>
    %58 = arith.divf %56, %57 : vector<2x16xf32>
    %59 = vector.extract_strided_slice %50 {offsets = [0, 16], sizes = [2, 16], strides = [1, 1]} : vector<2x48xf32> to vector<2x16xf32>
    %60 = vector.extract_strided_slice %16 {offsets = [0, 16], sizes = [2, 16], strides = [1, 1]} : vector<2x48xf32> to vector<2x16xf32>
    %61 = arith.addf %59, %60 : vector<2x16xf32>
    %62 = arith.negf %61 : vector<2x16xf32>
    %63 = math.exp %62 : vector<2x16xf32>
    %cst_15 = arith.constant 1.000000e+00 : f32
    %64 = vector.broadcast %cst_15 : f32 to vector<2x16xf32>
    %65 = arith.addf %64, %63 : vector<2x16xf32>
    %66 = arith.divf %64, %65 : vector<2x16xf32>
    %67 = vector.extract_strided_slice %50 {offsets = [0, 32], sizes = [2, 16], strides = [1, 1]} : vector<2x48xf32> to vector<2x16xf32>
    %68 = vector.extract_strided_slice %16 {offsets = [0, 32], sizes = [2, 16], strides = [1, 1]} : vector<2x48xf32> to vector<2x16xf32>
    %69 = vector.broadcast %10 : vector<1x16xf32> to vector<2x16xf32>
    %70 = arith.addf %68, %69 : vector<2x16xf32>
    %71 = arith.mulf %58, %70 : vector<2x16xf32>
    %72 = arith.addf %67, %71 : vector<2x16xf32>
    %73 = math.tanh %72 : vector<2x16xf32>
    %cst_16 = arith.constant 1.000000e+00 : f32
    %74 = vector.broadcast %cst_16 : f32 to vector<2x16xf32>
    %75 = arith.subf %74, %66 : vector<2x16xf32>
    %76 = arith.mulf %75, %73 : vector<2x16xf32>
    %77 = arith.mulf %66, %14 : vector<2x16xf32>
    %78 = arith.addf %76, %77 : vector<2x16xf32>
    %cst_17 = arith.constant dense<0.000000e+00> : vector<2x48xf32>
    %79 = tpu.matmul %47, %11, %cst_17 {dimension_numbers = #tpu.dot_dimension_numbers<[1], [0], [0], [1], [0, 0, 1, 1], [], []>} : vector<2x16xf32>, vector<16x48xf32>, vector<2x48xf32> -> vector<2x48xf32>
    %cst_18 = arith.constant dense<0.000000e+00> : vector<2x48xf32>
    %80 = tpu.matmul %78, %12, %cst_18 {dimension_numbers = #tpu.dot_dimension_numbers<[1], [0], [0], [1], [0, 0, 1, 1], [], []>} : vector<2x16xf32>, vector<16x48xf32>, vector<2x48xf32> -> vector<2x48xf32>
    %81 = vector.extract_strided_slice %6 {offsets = [1, 0], sizes = [1, 48], strides = [1, 1]} : vector<16x48xf32> to vector<1x48xf32>
    %82 = vector.extract_strided_slice %6 {offsets = [9, 0], sizes = [1, 48], strides = [1, 1]} : vector<16x48xf32> to vector<1x48xf32>
    %83 = tpu.concatenate %81, %82 in 0 : vector<1x48xf32>, vector<1x48xf32> -> vector<2x48xf32>
    %84 = vector.extract_strided_slice %83 {offsets = [0, 0], sizes = [2, 16], strides = [1, 1]} : vector<2x48xf32> to vector<2x16xf32>
    %85 = vector.extract_strided_slice %79 {offsets = [0, 0], sizes = [2, 16], strides = [1, 1]} : vector<2x48xf32> to vector<2x16xf32>
    %86 = arith.addf %84, %85 : vector<2x16xf32>
    %87 = arith.negf %86 : vector<2x16xf32>
    %88 = math.exp %87 : vector<2x16xf32>
    %cst_19 = arith.constant 1.000000e+00 : f32
    %89 = vector.broadcast %cst_19 : f32 to vector<2x16xf32>
    %90 = arith.addf %89, %88 : vector<2x16xf32>
    %91 = arith.divf %89, %90 : vector<2x16xf32>
    %92 = vector.extract_strided_slice %83 {offsets = [0, 16], sizes = [2, 16], strides = [1, 1]} : vector<2x48xf32> to vector<2x16xf32>
    %93 = vector.extract_strided_slice %79 {offsets = [0, 16], sizes = [2, 16], strides = [1, 1]} : vector<2x48xf32> to vector<2x16xf32>
    %94 = arith.addf %92, %93 : vector<2x16xf32>
    %95 = arith.negf %94 : vector<2x16xf32>
    %96 = math.exp %95 : vector<2x16xf32>
    %cst_20 = arith.constant 1.000000e+00 : f32
    %97 = vector.broadcast %cst_20 : f32 to vector<2x16xf32>
    %98 = arith.addf %97, %96 : vector<2x16xf32>
    %99 = arith.divf %97, %98 : vector<2x16xf32>
    %100 = vector.extract_strided_slice %83 {offsets = [0, 32], sizes = [2, 16], strides = [1, 1]} : vector<2x48xf32> to vector<2x16xf32>
    %101 = vector.extract_strided_slice %79 {offsets = [0, 32], sizes = [2, 16], strides = [1, 1]} : vector<2x48xf32> to vector<2x16xf32>
    %102 = vector.broadcast %9 : vector<1x16xf32> to vector<2x16xf32>
    %103 = arith.addf %101, %102 : vector<2x16xf32>
    %104 = arith.mulf %91, %103 : vector<2x16xf32>
    %105 = arith.addf %100, %104 : vector<2x16xf32>
    %106 = math.tanh %105 : vector<2x16xf32>
    %cst_21 = arith.constant 1.000000e+00 : f32
    %107 = vector.broadcast %cst_21 : f32 to vector<2x16xf32>
    %108 = arith.subf %107, %99 : vector<2x16xf32>
    %109 = arith.mulf %108, %106 : vector<2x16xf32>
    %110 = arith.mulf %99, %47 : vector<2x16xf32>
    %111 = arith.addf %109, %110 : vector<2x16xf32>
    %112 = vector.extract_strided_slice %7 {offsets = [6, 0], sizes = [1, 48], strides = [1, 1]} : vector<16x48xf32> to vector<1x48xf32>
    %113 = vector.extract_strided_slice %7 {offsets = [14, 0], sizes = [1, 48], strides = [1, 1]} : vector<16x48xf32> to vector<1x48xf32>
    %114 = tpu.concatenate %112, %113 in 0 : vector<1x48xf32>, vector<1x48xf32> -> vector<2x48xf32>
    %115 = vector.extract_strided_slice %114 {offsets = [0, 0], sizes = [2, 16], strides = [1, 1]} : vector<2x48xf32> to vector<2x16xf32>
    %116 = vector.extract_strided_slice %80 {offsets = [0, 0], sizes = [2, 16], strides = [1, 1]} : vector<2x48xf32> to vector<2x16xf32>
    %117 = arith.addf %115, %116 : vector<2x16xf32>
    %118 = arith.negf %117 : vector<2x16xf32>
    %119 = math.exp %118 : vector<2x16xf32>
    %cst_22 = arith.constant 1.000000e+00 : f32
    %120 = vector.broadcast %cst_22 : f32 to vector<2x16xf32>
    %121 = arith.addf %120, %119 : vector<2x16xf32>
    %122 = arith.divf %120, %121 : vector<2x16xf32>
    %123 = vector.extract_strided_slice %114 {offsets = [0, 16], sizes = [2, 16], strides = [1, 1]} : vector<2x48xf32> to vector<2x16xf32>
    %124 = vector.extract_strided_slice %80 {offsets = [0, 16], sizes = [2, 16], strides = [1, 1]} : vector<2x48xf32> to vector<2x16xf32>
    %125 = arith.addf %123, %124 : vector<2x16xf32>
    %126 = arith.negf %125 : vector<2x16xf32>
    %127 = math.exp %126 : vector<2x16xf32>
    %cst_23 = arith.constant 1.000000e+00 : f32
    %128 = vector.broadcast %cst_23 : f32 to vector<2x16xf32>
    %129 = arith.addf %128, %127 : vector<2x16xf32>
    %130 = arith.divf %128, %129 : vector<2x16xf32>
    %131 = vector.extract_strided_slice %114 {offsets = [0, 32], sizes = [2, 16], strides = [1, 1]} : vector<2x48xf32> to vector<2x16xf32>
    %132 = vector.extract_strided_slice %80 {offsets = [0, 32], sizes = [2, 16], strides = [1, 1]} : vector<2x48xf32> to vector<2x16xf32>
    %133 = vector.broadcast %10 : vector<1x16xf32> to vector<2x16xf32>
    %134 = arith.addf %132, %133 : vector<2x16xf32>
    %135 = arith.mulf %122, %134 : vector<2x16xf32>
    %136 = arith.addf %131, %135 : vector<2x16xf32>
    %137 = math.tanh %136 : vector<2x16xf32>
    %cst_24 = arith.constant 1.000000e+00 : f32
    %138 = vector.broadcast %cst_24 : f32 to vector<2x16xf32>
    %139 = arith.subf %138, %130 : vector<2x16xf32>
    %140 = arith.mulf %139, %137 : vector<2x16xf32>
    %141 = arith.mulf %130, %78 : vector<2x16xf32>
    %142 = arith.addf %140, %141 : vector<2x16xf32>
    %cst_25 = arith.constant dense<0.000000e+00> : vector<2x48xf32>
    %143 = tpu.matmul %111, %11, %cst_25 {dimension_numbers = #tpu.dot_dimension_numbers<[1], [0], [0], [1], [0, 0, 1, 1], [], []>} : vector<2x16xf32>, vector<16x48xf32>, vector<2x48xf32> -> vector<2x48xf32>
    %cst_26 = arith.constant dense<0.000000e+00> : vector<2x48xf32>
    %144 = tpu.matmul %142, %12, %cst_26 {dimension_numbers = #tpu.dot_dimension_numbers<[1], [0], [0], [1], [0, 0, 1, 1], [], []>} : vector<2x16xf32>, vector<16x48xf32>, vector<2x48xf32> -> vector<2x48xf32>
    %145 = vector.extract_strided_slice %6 {offsets = [2, 0], sizes = [1, 48], strides = [1, 1]} : vector<16x48xf32> to vector<1x48xf32>
    %146 = vector.extract_strided_slice %6 {offsets = [10, 0], sizes = [1, 48], strides = [1, 1]} : vector<16x48xf32> to vector<1x48xf32>
    %147 = tpu.concatenate %145, %146 in 0 : vector<1x48xf32>, vector<1x48xf32> -> vector<2x48xf32>
    %148 = vector.extract_strided_slice %147 {offsets = [0, 0], sizes = [2, 16], strides = [1, 1]} : vector<2x48xf32> to vector<2x16xf32>
    %149 = vector.extract_strided_slice %143 {offsets = [0, 0], sizes = [2, 16], strides = [1, 1]} : vector<2x48xf32> to vector<2x16xf32>
    %150 = arith.addf %148, %149 : vector<2x16xf32>
    %151 = arith.negf %150 : vector<2x16xf32>
    %152 = math.exp %151 : vector<2x16xf32>
    %cst_27 = arith.constant 1.000000e+00 : f32
    %153 = vector.broadcast %cst_27 : f32 to vector<2x16xf32>
    %154 = arith.addf %153, %152 : vector<2x16xf32>
    %155 = arith.divf %153, %154 : vector<2x16xf32>
    %156 = vector.extract_strided_slice %147 {offsets = [0, 16], sizes = [2, 16], strides = [1, 1]} : vector<2x48xf32> to vector<2x16xf32>
    %157 = vector.extract_strided_slice %143 {offsets = [0, 16], sizes = [2, 16], strides = [1, 1]} : vector<2x48xf32> to vector<2x16xf32>
    %158 = arith.addf %156, %157 : vector<2x16xf32>
    %159 = arith.negf %158 : vector<2x16xf32>
    %160 = math.exp %159 : vector<2x16xf32>
    %cst_28 = arith.constant 1.000000e+00 : f32
    %161 = vector.broadcast %cst_28 : f32 to vector<2x16xf32>
    %162 = arith.addf %161, %160 : vector<2x16xf32>
    %163 = arith.divf %161, %162 : vector<2x16xf32>
    %164 = vector.extract_strided_slice %147 {offsets = [0, 32], sizes = [2, 16], strides = [1, 1]} : vector<2x48xf32> to vector<2x16xf32>
    %165 = vector.extract_strided_slice %143 {offsets = [0, 32], sizes = [2, 16], strides = [1, 1]} : vector<2x48xf32> to vector<2x16xf32>
    %166 = vector.broadcast %9 : vector<1x16xf32> to vector<2x16xf32>
    %167 = arith.addf %165, %166 : vector<2x16xf32>
    %168 = arith.mulf %155, %167 : vector<2x16xf32>
    %169 = arith.addf %164, %168 : vector<2x16xf32>
    %170 = math.tanh %169 : vector<2x16xf32>
    %cst_29 = arith.constant 1.000000e+00 : f32
    %171 = vector.broadcast %cst_29 : f32 to vector<2x16xf32>
    %172 = arith.subf %171, %163 : vector<2x16xf32>
    %173 = arith.mulf %172, %170 : vector<2x16xf32>
    %174 = arith.mulf %163, %111 : vector<2x16xf32>
    %175 = arith.addf %173, %174 : vector<2x16xf32>
    %176 = vector.extract_strided_slice %7 {offsets = [5, 0], sizes = [1, 48], strides = [1, 1]} : vector<16x48xf32> to vector<1x48xf32>
    %177 = vector.extract_strided_slice %7 {offsets = [13, 0], sizes = [1, 48], strides = [1, 1]} : vector<16x48xf32> to vector<1x48xf32>
    %178 = tpu.concatenate %176, %177 in 0 : vector<1x48xf32>, vector<1x48xf32> -> vector<2x48xf32>
    %179 = vector.extract_strided_slice %178 {offsets = [0, 0], sizes = [2, 16], strides = [1, 1]} : vector<2x48xf32> to vector<2x16xf32>
    %180 = vector.extract_strided_slice %144 {offsets = [0, 0], sizes = [2, 16], strides = [1, 1]} : vector<2x48xf32> to vector<2x16xf32>
    %181 = arith.addf %179, %180 : vector<2x16xf32>
    %182 = arith.negf %181 : vector<2x16xf32>
    %183 = math.exp %182 : vector<2x16xf32>
    %cst_30 = arith.constant 1.000000e+00 : f32
    %184 = vector.broadcast %cst_30 : f32 to vector<2x16xf32>
    %185 = arith.addf %184, %183 : vector<2x16xf32>
    %186 = arith.divf %184, %185 : vector<2x16xf32>
    %187 = vector.extract_strided_slice %178 {offsets = [0, 16], sizes = [2, 16], strides = [1, 1]} : vector<2x48xf32> to vector<2x16xf32>
    %188 = vector.extract_strided_slice %144 {offsets = [0, 16], sizes = [2, 16], strides = [1, 1]} : vector<2x48xf32> to vector<2x16xf32>
    %189 = arith.addf %187, %188 : vector<2x16xf32>
    %190 = arith.negf %189 : vector<2x16xf32>
    %191 = math.exp %190 : vector<2x16xf32>
    %cst_31 = arith.constant 1.000000e+00 : f32
    %192 = vector.broadcast %cst_31 : f32 to vector<2x16xf32>
    %193 = arith.addf %192, %191 : vector<2x16xf32>
    %194 = arith.divf %192, %193 : vector<2x16xf32>
    %195 = vector.extract_strided_slice %178 {offsets = [0, 32], sizes = [2, 16], strides = [1, 1]} : vector<2x48xf32> to vector<2x16xf32>
    %196 = vector.extract_strided_slice %144 {offsets = [0, 32], sizes = [2, 16], strides = [1, 1]} : vector<2x48xf32> to vector<2x16xf32>
    %197 = vector.broadcast %10 : vector<1x16xf32> to vector<2x16xf32>
    %198 = arith.addf %196, %197 : vector<2x16xf32>
    %199 = arith.mulf %186, %198 : vector<2x16xf32>
    %200 = arith.addf %195, %199 : vector<2x16xf32>
    %201 = math.tanh %200 : vector<2x16xf32>
    %cst_32 = arith.constant 1.000000e+00 : f32
    %202 = vector.broadcast %cst_32 : f32 to vector<2x16xf32>
    %203 = arith.subf %202, %194 : vector<2x16xf32>
    %204 = arith.mulf %203, %201 : vector<2x16xf32>
    %205 = arith.mulf %194, %142 : vector<2x16xf32>
    %206 = arith.addf %204, %205 : vector<2x16xf32>
    %cst_33 = arith.constant dense<0.000000e+00> : vector<2x48xf32>
    %207 = tpu.matmul %175, %11, %cst_33 {dimension_numbers = #tpu.dot_dimension_numbers<[1], [0], [0], [1], [0, 0, 1, 1], [], []>} : vector<2x16xf32>, vector<16x48xf32>, vector<2x48xf32> -> vector<2x48xf32>
    %cst_34 = arith.constant dense<0.000000e+00> : vector<2x48xf32>
    %208 = tpu.matmul %206, %12, %cst_34 {dimension_numbers = #tpu.dot_dimension_numbers<[1], [0], [0], [1], [0, 0, 1, 1], [], []>} : vector<2x16xf32>, vector<16x48xf32>, vector<2x48xf32> -> vector<2x48xf32>
    %209 = vector.extract_strided_slice %6 {offsets = [3, 0], sizes = [1, 48], strides = [1, 1]} : vector<16x48xf32> to vector<1x48xf32>
    %210 = vector.extract_strided_slice %6 {offsets = [11, 0], sizes = [1, 48], strides = [1, 1]} : vector<16x48xf32> to vector<1x48xf32>
    %211 = tpu.concatenate %209, %210 in 0 : vector<1x48xf32>, vector<1x48xf32> -> vector<2x48xf32>
    %212 = vector.extract_strided_slice %211 {offsets = [0, 0], sizes = [2, 16], strides = [1, 1]} : vector<2x48xf32> to vector<2x16xf32>
    %213 = vector.extract_strided_slice %207 {offsets = [0, 0], sizes = [2, 16], strides = [1, 1]} : vector<2x48xf32> to vector<2x16xf32>
    %214 = arith.addf %212, %213 : vector<2x16xf32>
    %215 = arith.negf %214 : vector<2x16xf32>
    %216 = math.exp %215 : vector<2x16xf32>
    %cst_35 = arith.constant 1.000000e+00 : f32
    %217 = vector.broadcast %cst_35 : f32 to vector<2x16xf32>
    %218 = arith.addf %217, %216 : vector<2x16xf32>
    %219 = arith.divf %217, %218 : vector<2x16xf32>
    %220 = vector.extract_strided_slice %211 {offsets = [0, 16], sizes = [2, 16], strides = [1, 1]} : vector<2x48xf32> to vector<2x16xf32>
    %221 = vector.extract_strided_slice %207 {offsets = [0, 16], sizes = [2, 16], strides = [1, 1]} : vector<2x48xf32> to vector<2x16xf32>
    %222 = arith.addf %220, %221 : vector<2x16xf32>
    %223 = arith.negf %222 : vector<2x16xf32>
    %224 = math.exp %223 : vector<2x16xf32>
    %cst_36 = arith.constant 1.000000e+00 : f32
    %225 = vector.broadcast %cst_36 : f32 to vector<2x16xf32>
    %226 = arith.addf %225, %224 : vector<2x16xf32>
    %227 = arith.divf %225, %226 : vector<2x16xf32>
    %228 = vector.extract_strided_slice %211 {offsets = [0, 32], sizes = [2, 16], strides = [1, 1]} : vector<2x48xf32> to vector<2x16xf32>
    %229 = vector.extract_strided_slice %207 {offsets = [0, 32], sizes = [2, 16], strides = [1, 1]} : vector<2x48xf32> to vector<2x16xf32>
    %230 = vector.broadcast %9 : vector<1x16xf32> to vector<2x16xf32>
    %231 = arith.addf %229, %230 : vector<2x16xf32>
    %232 = arith.mulf %219, %231 : vector<2x16xf32>
    %233 = arith.addf %228, %232 : vector<2x16xf32>
    %234 = math.tanh %233 : vector<2x16xf32>
    %cst_37 = arith.constant 1.000000e+00 : f32
    %235 = vector.broadcast %cst_37 : f32 to vector<2x16xf32>
    %236 = arith.subf %235, %227 : vector<2x16xf32>
    %237 = arith.mulf %236, %234 : vector<2x16xf32>
    %238 = arith.mulf %227, %175 : vector<2x16xf32>
    %239 = arith.addf %237, %238 : vector<2x16xf32>
    %240 = vector.extract_strided_slice %7 {offsets = [4, 0], sizes = [1, 48], strides = [1, 1]} : vector<16x48xf32> to vector<1x48xf32>
    %241 = vector.extract_strided_slice %7 {offsets = [12, 0], sizes = [1, 48], strides = [1, 1]} : vector<16x48xf32> to vector<1x48xf32>
    %242 = tpu.concatenate %240, %241 in 0 : vector<1x48xf32>, vector<1x48xf32> -> vector<2x48xf32>
    %243 = vector.extract_strided_slice %242 {offsets = [0, 0], sizes = [2, 16], strides = [1, 1]} : vector<2x48xf32> to vector<2x16xf32>
    %244 = vector.extract_strided_slice %208 {offsets = [0, 0], sizes = [2, 16], strides = [1, 1]} : vector<2x48xf32> to vector<2x16xf32>
    %245 = arith.addf %243, %244 : vector<2x16xf32>
    %246 = arith.negf %245 : vector<2x16xf32>
    %247 = math.exp %246 : vector<2x16xf32>
    %cst_38 = arith.constant 1.000000e+00 : f32
    %248 = vector.broadcast %cst_38 : f32 to vector<2x16xf32>
    %249 = arith.addf %248, %247 : vector<2x16xf32>
    %250 = arith.divf %248, %249 : vector<2x16xf32>
    %251 = vector.extract_strided_slice %242 {offsets = [0, 16], sizes = [2, 16], strides = [1, 1]} : vector<2x48xf32> to vector<2x16xf32>
    %252 = vector.extract_strided_slice %208 {offsets = [0, 16], sizes = [2, 16], strides = [1, 1]} : vector<2x48xf32> to vector<2x16xf32>
    %253 = arith.addf %251, %252 : vector<2x16xf32>
    %254 = arith.negf %253 : vector<2x16xf32>
    %255 = math.exp %254 : vector<2x16xf32>
    %cst_39 = arith.constant 1.000000e+00 : f32
    %256 = vector.broadcast %cst_39 : f32 to vector<2x16xf32>
    %257 = arith.addf %256, %255 : vector<2x16xf32>
    %258 = arith.divf %256, %257 : vector<2x16xf32>
    %259 = vector.extract_strided_slice %242 {offsets = [0, 32], sizes = [2, 16], strides = [1, 1]} : vector<2x48xf32> to vector<2x16xf32>
    %260 = vector.extract_strided_slice %208 {offsets = [0, 32], sizes = [2, 16], strides = [1, 1]} : vector<2x48xf32> to vector<2x16xf32>
    %261 = vector.broadcast %10 : vector<1x16xf32> to vector<2x16xf32>
    %262 = arith.addf %260, %261 : vector<2x16xf32>
    %263 = arith.mulf %250, %262 : vector<2x16xf32>
    %264 = arith.addf %259, %263 : vector<2x16xf32>
    %265 = math.tanh %264 : vector<2x16xf32>
    %cst_40 = arith.constant 1.000000e+00 : f32
    %266 = vector.broadcast %cst_40 : f32 to vector<2x16xf32>
    %267 = arith.subf %266, %258 : vector<2x16xf32>
    %268 = arith.mulf %267, %265 : vector<2x16xf32>
    %269 = arith.mulf %258, %206 : vector<2x16xf32>
    %270 = arith.addf %268, %269 : vector<2x16xf32>
    %cst_41 = arith.constant dense<0.000000e+00> : vector<2x48xf32>
    %271 = tpu.matmul %239, %11, %cst_41 {dimension_numbers = #tpu.dot_dimension_numbers<[1], [0], [0], [1], [0, 0, 1, 1], [], []>} : vector<2x16xf32>, vector<16x48xf32>, vector<2x48xf32> -> vector<2x48xf32>
    %cst_42 = arith.constant dense<0.000000e+00> : vector<2x48xf32>
    %272 = tpu.matmul %270, %12, %cst_42 {dimension_numbers = #tpu.dot_dimension_numbers<[1], [0], [0], [1], [0, 0, 1, 1], [], []>} : vector<2x16xf32>, vector<16x48xf32>, vector<2x48xf32> -> vector<2x48xf32>
    %273 = vector.extract_strided_slice %6 {offsets = [4, 0], sizes = [1, 48], strides = [1, 1]} : vector<16x48xf32> to vector<1x48xf32>
    %274 = vector.extract_strided_slice %6 {offsets = [12, 0], sizes = [1, 48], strides = [1, 1]} : vector<16x48xf32> to vector<1x48xf32>
    %275 = tpu.concatenate %273, %274 in 0 : vector<1x48xf32>, vector<1x48xf32> -> vector<2x48xf32>
    %276 = vector.extract_strided_slice %275 {offsets = [0, 0], sizes = [2, 16], strides = [1, 1]} : vector<2x48xf32> to vector<2x16xf32>
    %277 = vector.extract_strided_slice %271 {offsets = [0, 0], sizes = [2, 16], strides = [1, 1]} : vector<2x48xf32> to vector<2x16xf32>
    %278 = arith.addf %276, %277 : vector<2x16xf32>
    %279 = arith.negf %278 : vector<2x16xf32>
    %280 = math.exp %279 : vector<2x16xf32>
    %cst_43 = arith.constant 1.000000e+00 : f32
    %281 = vector.broadcast %cst_43 : f32 to vector<2x16xf32>
    %282 = arith.addf %281, %280 : vector<2x16xf32>
    %283 = arith.divf %281, %282 : vector<2x16xf32>
    %284 = vector.extract_strided_slice %275 {offsets = [0, 16], sizes = [2, 16], strides = [1, 1]} : vector<2x48xf32> to vector<2x16xf32>
    %285 = vector.extract_strided_slice %271 {offsets = [0, 16], sizes = [2, 16], strides = [1, 1]} : vector<2x48xf32> to vector<2x16xf32>
    %286 = arith.addf %284, %285 : vector<2x16xf32>
    %287 = arith.negf %286 : vector<2x16xf32>
    %288 = math.exp %287 : vector<2x16xf32>
    %cst_44 = arith.constant 1.000000e+00 : f32
    %289 = vector.broadcast %cst_44 : f32 to vector<2x16xf32>
    %290 = arith.addf %289, %288 : vector<2x16xf32>
    %291 = arith.divf %289, %290 : vector<2x16xf32>
    %292 = vector.extract_strided_slice %275 {offsets = [0, 32], sizes = [2, 16], strides = [1, 1]} : vector<2x48xf32> to vector<2x16xf32>
    %293 = vector.extract_strided_slice %271 {offsets = [0, 32], sizes = [2, 16], strides = [1, 1]} : vector<2x48xf32> to vector<2x16xf32>
    %294 = vector.broadcast %9 : vector<1x16xf32> to vector<2x16xf32>
    %295 = arith.addf %293, %294 : vector<2x16xf32>
    %296 = arith.mulf %283, %295 : vector<2x16xf32>
    %297 = arith.addf %292, %296 : vector<2x16xf32>
    %298 = math.tanh %297 : vector<2x16xf32>
    %cst_45 = arith.constant 1.000000e+00 : f32
    %299 = vector.broadcast %cst_45 : f32 to vector<2x16xf32>
    %300 = arith.subf %299, %291 : vector<2x16xf32>
    %301 = arith.mulf %300, %298 : vector<2x16xf32>
    %302 = arith.mulf %291, %239 : vector<2x16xf32>
    %303 = arith.addf %301, %302 : vector<2x16xf32>
    %304 = vector.extract_strided_slice %7 {offsets = [3, 0], sizes = [1, 48], strides = [1, 1]} : vector<16x48xf32> to vector<1x48xf32>
    %305 = vector.extract_strided_slice %7 {offsets = [11, 0], sizes = [1, 48], strides = [1, 1]} : vector<16x48xf32> to vector<1x48xf32>
    %306 = tpu.concatenate %304, %305 in 0 : vector<1x48xf32>, vector<1x48xf32> -> vector<2x48xf32>
    %307 = vector.extract_strided_slice %306 {offsets = [0, 0], sizes = [2, 16], strides = [1, 1]} : vector<2x48xf32> to vector<2x16xf32>
    %308 = vector.extract_strided_slice %272 {offsets = [0, 0], sizes = [2, 16], strides = [1, 1]} : vector<2x48xf32> to vector<2x16xf32>
    %309 = arith.addf %307, %308 : vector<2x16xf32>
    %310 = arith.negf %309 : vector<2x16xf32>
    %311 = math.exp %310 : vector<2x16xf32>
    %cst_46 = arith.constant 1.000000e+00 : f32
    %312 = vector.broadcast %cst_46 : f32 to vector<2x16xf32>
    %313 = arith.addf %312, %311 : vector<2x16xf32>
    %314 = arith.divf %312, %313 : vector<2x16xf32>
    %315 = vector.extract_strided_slice %306 {offsets = [0, 16], sizes = [2, 16], strides = [1, 1]} : vector<2x48xf32> to vector<2x16xf32>
    %316 = vector.extract_strided_slice %272 {offsets = [0, 16], sizes = [2, 16], strides = [1, 1]} : vector<2x48xf32> to vector<2x16xf32>
    %317 = arith.addf %315, %316 : vector<2x16xf32>
    %318 = arith.negf %317 : vector<2x16xf32>
    %319 = math.exp %318 : vector<2x16xf32>
    %cst_47 = arith.constant 1.000000e+00 : f32
    %320 = vector.broadcast %cst_47 : f32 to vector<2x16xf32>
    %321 = arith.addf %320, %319 : vector<2x16xf32>
    %322 = arith.divf %320, %321 : vector<2x16xf32>
    %323 = vector.extract_strided_slice %306 {offsets = [0, 32], sizes = [2, 16], strides = [1, 1]} : vector<2x48xf32> to vector<2x16xf32>
    %324 = vector.extract_strided_slice %272 {offsets = [0, 32], sizes = [2, 16], strides = [1, 1]} : vector<2x48xf32> to vector<2x16xf32>
    %325 = vector.broadcast %10 : vector<1x16xf32> to vector<2x16xf32>
    %326 = arith.addf %324, %325 : vector<2x16xf32>
    %327 = arith.mulf %314, %326 : vector<2x16xf32>
    %328 = arith.addf %323, %327 : vector<2x16xf32>
    %329 = math.tanh %328 : vector<2x16xf32>
    %cst_48 = arith.constant 1.000000e+00 : f32
    %330 = vector.broadcast %cst_48 : f32 to vector<2x16xf32>
    %331 = arith.subf %330, %322 : vector<2x16xf32>
    %332 = arith.mulf %331, %329 : vector<2x16xf32>
    %333 = arith.mulf %322, %270 : vector<2x16xf32>
    %334 = arith.addf %332, %333 : vector<2x16xf32>
    %cst_49 = arith.constant dense<0.000000e+00> : vector<2x48xf32>
    %335 = tpu.matmul %303, %11, %cst_49 {dimension_numbers = #tpu.dot_dimension_numbers<[1], [0], [0], [1], [0, 0, 1, 1], [], []>} : vector<2x16xf32>, vector<16x48xf32>, vector<2x48xf32> -> vector<2x48xf32>
    %cst_50 = arith.constant dense<0.000000e+00> : vector<2x48xf32>
    %336 = tpu.matmul %334, %12, %cst_50 {dimension_numbers = #tpu.dot_dimension_numbers<[1], [0], [0], [1], [0, 0, 1, 1], [], []>} : vector<2x16xf32>, vector<16x48xf32>, vector<2x48xf32> -> vector<2x48xf32>
    %337 = vector.extract_strided_slice %6 {offsets = [5, 0], sizes = [1, 48], strides = [1, 1]} : vector<16x48xf32> to vector<1x48xf32>
    %338 = vector.extract_strided_slice %6 {offsets = [13, 0], sizes = [1, 48], strides = [1, 1]} : vector<16x48xf32> to vector<1x48xf32>
    %339 = tpu.concatenate %337, %338 in 0 : vector<1x48xf32>, vector<1x48xf32> -> vector<2x48xf32>
    %340 = vector.extract_strided_slice %339 {offsets = [0, 0], sizes = [2, 16], strides = [1, 1]} : vector<2x48xf32> to vector<2x16xf32>
    %341 = vector.extract_strided_slice %335 {offsets = [0, 0], sizes = [2, 16], strides = [1, 1]} : vector<2x48xf32> to vector<2x16xf32>
    %342 = arith.addf %340, %341 : vector<2x16xf32>
    %343 = arith.negf %342 : vector<2x16xf32>
    %344 = math.exp %343 : vector<2x16xf32>
    %cst_51 = arith.constant 1.000000e+00 : f32
    %345 = vector.broadcast %cst_51 : f32 to vector<2x16xf32>
    %346 = arith.addf %345, %344 : vector<2x16xf32>
    %347 = arith.divf %345, %346 : vector<2x16xf32>
    %348 = vector.extract_strided_slice %339 {offsets = [0, 16], sizes = [2, 16], strides = [1, 1]} : vector<2x48xf32> to vector<2x16xf32>
    %349 = vector.extract_strided_slice %335 {offsets = [0, 16], sizes = [2, 16], strides = [1, 1]} : vector<2x48xf32> to vector<2x16xf32>
    %350 = arith.addf %348, %349 : vector<2x16xf32>
    %351 = arith.negf %350 : vector<2x16xf32>
    %352 = math.exp %351 : vector<2x16xf32>
    %cst_52 = arith.constant 1.000000e+00 : f32
    %353 = vector.broadcast %cst_52 : f32 to vector<2x16xf32>
    %354 = arith.addf %353, %352 : vector<2x16xf32>
    %355 = arith.divf %353, %354 : vector<2x16xf32>
    %356 = vector.extract_strided_slice %339 {offsets = [0, 32], sizes = [2, 16], strides = [1, 1]} : vector<2x48xf32> to vector<2x16xf32>
    %357 = vector.extract_strided_slice %335 {offsets = [0, 32], sizes = [2, 16], strides = [1, 1]} : vector<2x48xf32> to vector<2x16xf32>
    %358 = vector.broadcast %9 : vector<1x16xf32> to vector<2x16xf32>
    %359 = arith.addf %357, %358 : vector<2x16xf32>
    %360 = arith.mulf %347, %359 : vector<2x16xf32>
    %361 = arith.addf %356, %360 : vector<2x16xf32>
    %362 = math.tanh %361 : vector<2x16xf32>
    %cst_53 = arith.constant 1.000000e+00 : f32
    %363 = vector.broadcast %cst_53 : f32 to vector<2x16xf32>
    %364 = arith.subf %363, %355 : vector<2x16xf32>
    %365 = arith.mulf %364, %362 : vector<2x16xf32>
    %366 = arith.mulf %355, %303 : vector<2x16xf32>
    %367 = arith.addf %365, %366 : vector<2x16xf32>
    %368 = vector.extract_strided_slice %7 {offsets = [2, 0], sizes = [1, 48], strides = [1, 1]} : vector<16x48xf32> to vector<1x48xf32>
    %369 = vector.extract_strided_slice %7 {offsets = [10, 0], sizes = [1, 48], strides = [1, 1]} : vector<16x48xf32> to vector<1x48xf32>
    %370 = tpu.concatenate %368, %369 in 0 : vector<1x48xf32>, vector<1x48xf32> -> vector<2x48xf32>
    %371 = vector.extract_strided_slice %370 {offsets = [0, 0], sizes = [2, 16], strides = [1, 1]} : vector<2x48xf32> to vector<2x16xf32>
    %372 = vector.extract_strided_slice %336 {offsets = [0, 0], sizes = [2, 16], strides = [1, 1]} : vector<2x48xf32> to vector<2x16xf32>
    %373 = arith.addf %371, %372 : vector<2x16xf32>
    %374 = arith.negf %373 : vector<2x16xf32>
    %375 = math.exp %374 : vector<2x16xf32>
    %cst_54 = arith.constant 1.000000e+00 : f32
    %376 = vector.broadcast %cst_54 : f32 to vector<2x16xf32>
    %377 = arith.addf %376, %375 : vector<2x16xf32>
    %378 = arith.divf %376, %377 : vector<2x16xf32>
    %379 = vector.extract_strided_slice %370 {offsets = [0, 16], sizes = [2, 16], strides = [1, 1]} : vector<2x48xf32> to vector<2x16xf32>
    %380 = vector.extract_strided_slice %336 {offsets = [0, 16], sizes = [2, 16], strides = [1, 1]} : vector<2x48xf32> to vector<2x16xf32>
    %381 = arith.addf %379, %380 : vector<2x16xf32>
    %382 = arith.negf %381 : vector<2x16xf32>
    %383 = math.exp %382 : vector<2x16xf32>
    %cst_55 = arith.constant 1.000000e+00 : f32
    %384 = vector.broadcast %cst_55 : f32 to vector<2x16xf32>
    %385 = arith.addf %384, %383 : vector<2x16xf32>
    %386 = arith.divf %384, %385 : vector<2x16xf32>
    %387 = vector.extract_strided_slice %370 {offsets = [0, 32], sizes = [2, 16], strides = [1, 1]} : vector<2x48xf32> to vector<2x16xf32>
    %388 = vector.extract_strided_slice %336 {offsets = [0, 32], sizes = [2, 16], strides = [1, 1]} : vector<2x48xf32> to vector<2x16xf32>
    %389 = vector.broadcast %10 : vector<1x16xf32> to vector<2x16xf32>
    %390 = arith.addf %388, %389 : vector<2x16xf32>
    %391 = arith.mulf %378, %390 : vector<2x16xf32>
    %392 = arith.addf %387, %391 : vector<2x16xf32>
    %393 = math.tanh %392 : vector<2x16xf32>
    %cst_56 = arith.constant 1.000000e+00 : f32
    %394 = vector.broadcast %cst_56 : f32 to vector<2x16xf32>
    %395 = arith.subf %394, %386 : vector<2x16xf32>
    %396 = arith.mulf %395, %393 : vector<2x16xf32>
    %397 = arith.mulf %386, %334 : vector<2x16xf32>
    %398 = arith.addf %396, %397 : vector<2x16xf32>
    %cst_57 = arith.constant dense<0.000000e+00> : vector<2x48xf32>
    %399 = tpu.matmul %367, %11, %cst_57 {dimension_numbers = #tpu.dot_dimension_numbers<[1], [0], [0], [1], [0, 0, 1, 1], [], []>} : vector<2x16xf32>, vector<16x48xf32>, vector<2x48xf32> -> vector<2x48xf32>
    %cst_58 = arith.constant dense<0.000000e+00> : vector<2x48xf32>
    %400 = tpu.matmul %398, %12, %cst_58 {dimension_numbers = #tpu.dot_dimension_numbers<[1], [0], [0], [1], [0, 0, 1, 1], [], []>} : vector<2x16xf32>, vector<16x48xf32>, vector<2x48xf32> -> vector<2x48xf32>
    %401 = vector.extract_strided_slice %6 {offsets = [6, 0], sizes = [1, 48], strides = [1, 1]} : vector<16x48xf32> to vector<1x48xf32>
    %402 = vector.extract_strided_slice %6 {offsets = [14, 0], sizes = [1, 48], strides = [1, 1]} : vector<16x48xf32> to vector<1x48xf32>
    %403 = tpu.concatenate %401, %402 in 0 : vector<1x48xf32>, vector<1x48xf32> -> vector<2x48xf32>
    %404 = vector.extract_strided_slice %403 {offsets = [0, 0], sizes = [2, 16], strides = [1, 1]} : vector<2x48xf32> to vector<2x16xf32>
    %405 = vector.extract_strided_slice %399 {offsets = [0, 0], sizes = [2, 16], strides = [1, 1]} : vector<2x48xf32> to vector<2x16xf32>
    %406 = arith.addf %404, %405 : vector<2x16xf32>
    %407 = arith.negf %406 : vector<2x16xf32>
    %408 = math.exp %407 : vector<2x16xf32>
    %cst_59 = arith.constant 1.000000e+00 : f32
    %409 = vector.broadcast %cst_59 : f32 to vector<2x16xf32>
    %410 = arith.addf %409, %408 : vector<2x16xf32>
    %411 = arith.divf %409, %410 : vector<2x16xf32>
    %412 = vector.extract_strided_slice %403 {offsets = [0, 16], sizes = [2, 16], strides = [1, 1]} : vector<2x48xf32> to vector<2x16xf32>
    %413 = vector.extract_strided_slice %399 {offsets = [0, 16], sizes = [2, 16], strides = [1, 1]} : vector<2x48xf32> to vector<2x16xf32>
    %414 = arith.addf %412, %413 : vector<2x16xf32>
    %415 = arith.negf %414 : vector<2x16xf32>
    %416 = math.exp %415 : vector<2x16xf32>
    %cst_60 = arith.constant 1.000000e+00 : f32
    %417 = vector.broadcast %cst_60 : f32 to vector<2x16xf32>
    %418 = arith.addf %417, %416 : vector<2x16xf32>
    %419 = arith.divf %417, %418 : vector<2x16xf32>
    %420 = vector.extract_strided_slice %403 {offsets = [0, 32], sizes = [2, 16], strides = [1, 1]} : vector<2x48xf32> to vector<2x16xf32>
    %421 = vector.extract_strided_slice %399 {offsets = [0, 32], sizes = [2, 16], strides = [1, 1]} : vector<2x48xf32> to vector<2x16xf32>
    %422 = vector.broadcast %9 : vector<1x16xf32> to vector<2x16xf32>
    %423 = arith.addf %421, %422 : vector<2x16xf32>
    %424 = arith.mulf %411, %423 : vector<2x16xf32>
    %425 = arith.addf %420, %424 : vector<2x16xf32>
    %426 = math.tanh %425 : vector<2x16xf32>
    %cst_61 = arith.constant 1.000000e+00 : f32
    %427 = vector.broadcast %cst_61 : f32 to vector<2x16xf32>
    %428 = arith.subf %427, %419 : vector<2x16xf32>
    %429 = arith.mulf %428, %426 : vector<2x16xf32>
    %430 = arith.mulf %419, %367 : vector<2x16xf32>
    %431 = arith.addf %429, %430 : vector<2x16xf32>
    %432 = vector.extract_strided_slice %7 {offsets = [1, 0], sizes = [1, 48], strides = [1, 1]} : vector<16x48xf32> to vector<1x48xf32>
    %433 = vector.extract_strided_slice %7 {offsets = [9, 0], sizes = [1, 48], strides = [1, 1]} : vector<16x48xf32> to vector<1x48xf32>
    %434 = tpu.concatenate %432, %433 in 0 : vector<1x48xf32>, vector<1x48xf32> -> vector<2x48xf32>
    %435 = vector.extract_strided_slice %434 {offsets = [0, 0], sizes = [2, 16], strides = [1, 1]} : vector<2x48xf32> to vector<2x16xf32>
    %436 = vector.extract_strided_slice %400 {offsets = [0, 0], sizes = [2, 16], strides = [1, 1]} : vector<2x48xf32> to vector<2x16xf32>
    %437 = arith.addf %435, %436 : vector<2x16xf32>
    %438 = arith.negf %437 : vector<2x16xf32>
    %439 = math.exp %438 : vector<2x16xf32>
    %cst_62 = arith.constant 1.000000e+00 : f32
    %440 = vector.broadcast %cst_62 : f32 to vector<2x16xf32>
    %441 = arith.addf %440, %439 : vector<2x16xf32>
    %442 = arith.divf %440, %441 : vector<2x16xf32>
    %443 = vector.extract_strided_slice %434 {offsets = [0, 16], sizes = [2, 16], strides = [1, 1]} : vector<2x48xf32> to vector<2x16xf32>
    %444 = vector.extract_strided_slice %400 {offsets = [0, 16], sizes = [2, 16], strides = [1, 1]} : vector<2x48xf32> to vector<2x16xf32>
    %445 = arith.addf %443, %444 : vector<2x16xf32>
    %446 = arith.negf %445 : vector<2x16xf32>
    %447 = math.exp %446 : vector<2x16xf32>
    %cst_63 = arith.constant 1.000000e+00 : f32
    %448 = vector.broadcast %cst_63 : f32 to vector<2x16xf32>
    %449 = arith.addf %448, %447 : vector<2x16xf32>
    %450 = arith.divf %448, %449 : vector<2x16xf32>
    %451 = vector.extract_strided_slice %434 {offsets = [0, 32], sizes = [2, 16], strides = [1, 1]} : vector<2x48xf32> to vector<2x16xf32>
    %452 = vector.extract_strided_slice %400 {offsets = [0, 32], sizes = [2, 16], strides = [1, 1]} : vector<2x48xf32> to vector<2x16xf32>
    %453 = vector.broadcast %10 : vector<1x16xf32> to vector<2x16xf32>
    %454 = arith.addf %452, %453 : vector<2x16xf32>
    %455 = arith.mulf %442, %454 : vector<2x16xf32>
    %456 = arith.addf %451, %455 : vector<2x16xf32>
    %457 = math.tanh %456 : vector<2x16xf32>
    %cst_64 = arith.constant 1.000000e+00 : f32
    %458 = vector.broadcast %cst_64 : f32 to vector<2x16xf32>
    %459 = arith.subf %458, %450 : vector<2x16xf32>
    %460 = arith.mulf %459, %457 : vector<2x16xf32>
    %461 = arith.mulf %450, %398 : vector<2x16xf32>
    %462 = arith.addf %460, %461 : vector<2x16xf32>
    %cst_65 = arith.constant dense<0.000000e+00> : vector<2x48xf32>
    %463 = tpu.matmul %431, %11, %cst_65 {dimension_numbers = #tpu.dot_dimension_numbers<[1], [0], [0], [1], [0, 0, 1, 1], [], []>} : vector<2x16xf32>, vector<16x48xf32>, vector<2x48xf32> -> vector<2x48xf32>
    %cst_66 = arith.constant dense<0.000000e+00> : vector<2x48xf32>
    %464 = tpu.matmul %462, %12, %cst_66 {dimension_numbers = #tpu.dot_dimension_numbers<[1], [0], [0], [1], [0, 0, 1, 1], [], []>} : vector<2x16xf32>, vector<16x48xf32>, vector<2x48xf32> -> vector<2x48xf32>
    %465 = vector.extract_strided_slice %6 {offsets = [7, 0], sizes = [1, 48], strides = [1, 1]} : vector<16x48xf32> to vector<1x48xf32>
    %466 = vector.extract_strided_slice %6 {offsets = [15, 0], sizes = [1, 48], strides = [1, 1]} : vector<16x48xf32> to vector<1x48xf32>
    %467 = tpu.concatenate %465, %466 in 0 : vector<1x48xf32>, vector<1x48xf32> -> vector<2x48xf32>
    %468 = vector.extract_strided_slice %467 {offsets = [0, 0], sizes = [2, 16], strides = [1, 1]} : vector<2x48xf32> to vector<2x16xf32>
    %469 = vector.extract_strided_slice %463 {offsets = [0, 0], sizes = [2, 16], strides = [1, 1]} : vector<2x48xf32> to vector<2x16xf32>
    %470 = arith.addf %468, %469 : vector<2x16xf32>
    %471 = arith.negf %470 : vector<2x16xf32>
    %472 = math.exp %471 : vector<2x16xf32>
    %cst_67 = arith.constant 1.000000e+00 : f32
    %473 = vector.broadcast %cst_67 : f32 to vector<2x16xf32>
    %474 = arith.addf %473, %472 : vector<2x16xf32>
    %475 = arith.divf %473, %474 : vector<2x16xf32>
    %476 = vector.extract_strided_slice %467 {offsets = [0, 16], sizes = [2, 16], strides = [1, 1]} : vector<2x48xf32> to vector<2x16xf32>
    %477 = vector.extract_strided_slice %463 {offsets = [0, 16], sizes = [2, 16], strides = [1, 1]} : vector<2x48xf32> to vector<2x16xf32>
    %478 = arith.addf %476, %477 : vector<2x16xf32>
    %479 = arith.negf %478 : vector<2x16xf32>
    %480 = math.exp %479 : vector<2x16xf32>
    %cst_68 = arith.constant 1.000000e+00 : f32
    %481 = vector.broadcast %cst_68 : f32 to vector<2x16xf32>
    %482 = arith.addf %481, %480 : vector<2x16xf32>
    %483 = arith.divf %481, %482 : vector<2x16xf32>
    %484 = vector.extract_strided_slice %467 {offsets = [0, 32], sizes = [2, 16], strides = [1, 1]} : vector<2x48xf32> to vector<2x16xf32>
    %485 = vector.extract_strided_slice %463 {offsets = [0, 32], sizes = [2, 16], strides = [1, 1]} : vector<2x48xf32> to vector<2x16xf32>
    %486 = vector.broadcast %9 : vector<1x16xf32> to vector<2x16xf32>
    %487 = arith.addf %485, %486 : vector<2x16xf32>
    %488 = arith.mulf %475, %487 : vector<2x16xf32>
    %489 = arith.addf %484, %488 : vector<2x16xf32>
    %490 = math.tanh %489 : vector<2x16xf32>
    %cst_69 = arith.constant 1.000000e+00 : f32
    %491 = vector.broadcast %cst_69 : f32 to vector<2x16xf32>
    %492 = arith.subf %491, %483 : vector<2x16xf32>
    %493 = arith.mulf %492, %490 : vector<2x16xf32>
    %494 = arith.mulf %483, %431 : vector<2x16xf32>
    %495 = arith.addf %493, %494 : vector<2x16xf32>
    %496 = vector.extract_strided_slice %7 {offsets = [0, 0], sizes = [1, 48], strides = [1, 1]} : vector<16x48xf32> to vector<1x48xf32>
    %497 = vector.extract_strided_slice %7 {offsets = [8, 0], sizes = [1, 48], strides = [1, 1]} : vector<16x48xf32> to vector<1x48xf32>
    %498 = tpu.concatenate %496, %497 in 0 : vector<1x48xf32>, vector<1x48xf32> -> vector<2x48xf32>
    %499 = vector.extract_strided_slice %498 {offsets = [0, 0], sizes = [2, 16], strides = [1, 1]} : vector<2x48xf32> to vector<2x16xf32>
    %500 = vector.extract_strided_slice %464 {offsets = [0, 0], sizes = [2, 16], strides = [1, 1]} : vector<2x48xf32> to vector<2x16xf32>
    %501 = arith.addf %499, %500 : vector<2x16xf32>
    %502 = arith.negf %501 : vector<2x16xf32>
    %503 = math.exp %502 : vector<2x16xf32>
    %cst_70 = arith.constant 1.000000e+00 : f32
    %504 = vector.broadcast %cst_70 : f32 to vector<2x16xf32>
    %505 = arith.addf %504, %503 : vector<2x16xf32>
    %506 = arith.divf %504, %505 : vector<2x16xf32>
    %507 = vector.extract_strided_slice %498 {offsets = [0, 16], sizes = [2, 16], strides = [1, 1]} : vector<2x48xf32> to vector<2x16xf32>
    %508 = vector.extract_strided_slice %464 {offsets = [0, 16], sizes = [2, 16], strides = [1, 1]} : vector<2x48xf32> to vector<2x16xf32>
    %509 = arith.addf %507, %508 : vector<2x16xf32>
    %510 = arith.negf %509 : vector<2x16xf32>
    %511 = math.exp %510 : vector<2x16xf32>
    %cst_71 = arith.constant 1.000000e+00 : f32
    %512 = vector.broadcast %cst_71 : f32 to vector<2x16xf32>
    %513 = arith.addf %512, %511 : vector<2x16xf32>
    %514 = arith.divf %512, %513 : vector<2x16xf32>
    %515 = vector.extract_strided_slice %498 {offsets = [0, 32], sizes = [2, 16], strides = [1, 1]} : vector<2x48xf32> to vector<2x16xf32>
    %516 = vector.extract_strided_slice %464 {offsets = [0, 32], sizes = [2, 16], strides = [1, 1]} : vector<2x48xf32> to vector<2x16xf32>
    %517 = vector.broadcast %10 : vector<1x16xf32> to vector<2x16xf32>
    %518 = arith.addf %516, %517 : vector<2x16xf32>
    %519 = arith.mulf %506, %518 : vector<2x16xf32>
    %520 = arith.addf %515, %519 : vector<2x16xf32>
    %521 = math.tanh %520 : vector<2x16xf32>
    %cst_72 = arith.constant 1.000000e+00 : f32
    %522 = vector.broadcast %cst_72 : f32 to vector<2x16xf32>
    %523 = arith.subf %522, %514 : vector<2x16xf32>
    %524 = arith.mulf %523, %521 : vector<2x16xf32>
    %525 = arith.mulf %514, %462 : vector<2x16xf32>
    %526 = arith.addf %524, %525 : vector<2x16xf32>
    %527 = tpu.concatenate %47, %526 in 1 : vector<2x16xf32>, vector<2x16xf32> -> vector<2x32xf32>
    %528 = tpu.concatenate %111, %462 in 1 : vector<2x16xf32>, vector<2x16xf32> -> vector<2x32xf32>
    %529 = tpu.concatenate %175, %398 in 1 : vector<2x16xf32>, vector<2x16xf32> -> vector<2x32xf32>
    %530 = tpu.concatenate %239, %334 in 1 : vector<2x16xf32>, vector<2x16xf32> -> vector<2x32xf32>
    %531 = tpu.concatenate %303, %270 in 1 : vector<2x16xf32>, vector<2x16xf32> -> vector<2x32xf32>
    %532 = tpu.concatenate %367, %206 in 1 : vector<2x16xf32>, vector<2x16xf32> -> vector<2x32xf32>
    %533 = tpu.concatenate %431, %142 in 1 : vector<2x16xf32>, vector<2x16xf32> -> vector<2x32xf32>
    %534 = tpu.concatenate %495, %78 in 1 : vector<2x16xf32>, vector<2x16xf32> -> vector<2x32xf32>
    %535 = tpu.concatenate %527, %528, %529, %530, %531, %532, %533, %534 in 0 : vector<2x32xf32>, vector<2x32xf32>, vector<2x32xf32>, vector<2x32xf32>, vector<2x32xf32>, vector<2x32xf32>, vector<2x32xf32>, vector<2x32xf32> -> vector<16x32xf32>
    %cst_73 = arith.constant dense<0.000000e+00> : vector<16xf32>
    %536 = vector.multi_reduction <add>, %535, %cst_73 [1] : vector<16x32xf32> to vector<16xf32>
    %537 = vector.shape_cast %536 : vector<16xf32> to vector<16x1xf32>
    %cst_74 = arith.constant 3.200000e+01 : f32
    %538 = vector.broadcast %cst_74 : f32 to vector<16x1xf32>
    %539 = arith.divf %537, %538 : vector<16x1xf32>
    %540 = vector.broadcast %539 : vector<16x1xf32> to vector<16x32xf32>
    %541 = arith.subf %535, %540 : vector<16x32xf32>
    %542 = arith.mulf %541, %541 : vector<16x32xf32>
    %cst_75 = arith.constant dense<0.000000e+00> : vector<16xf32>
    %543 = vector.multi_reduction <add>, %542, %cst_75 [1] : vector<16x32xf32> to vector<16xf32>
    %544 = vector.shape_cast %543 : vector<16xf32> to vector<16x1xf32>
    %cst_76 = arith.constant 3.200000e+01 : f32
    %545 = vector.broadcast %cst_76 : f32 to vector<16x1xf32>
    %546 = arith.divf %544, %545 : vector<16x1xf32>
    %cst_77 = arith.constant 9.99999974E-6 : f32
    %547 = vector.broadcast %cst_77 : f32 to vector<16x1xf32>
    %548 = arith.addf %546, %547 : vector<16x1xf32>
    %549 = math.rsqrt %548 : vector<16x1xf32>
    %550 = vector.broadcast %549 : vector<16x1xf32> to vector<16x32xf32>
    %551 = arith.mulf %541, %550 : vector<16x32xf32>
    %c64 = arith.constant 64 : index
    %c0_78 = arith.constant 0 : index
    %552 = vector.load %arg2[%c64, %c0_78] : memref<296x128xf32, #tpu.memory_space<vmem>>, vector<32x96xf32>
    %cst_79 = arith.constant dense<0.000000e+00> : vector<16x96xf32>
    %553 = tpu.matmul %551, %552, %cst_79 {dimension_numbers = #tpu.dot_dimension_numbers<[1], [0], [0], [1], [0, 0, 1, 1], [], []>} : vector<16x32xf32>, vector<32x96xf32>, vector<16x96xf32> -> vector<16x96xf32>
    %c282 = arith.constant 282 : index
    %c0_80 = arith.constant 0 : index
    %554 = vector.load %arg2[%c282, %c0_80] : memref<296x128xf32, #tpu.memory_space<vmem>>, vector<1x96xf32>
    %555 = vector.broadcast %554 : vector<1x96xf32> to vector<16x96xf32>
    %556 = arith.addf %553, %555 : vector<16x96xf32>
    %557 = vector.extract_strided_slice %556 {offsets = [0, 0], sizes = [16, 48], strides = [1, 1]} : vector<16x96xf32> to vector<16x48xf32>
    %558 = vector.extract_strided_slice %556 {offsets = [0, 48], sizes = [16, 48], strides = [1, 1]} : vector<16x96xf32> to vector<16x48xf32>
    %c283 = arith.constant 283 : index
    %c0_81 = arith.constant 0 : index
    %559 = vector.load %arg2[%c283, %c0_81] : memref<296x128xf32, #tpu.memory_space<vmem>>, vector<1x32xf32>
    %560 = vector.extract_strided_slice %559 {offsets = [0, 0], sizes = [1, 16], strides = [1, 1]} : vector<1x32xf32> to vector<1x16xf32>
    %561 = vector.extract_strided_slice %559 {offsets = [0, 16], sizes = [1, 16], strides = [1, 1]} : vector<1x32xf32> to vector<1x16xf32>
    %c96 = arith.constant 96 : index
    %c0_82 = arith.constant 0 : index
    %562 = vector.load %arg2[%c96, %c0_82] : memref<296x128xf32, #tpu.memory_space<vmem>>, vector<16x48xf32>
    %c112 = arith.constant 112 : index
    %c0_83 = arith.constant 0 : index
    %563 = vector.load %arg2[%c112, %c0_83] : memref<296x128xf32, #tpu.memory_space<vmem>>, vector<16x48xf32>
    %cst_84 = arith.constant 0.000000e+00 : f32
    %564 = vector.broadcast %cst_84 : f32 to vector<2x16xf32>
    %cst_85 = arith.constant 0.000000e+00 : f32
    %565 = vector.broadcast %cst_85 : f32 to vector<2x16xf32>
    %cst_86 = arith.constant dense<0.000000e+00> : vector<2x48xf32>
    %566 = tpu.matmul %564, %562, %cst_86 {dimension_numbers = #tpu.dot_dimension_numbers<[1], [0], [0], [1], [0, 0, 1, 1], [], []>} : vector<2x16xf32>, vector<16x48xf32>, vector<2x48xf32> -> vector<2x48xf32>
    %cst_87 = arith.constant dense<0.000000e+00> : vector<2x48xf32>
    %567 = tpu.matmul %565, %563, %cst_87 {dimension_numbers = #tpu.dot_dimension_numbers<[1], [0], [0], [1], [0, 0, 1, 1], [], []>} : vector<2x16xf32>, vector<16x48xf32>, vector<2x48xf32> -> vector<2x48xf32>
    %568 = vector.extract_strided_slice %557 {offsets = [0, 0], sizes = [2, 48], strides = [1, 1]} : vector<16x48xf32> to vector<2x48xf32>
    %569 = vector.extract_strided_slice %568 {offsets = [0, 0], sizes = [2, 16], strides = [1, 1]} : vector<2x48xf32> to vector<2x16xf32>
    %570 = vector.extract_strided_slice %566 {offsets = [0, 0], sizes = [2, 16], strides = [1, 1]} : vector<2x48xf32> to vector<2x16xf32>
    %571 = arith.addf %569, %570 : vector<2x16xf32>
    %572 = arith.negf %571 : vector<2x16xf32>
    %573 = math.exp %572 : vector<2x16xf32>
    %cst_88 = arith.constant 1.000000e+00 : f32
    %574 = vector.broadcast %cst_88 : f32 to vector<2x16xf32>
    %575 = arith.addf %574, %573 : vector<2x16xf32>
    %576 = arith.divf %574, %575 : vector<2x16xf32>
    %577 = vector.extract_strided_slice %568 {offsets = [0, 16], sizes = [2, 16], strides = [1, 1]} : vector<2x48xf32> to vector<2x16xf32>
    %578 = vector.extract_strided_slice %566 {offsets = [0, 16], sizes = [2, 16], strides = [1, 1]} : vector<2x48xf32> to vector<2x16xf32>
    %579 = arith.addf %577, %578 : vector<2x16xf32>
    %580 = arith.negf %579 : vector<2x16xf32>
    %581 = math.exp %580 : vector<2x16xf32>
    %cst_89 = arith.constant 1.000000e+00 : f32
    %582 = vector.broadcast %cst_89 : f32 to vector<2x16xf32>
    %583 = arith.addf %582, %581 : vector<2x16xf32>
    %584 = arith.divf %582, %583 : vector<2x16xf32>
    %585 = vector.extract_strided_slice %568 {offsets = [0, 32], sizes = [2, 16], strides = [1, 1]} : vector<2x48xf32> to vector<2x16xf32>
    %586 = vector.extract_strided_slice %566 {offsets = [0, 32], sizes = [2, 16], strides = [1, 1]} : vector<2x48xf32> to vector<2x16xf32>
    %587 = vector.broadcast %560 : vector<1x16xf32> to vector<2x16xf32>
    %588 = arith.addf %586, %587 : vector<2x16xf32>
    %589 = arith.mulf %576, %588 : vector<2x16xf32>
    %590 = arith.addf %585, %589 : vector<2x16xf32>
    %591 = math.tanh %590 : vector<2x16xf32>
    %cst_90 = arith.constant 1.000000e+00 : f32
    %592 = vector.broadcast %cst_90 : f32 to vector<2x16xf32>
    %593 = arith.subf %592, %584 : vector<2x16xf32>
    %594 = arith.mulf %593, %591 : vector<2x16xf32>
    %595 = arith.mulf %584, %564 : vector<2x16xf32>
    %596 = arith.addf %594, %595 : vector<2x16xf32>
    %597 = vector.extract_strided_slice %558 {offsets = [14, 0], sizes = [2, 48], strides = [1, 1]} : vector<16x48xf32> to vector<2x48xf32>
    %598 = vector.extract_strided_slice %597 {offsets = [0, 0], sizes = [2, 16], strides = [1, 1]} : vector<2x48xf32> to vector<2x16xf32>
    %599 = vector.extract_strided_slice %567 {offsets = [0, 0], sizes = [2, 16], strides = [1, 1]} : vector<2x48xf32> to vector<2x16xf32>
    %600 = arith.addf %598, %599 : vector<2x16xf32>
    %601 = arith.negf %600 : vector<2x16xf32>
    %602 = math.exp %601 : vector<2x16xf32>
    %cst_91 = arith.constant 1.000000e+00 : f32
    %603 = vector.broadcast %cst_91 : f32 to vector<2x16xf32>
    %604 = arith.addf %603, %602 : vector<2x16xf32>
    %605 = arith.divf %603, %604 : vector<2x16xf32>
    %606 = vector.extract_strided_slice %597 {offsets = [0, 16], sizes = [2, 16], strides = [1, 1]} : vector<2x48xf32> to vector<2x16xf32>
    %607 = vector.extract_strided_slice %567 {offsets = [0, 16], sizes = [2, 16], strides = [1, 1]} : vector<2x48xf32> to vector<2x16xf32>
    %608 = arith.addf %606, %607 : vector<2x16xf32>
    %609 = arith.negf %608 : vector<2x16xf32>
    %610 = math.exp %609 : vector<2x16xf32>
    %cst_92 = arith.constant 1.000000e+00 : f32
    %611 = vector.broadcast %cst_92 : f32 to vector<2x16xf32>
    %612 = arith.addf %611, %610 : vector<2x16xf32>
    %613 = arith.divf %611, %612 : vector<2x16xf32>
    %614 = vector.extract_strided_slice %597 {offsets = [0, 32], sizes = [2, 16], strides = [1, 1]} : vector<2x48xf32> to vector<2x16xf32>
    %615 = vector.extract_strided_slice %567 {offsets = [0, 32], sizes = [2, 16], strides = [1, 1]} : vector<2x48xf32> to vector<2x16xf32>
    %616 = vector.broadcast %561 : vector<1x16xf32> to vector<2x16xf32>
    %617 = arith.addf %615, %616 : vector<2x16xf32>
    %618 = arith.mulf %605, %617 : vector<2x16xf32>
    %619 = arith.addf %614, %618 : vector<2x16xf32>
    %620 = math.tanh %619 : vector<2x16xf32>
    %cst_93 = arith.constant 1.000000e+00 : f32
    %621 = vector.broadcast %cst_93 : f32 to vector<2x16xf32>
    %622 = arith.subf %621, %613 : vector<2x16xf32>
    %623 = arith.mulf %622, %620 : vector<2x16xf32>
    %624 = arith.mulf %613, %565 : vector<2x16xf32>
    %625 = arith.addf %623, %624 : vector<2x16xf32>
    %cst_94 = arith.constant dense<0.000000e+00> : vector<2x48xf32>
    %626 = tpu.matmul %596, %562, %cst_94 {dimension_numbers = #tpu.dot_dimension_numbers<[1], [0], [0], [1], [0, 0, 1, 1], [], []>} : vector<2x16xf32>, vector<16x48xf32>, vector<2x48xf32> -> vector<2x48xf32>
    %627 = vector.extract_strided_slice %557 {offsets = [2, 0], sizes = [2, 48], strides = [1, 1]} : vector<16x48xf32> to vector<2x48xf32>
    %628 = vector.extract_strided_slice %627 {offsets = [0, 0], sizes = [2, 16], strides = [1, 1]} : vector<2x48xf32> to vector<2x16xf32>
    %629 = vector.extract_strided_slice %626 {offsets = [0, 0], sizes = [2, 16], strides = [1, 1]} : vector<2x48xf32> to vector<2x16xf32>
    %630 = arith.addf %628, %629 : vector<2x16xf32>
    %631 = arith.negf %630 : vector<2x16xf32>
    %632 = math.exp %631 : vector<2x16xf32>
    %cst_95 = arith.constant 1.000000e+00 : f32
    %633 = vector.broadcast %cst_95 : f32 to vector<2x16xf32>
    %634 = arith.addf %633, %632 : vector<2x16xf32>
    %635 = arith.divf %633, %634 : vector<2x16xf32>
    %636 = vector.extract_strided_slice %627 {offsets = [0, 16], sizes = [2, 16], strides = [1, 1]} : vector<2x48xf32> to vector<2x16xf32>
    %637 = vector.extract_strided_slice %626 {offsets = [0, 16], sizes = [2, 16], strides = [1, 1]} : vector<2x48xf32> to vector<2x16xf32>
    %638 = arith.addf %636, %637 : vector<2x16xf32>
    %639 = arith.negf %638 : vector<2x16xf32>
    %640 = math.exp %639 : vector<2x16xf32>
    %cst_96 = arith.constant 1.000000e+00 : f32
    %641 = vector.broadcast %cst_96 : f32 to vector<2x16xf32>
    %642 = arith.addf %641, %640 : vector<2x16xf32>
    %643 = arith.divf %641, %642 : vector<2x16xf32>
    %644 = vector.extract_strided_slice %627 {offsets = [0, 32], sizes = [2, 16], strides = [1, 1]} : vector<2x48xf32> to vector<2x16xf32>
    %645 = vector.extract_strided_slice %626 {offsets = [0, 32], sizes = [2, 16], strides = [1, 1]} : vector<2x48xf32> to vector<2x16xf32>
    %646 = vector.broadcast %560 : vector<1x16xf32> to vector<2x16xf32>
    %647 = arith.addf %645, %646 : vector<2x16xf32>
    %648 = arith.mulf %635, %647 : vector<2x16xf32>
    %649 = arith.addf %644, %648 : vector<2x16xf32>
    %650 = math.tanh %649 : vector<2x16xf32>
    %cst_97 = arith.constant 1.000000e+00 : f32
    %651 = vector.broadcast %cst_97 : f32 to vector<2x16xf32>
    %652 = arith.subf %651, %643 : vector<2x16xf32>
    %653 = arith.mulf %652, %650 : vector<2x16xf32>
    %654 = arith.mulf %643, %596 : vector<2x16xf32>
    %655 = arith.addf %653, %654 : vector<2x16xf32>
    %cst_98 = arith.constant dense<0.000000e+00> : vector<2x48xf32>
    %656 = tpu.matmul %655, %562, %cst_98 {dimension_numbers = #tpu.dot_dimension_numbers<[1], [0], [0], [1], [0, 0, 1, 1], [], []>} : vector<2x16xf32>, vector<16x48xf32>, vector<2x48xf32> -> vector<2x48xf32>
    %657 = vector.extract_strided_slice %557 {offsets = [4, 0], sizes = [2, 48], strides = [1, 1]} : vector<16x48xf32> to vector<2x48xf32>
    %658 = vector.extract_strided_slice %657 {offsets = [0, 0], sizes = [2, 16], strides = [1, 1]} : vector<2x48xf32> to vector<2x16xf32>
    %659 = vector.extract_strided_slice %656 {offsets = [0, 0], sizes = [2, 16], strides = [1, 1]} : vector<2x48xf32> to vector<2x16xf32>
    %660 = arith.addf %658, %659 : vector<2x16xf32>
    %661 = arith.negf %660 : vector<2x16xf32>
    %662 = math.exp %661 : vector<2x16xf32>
    %cst_99 = arith.constant 1.000000e+00 : f32
    %663 = vector.broadcast %cst_99 : f32 to vector<2x16xf32>
    %664 = arith.addf %663, %662 : vector<2x16xf32>
    %665 = arith.divf %663, %664 : vector<2x16xf32>
    %666 = vector.extract_strided_slice %657 {offsets = [0, 16], sizes = [2, 16], strides = [1, 1]} : vector<2x48xf32> to vector<2x16xf32>
    %667 = vector.extract_strided_slice %656 {offsets = [0, 16], sizes = [2, 16], strides = [1, 1]} : vector<2x48xf32> to vector<2x16xf32>
    %668 = arith.addf %666, %667 : vector<2x16xf32>
    %669 = arith.negf %668 : vector<2x16xf32>
    %670 = math.exp %669 : vector<2x16xf32>
    %cst_100 = arith.constant 1.000000e+00 : f32
    %671 = vector.broadcast %cst_100 : f32 to vector<2x16xf32>
    %672 = arith.addf %671, %670 : vector<2x16xf32>
    %673 = arith.divf %671, %672 : vector<2x16xf32>
    %674 = vector.extract_strided_slice %657 {offsets = [0, 32], sizes = [2, 16], strides = [1, 1]} : vector<2x48xf32> to vector<2x16xf32>
    %675 = vector.extract_strided_slice %656 {offsets = [0, 32], sizes = [2, 16], strides = [1, 1]} : vector<2x48xf32> to vector<2x16xf32>
    %676 = vector.broadcast %560 : vector<1x16xf32> to vector<2x16xf32>
    %677 = arith.addf %675, %676 : vector<2x16xf32>
    %678 = arith.mulf %665, %677 : vector<2x16xf32>
    %679 = arith.addf %674, %678 : vector<2x16xf32>
    %680 = math.tanh %679 : vector<2x16xf32>
    %cst_101 = arith.constant 1.000000e+00 : f32
    %681 = vector.broadcast %cst_101 : f32 to vector<2x16xf32>
    %682 = arith.subf %681, %673 : vector<2x16xf32>
    %683 = arith.mulf %682, %680 : vector<2x16xf32>
    %684 = arith.mulf %673, %655 : vector<2x16xf32>
    %685 = arith.addf %683, %684 : vector<2x16xf32>
    %cst_102 = arith.constant dense<0.000000e+00> : vector<2x48xf32>
    %686 = tpu.matmul %685, %562, %cst_102 {dimension_numbers = #tpu.dot_dimension_numbers<[1], [0], [0], [1], [0, 0, 1, 1], [], []>} : vector<2x16xf32>, vector<16x48xf32>, vector<2x48xf32> -> vector<2x48xf32>
    %687 = vector.extract_strided_slice %557 {offsets = [6, 0], sizes = [2, 48], strides = [1, 1]} : vector<16x48xf32> to vector<2x48xf32>
    %688 = vector.extract_strided_slice %687 {offsets = [0, 0], sizes = [2, 16], strides = [1, 1]} : vector<2x48xf32> to vector<2x16xf32>
    %689 = vector.extract_strided_slice %686 {offsets = [0, 0], sizes = [2, 16], strides = [1, 1]} : vector<2x48xf32> to vector<2x16xf32>
    %690 = arith.addf %688, %689 : vector<2x16xf32>
    %691 = arith.negf %690 : vector<2x16xf32>
    %692 = math.exp %691 : vector<2x16xf32>
    %cst_103 = arith.constant 1.000000e+00 : f32
    %693 = vector.broadcast %cst_103 : f32 to vector<2x16xf32>
    %694 = arith.addf %693, %692 : vector<2x16xf32>
    %695 = arith.divf %693, %694 : vector<2x16xf32>
    %696 = vector.extract_strided_slice %687 {offsets = [0, 16], sizes = [2, 16], strides = [1, 1]} : vector<2x48xf32> to vector<2x16xf32>
    %697 = vector.extract_strided_slice %686 {offsets = [0, 16], sizes = [2, 16], strides = [1, 1]} : vector<2x48xf32> to vector<2x16xf32>
    %698 = arith.addf %696, %697 : vector<2x16xf32>
    %699 = arith.negf %698 : vector<2x16xf32>
    %700 = math.exp %699 : vector<2x16xf32>
    %cst_104 = arith.constant 1.000000e+00 : f32
    %701 = vector.broadcast %cst_104 : f32 to vector<2x16xf32>
    %702 = arith.addf %701, %700 : vector<2x16xf32>
    %703 = arith.divf %701, %702 : vector<2x16xf32>
    %704 = vector.extract_strided_slice %687 {offsets = [0, 32], sizes = [2, 16], strides = [1, 1]} : vector<2x48xf32> to vector<2x16xf32>
    %705 = vector.extract_strided_slice %686 {offsets = [0, 32], sizes = [2, 16], strides = [1, 1]} : vector<2x48xf32> to vector<2x16xf32>
    %706 = vector.broadcast %560 : vector<1x16xf32> to vector<2x16xf32>
    %707 = arith.addf %705, %706 : vector<2x16xf32>
    %708 = arith.mulf %695, %707 : vector<2x16xf32>
    %709 = arith.addf %704, %708 : vector<2x16xf32>
    %710 = math.tanh %709 : vector<2x16xf32>
    %cst_105 = arith.constant 1.000000e+00 : f32
    %711 = vector.broadcast %cst_105 : f32 to vector<2x16xf32>
    %712 = arith.subf %711, %703 : vector<2x16xf32>
    %713 = arith.mulf %712, %710 : vector<2x16xf32>
    %714 = arith.mulf %703, %685 : vector<2x16xf32>
    %715 = arith.addf %713, %714 : vector<2x16xf32>
    %cst_106 = arith.constant dense<0.000000e+00> : vector<2x48xf32>
    %716 = tpu.matmul %715, %562, %cst_106 {dimension_numbers = #tpu.dot_dimension_numbers<[1], [0], [0], [1], [0, 0, 1, 1], [], []>} : vector<2x16xf32>, vector<16x48xf32>, vector<2x48xf32> -> vector<2x48xf32>
    %717 = vector.extract_strided_slice %557 {offsets = [8, 0], sizes = [2, 48], strides = [1, 1]} : vector<16x48xf32> to vector<2x48xf32>
    %718 = vector.extract_strided_slice %717 {offsets = [0, 0], sizes = [2, 16], strides = [1, 1]} : vector<2x48xf32> to vector<2x16xf32>
    %719 = vector.extract_strided_slice %716 {offsets = [0, 0], sizes = [2, 16], strides = [1, 1]} : vector<2x48xf32> to vector<2x16xf32>
    %720 = arith.addf %718, %719 : vector<2x16xf32>
    %721 = arith.negf %720 : vector<2x16xf32>
    %722 = math.exp %721 : vector<2x16xf32>
    %cst_107 = arith.constant 1.000000e+00 : f32
    %723 = vector.broadcast %cst_107 : f32 to vector<2x16xf32>
    %724 = arith.addf %723, %722 : vector<2x16xf32>
    %725 = arith.divf %723, %724 : vector<2x16xf32>
    %726 = vector.extract_strided_slice %717 {offsets = [0, 16], sizes = [2, 16], strides = [1, 1]} : vector<2x48xf32> to vector<2x16xf32>
    %727 = vector.extract_strided_slice %716 {offsets = [0, 16], sizes = [2, 16], strides = [1, 1]} : vector<2x48xf32> to vector<2x16xf32>
    %728 = arith.addf %726, %727 : vector<2x16xf32>
    %729 = arith.negf %728 : vector<2x16xf32>
    %730 = math.exp %729 : vector<2x16xf32>
    %cst_108 = arith.constant 1.000000e+00 : f32
    %731 = vector.broadcast %cst_108 : f32 to vector<2x16xf32>
    %732 = arith.addf %731, %730 : vector<2x16xf32>
    %733 = arith.divf %731, %732 : vector<2x16xf32>
    %734 = vector.extract_strided_slice %717 {offsets = [0, 32], sizes = [2, 16], strides = [1, 1]} : vector<2x48xf32> to vector<2x16xf32>
    %735 = vector.extract_strided_slice %716 {offsets = [0, 32], sizes = [2, 16], strides = [1, 1]} : vector<2x48xf32> to vector<2x16xf32>
    %736 = vector.broadcast %560 : vector<1x16xf32> to vector<2x16xf32>
    %737 = arith.addf %735, %736 : vector<2x16xf32>
    %738 = arith.mulf %725, %737 : vector<2x16xf32>
    %739 = arith.addf %734, %738 : vector<2x16xf32>
    %740 = math.tanh %739 : vector<2x16xf32>
    %cst_109 = arith.constant 1.000000e+00 : f32
    %741 = vector.broadcast %cst_109 : f32 to vector<2x16xf32>
    %742 = arith.subf %741, %733 : vector<2x16xf32>
    %743 = arith.mulf %742, %740 : vector<2x16xf32>
    %744 = arith.mulf %733, %715 : vector<2x16xf32>
    %745 = arith.addf %743, %744 : vector<2x16xf32>
    %cst_110 = arith.constant dense<0.000000e+00> : vector<2x48xf32>
    %746 = tpu.matmul %745, %562, %cst_110 {dimension_numbers = #tpu.dot_dimension_numbers<[1], [0], [0], [1], [0, 0, 1, 1], [], []>} : vector<2x16xf32>, vector<16x48xf32>, vector<2x48xf32> -> vector<2x48xf32>
    %747 = vector.extract_strided_slice %557 {offsets = [10, 0], sizes = [2, 48], strides = [1, 1]} : vector<16x48xf32> to vector<2x48xf32>
    %748 = vector.extract_strided_slice %747 {offsets = [0, 0], sizes = [2, 16], strides = [1, 1]} : vector<2x48xf32> to vector<2x16xf32>
    %749 = vector.extract_strided_slice %746 {offsets = [0, 0], sizes = [2, 16], strides = [1, 1]} : vector<2x48xf32> to vector<2x16xf32>
    %750 = arith.addf %748, %749 : vector<2x16xf32>
    %751 = arith.negf %750 : vector<2x16xf32>
    %752 = math.exp %751 : vector<2x16xf32>
    %cst_111 = arith.constant 1.000000e+00 : f32
    %753 = vector.broadcast %cst_111 : f32 to vector<2x16xf32>
    %754 = arith.addf %753, %752 : vector<2x16xf32>
    %755 = arith.divf %753, %754 : vector<2x16xf32>
    %756 = vector.extract_strided_slice %747 {offsets = [0, 16], sizes = [2, 16], strides = [1, 1]} : vector<2x48xf32> to vector<2x16xf32>
    %757 = vector.extract_strided_slice %746 {offsets = [0, 16], sizes = [2, 16], strides = [1, 1]} : vector<2x48xf32> to vector<2x16xf32>
    %758 = arith.addf %756, %757 : vector<2x16xf32>
    %759 = arith.negf %758 : vector<2x16xf32>
    %760 = math.exp %759 : vector<2x16xf32>
    %cst_112 = arith.constant 1.000000e+00 : f32
    %761 = vector.broadcast %cst_112 : f32 to vector<2x16xf32>
    %762 = arith.addf %761, %760 : vector<2x16xf32>
    %763 = arith.divf %761, %762 : vector<2x16xf32>
    %764 = vector.extract_strided_slice %747 {offsets = [0, 32], sizes = [2, 16], strides = [1, 1]} : vector<2x48xf32> to vector<2x16xf32>
    %765 = vector.extract_strided_slice %746 {offsets = [0, 32], sizes = [2, 16], strides = [1, 1]} : vector<2x48xf32> to vector<2x16xf32>
    %766 = vector.broadcast %560 : vector<1x16xf32> to vector<2x16xf32>
    %767 = arith.addf %765, %766 : vector<2x16xf32>
    %768 = arith.mulf %755, %767 : vector<2x16xf32>
    %769 = arith.addf %764, %768 : vector<2x16xf32>
    %770 = math.tanh %769 : vector<2x16xf32>
    %cst_113 = arith.constant 1.000000e+00 : f32
    %771 = vector.broadcast %cst_113 : f32 to vector<2x16xf32>
    %772 = arith.subf %771, %763 : vector<2x16xf32>
    %773 = arith.mulf %772, %770 : vector<2x16xf32>
    %774 = arith.mulf %763, %745 : vector<2x16xf32>
    %775 = arith.addf %773, %774 : vector<2x16xf32>
    %cst_114 = arith.constant dense<0.000000e+00> : vector<2x48xf32>
    %776 = tpu.matmul %775, %562, %cst_114 {dimension_numbers = #tpu.dot_dimension_numbers<[1], [0], [0], [1], [0, 0, 1, 1], [], []>} : vector<2x16xf32>, vector<16x48xf32>, vector<2x48xf32> -> vector<2x48xf32>
    %777 = vector.extract_strided_slice %557 {offsets = [12, 0], sizes = [2, 48], strides = [1, 1]} : vector<16x48xf32> to vector<2x48xf32>
    %778 = vector.extract_strided_slice %777 {offsets = [0, 0], sizes = [2, 16], strides = [1, 1]} : vector<2x48xf32> to vector<2x16xf32>
    %779 = vector.extract_strided_slice %776 {offsets = [0, 0], sizes = [2, 16], strides = [1, 1]} : vector<2x48xf32> to vector<2x16xf32>
    %780 = arith.addf %778, %779 : vector<2x16xf32>
    %781 = arith.negf %780 : vector<2x16xf32>
    %782 = math.exp %781 : vector<2x16xf32>
    %cst_115 = arith.constant 1.000000e+00 : f32
    %783 = vector.broadcast %cst_115 : f32 to vector<2x16xf32>
    %784 = arith.addf %783, %782 : vector<2x16xf32>
    %785 = arith.divf %783, %784 : vector<2x16xf32>
    %786 = vector.extract_strided_slice %777 {offsets = [0, 16], sizes = [2, 16], strides = [1, 1]} : vector<2x48xf32> to vector<2x16xf32>
    %787 = vector.extract_strided_slice %776 {offsets = [0, 16], sizes = [2, 16], strides = [1, 1]} : vector<2x48xf32> to vector<2x16xf32>
    %788 = arith.addf %786, %787 : vector<2x16xf32>
    %789 = arith.negf %788 : vector<2x16xf32>
    %790 = math.exp %789 : vector<2x16xf32>
    %cst_116 = arith.constant 1.000000e+00 : f32
    %791 = vector.broadcast %cst_116 : f32 to vector<2x16xf32>
    %792 = arith.addf %791, %790 : vector<2x16xf32>
    %793 = arith.divf %791, %792 : vector<2x16xf32>
    %794 = vector.extract_strided_slice %777 {offsets = [0, 32], sizes = [2, 16], strides = [1, 1]} : vector<2x48xf32> to vector<2x16xf32>
    %795 = vector.extract_strided_slice %776 {offsets = [0, 32], sizes = [2, 16], strides = [1, 1]} : vector<2x48xf32> to vector<2x16xf32>
    %796 = vector.broadcast %560 : vector<1x16xf32> to vector<2x16xf32>
    %797 = arith.addf %795, %796 : vector<2x16xf32>
    %798 = arith.mulf %785, %797 : vector<2x16xf32>
    %799 = arith.addf %794, %798 : vector<2x16xf32>
    %800 = math.tanh %799 : vector<2x16xf32>
    %cst_117 = arith.constant 1.000000e+00 : f32
    %801 = vector.broadcast %cst_117 : f32 to vector<2x16xf32>
    %802 = arith.subf %801, %793 : vector<2x16xf32>
    %803 = arith.mulf %802, %800 : vector<2x16xf32>
    %804 = arith.mulf %793, %775 : vector<2x16xf32>
    %805 = arith.addf %803, %804 : vector<2x16xf32>
    %cst_118 = arith.constant dense<0.000000e+00> : vector<2x48xf32>
    %806 = tpu.matmul %805, %562, %cst_118 {dimension_numbers = #tpu.dot_dimension_numbers<[1], [0], [0], [1], [0, 0, 1, 1], [], []>} : vector<2x16xf32>, vector<16x48xf32>, vector<2x48xf32> -> vector<2x48xf32>
    %807 = vector.extract_strided_slice %557 {offsets = [14, 0], sizes = [2, 48], strides = [1, 1]} : vector<16x48xf32> to vector<2x48xf32>
    %808 = vector.extract_strided_slice %807 {offsets = [0, 0], sizes = [2, 16], strides = [1, 1]} : vector<2x48xf32> to vector<2x16xf32>
    %809 = vector.extract_strided_slice %806 {offsets = [0, 0], sizes = [2, 16], strides = [1, 1]} : vector<2x48xf32> to vector<2x16xf32>
    %810 = arith.addf %808, %809 : vector<2x16xf32>
    %811 = arith.negf %810 : vector<2x16xf32>
    %812 = math.exp %811 : vector<2x16xf32>
    %cst_119 = arith.constant 1.000000e+00 : f32
    %813 = vector.broadcast %cst_119 : f32 to vector<2x16xf32>
    %814 = arith.addf %813, %812 : vector<2x16xf32>
    %815 = arith.divf %813, %814 : vector<2x16xf32>
    %816 = vector.extract_strided_slice %807 {offsets = [0, 16], sizes = [2, 16], strides = [1, 1]} : vector<2x48xf32> to vector<2x16xf32>
    %817 = vector.extract_strided_slice %806 {offsets = [0, 16], sizes = [2, 16], strides = [1, 1]} : vector<2x48xf32> to vector<2x16xf32>
    %818 = arith.addf %816, %817 : vector<2x16xf32>
    %819 = arith.negf %818 : vector<2x16xf32>
    %820 = math.exp %819 : vector<2x16xf32>
    %cst_120 = arith.constant 1.000000e+00 : f32
    %821 = vector.broadcast %cst_120 : f32 to vector<2x16xf32>
    %822 = arith.addf %821, %820 : vector<2x16xf32>
    %823 = arith.divf %821, %822 : vector<2x16xf32>
    %824 = vector.extract_strided_slice %807 {offsets = [0, 32], sizes = [2, 16], strides = [1, 1]} : vector<2x48xf32> to vector<2x16xf32>
    %825 = vector.extract_strided_slice %806 {offsets = [0, 32], sizes = [2, 16], strides = [1, 1]} : vector<2x48xf32> to vector<2x16xf32>
    %826 = vector.broadcast %560 : vector<1x16xf32> to vector<2x16xf32>
    %827 = arith.addf %825, %826 : vector<2x16xf32>
    %828 = arith.mulf %815, %827 : vector<2x16xf32>
    %829 = arith.addf %824, %828 : vector<2x16xf32>
    %830 = math.tanh %829 : vector<2x16xf32>
    %cst_121 = arith.constant 1.000000e+00 : f32
    %831 = vector.broadcast %cst_121 : f32 to vector<2x16xf32>
    %832 = arith.subf %831, %823 : vector<2x16xf32>
    %833 = arith.mulf %832, %830 : vector<2x16xf32>
    %834 = arith.mulf %823, %805 : vector<2x16xf32>
    %835 = arith.addf %833, %834 : vector<2x16xf32>
    %836 = tpu.concatenate %835, %625 in 1 : vector<2x16xf32>, vector<2x16xf32> -> vector<2x32xf32>
    %837 = vector.extract_strided_slice %551 {offsets = [14, 0], sizes = [2, 32], strides = [1, 1]} : vector<16x32xf32> to vector<2x32xf32>
    %c284 = arith.constant 284 : index
    %c0_122 = arith.constant 0 : index
    %838 = vector.load %arg2[%c284, %c0_122] : memref<296x128xf32, #tpu.memory_space<vmem>>, vector<1x32xf32>
    %839 = vector.broadcast %838 : vector<1x32xf32> to vector<2x32xf32>
    %840 = arith.mulf %837, %839 : vector<2x32xf32>
    %c285 = arith.constant 285 : index
    %c0_123 = arith.constant 0 : index
    %841 = vector.load %arg2[%c285, %c0_123] : memref<296x128xf32, #tpu.memory_space<vmem>>, vector<1x32xf32>
    %842 = vector.broadcast %841 : vector<1x32xf32> to vector<2x32xf32>
    %843 = arith.addf %840, %842 : vector<2x32xf32>
    %844 = arith.addf %836, %843 : vector<2x32xf32>
    %c286 = arith.constant 286 : index
    %c0_124 = arith.constant 0 : index
    %845 = vector.load %arg2[%c286, %c0_124] : memref<296x128xf32, #tpu.memory_space<vmem>>, vector<1x32xf32>
    %c287 = arith.constant 287 : index
    %c0_125 = arith.constant 0 : index
    %846 = vector.load %arg2[%c287, %c0_125] : memref<296x128xf32, #tpu.memory_space<vmem>>, vector<1x32xf32>
    %cst_126 = arith.constant dense<0.000000e+00> : vector<2xf32>
    %847 = vector.multi_reduction <add>, %844, %cst_126 [1] : vector<2x32xf32> to vector<2xf32>
    %848 = vector.shape_cast %847 : vector<2xf32> to vector<2x1xf32>
    %cst_127 = arith.constant 3.200000e+01 : f32
    %849 = vector.broadcast %cst_127 : f32 to vector<2x1xf32>
    %850 = arith.divf %848, %849 : vector<2x1xf32>
    %851 = vector.broadcast %850 : vector<2x1xf32> to vector<2x32xf32>
    %852 = arith.subf %844, %851 : vector<2x32xf32>
    %853 = arith.mulf %852, %852 : vector<2x32xf32>
    %cst_128 = arith.constant dense<0.000000e+00> : vector<2xf32>
    %854 = vector.multi_reduction <add>, %853, %cst_128 [1] : vector<2x32xf32> to vector<2xf32>
    %855 = vector.shape_cast %854 : vector<2xf32> to vector<2x1xf32>
    %cst_129 = arith.constant 3.200000e+01 : f32
    %856 = vector.broadcast %cst_129 : f32 to vector<2x1xf32>
    %857 = arith.divf %855, %856 : vector<2x1xf32>
    %cst_130 = arith.constant 9.99999974E-6 : f32
    %858 = vector.broadcast %cst_130 : f32 to vector<2x1xf32>
    %859 = arith.addf %857, %858 : vector<2x1xf32>
    %860 = math.rsqrt %859 : vector<2x1xf32>
    %861 = vector.broadcast %860 : vector<2x1xf32> to vector<2x32xf32>
    %862 = arith.mulf %852, %861 : vector<2x32xf32>
    %863 = vector.broadcast %845 : vector<1x32xf32> to vector<2x32xf32>
    %864 = arith.mulf %862, %863 : vector<2x32xf32>
    %865 = vector.broadcast %846 : vector<1x32xf32> to vector<2x32xf32>
    %866 = arith.addf %864, %865 : vector<2x32xf32>
    %c128 = arith.constant 128 : index
    %c0_131 = arith.constant 0 : index
    %867 = vector.load %arg2[%c128, %c0_131] : memref<296x128xf32, #tpu.memory_space<vmem>>, vector<32x16xf32>
    %cst_132 = arith.constant dense<0.000000e+00> : vector<2x16xf32>
    %868 = tpu.matmul %866, %867, %cst_132 {dimension_numbers = #tpu.dot_dimension_numbers<[1], [0], [0], [1], [0, 0, 1, 1], [], []>} : vector<2x32xf32>, vector<32x16xf32>, vector<2x16xf32> -> vector<2x16xf32>
    %c288 = arith.constant 288 : index
    %c0_133 = arith.constant 0 : index
    %869 = vector.load %arg2[%c288, %c0_133] : memref<296x128xf32, #tpu.memory_space<vmem>>, vector<1x16xf32>
    %870 = vector.broadcast %869 : vector<1x16xf32> to vector<2x16xf32>
    %871 = arith.addf %868, %870 : vector<2x16xf32>
    %cst_134 = arith.constant 0.000000e+00 : f32
    %872 = vector.broadcast %cst_134 : f32 to vector<2x16xf32>
    %873 = arith.maximumf %871, %872 : vector<2x16xf32>
    %c0_135 = arith.constant 0 : index
    %c0_136 = arith.constant 0 : index
    %874 = vector.load %arg1[%c0_135, %c0_136] : memref<2x47xf32, #tpu.memory_space<vmem>>, vector<2x47xf32>
    %c160 = arith.constant 160 : index
    %c0_137 = arith.constant 0 : index
    %875 = vector.load %arg2[%c160, %c0_137] : memref<296x128xf32, #tpu.memory_space<vmem>>, vector<47x23xf32>
    %cst_138 = arith.constant dense<0.000000e+00> : vector<2x23xf32>
    %876 = tpu.matmul %874, %875, %cst_138 {dimension_numbers = #tpu.dot_dimension_numbers<[1], [0], [0], [1], [0, 0, 1, 1], [], []>} : vector<2x47xf32>, vector<47x23xf32>, vector<2x23xf32> -> vector<2x23xf32>
    %c289 = arith.constant 289 : index
    %c0_139 = arith.constant 0 : index
    %877 = vector.load %arg2[%c289, %c0_139] : memref<296x128xf32, #tpu.memory_space<vmem>>, vector<1x23xf32>
    %878 = vector.broadcast %877 : vector<1x23xf32> to vector<2x23xf32>
    %879 = arith.addf %876, %878 : vector<2x23xf32>
    %cst_140 = arith.constant 0.000000e+00 : f32
    %880 = vector.broadcast %cst_140 : f32 to vector<2x23xf32>
    %881 = arith.maximumf %879, %880 : vector<2x23xf32>
    %c208 = arith.constant 208 : index
    %c0_141 = arith.constant 0 : index
    %882 = vector.load %arg2[%c208, %c0_141] : memref<296x128xf32, #tpu.memory_space<vmem>>, vector<23x11xf32>
    %cst_142 = arith.constant dense<0.000000e+00> : vector<2x11xf32>
    %883 = tpu.matmul %881, %882, %cst_142 {dimension_numbers = #tpu.dot_dimension_numbers<[1], [0], [0], [1], [0, 0, 1, 1], [], []>} : vector<2x23xf32>, vector<23x11xf32>, vector<2x11xf32> -> vector<2x11xf32>
    %c290 = arith.constant 290 : index
    %c0_143 = arith.constant 0 : index
    %884 = vector.load %arg2[%c290, %c0_143] : memref<296x128xf32, #tpu.memory_space<vmem>>, vector<1x11xf32>
    %885 = vector.broadcast %884 : vector<1x11xf32> to vector<2x11xf32>
    %886 = arith.addf %883, %885 : vector<2x11xf32>
    %cst_144 = arith.constant 0.000000e+00 : f32
    %887 = vector.broadcast %cst_144 : f32 to vector<2x11xf32>
    %888 = arith.maximumf %886, %887 : vector<2x11xf32>
    %c232 = arith.constant 232 : index
    %c0_145 = arith.constant 0 : index
    %889 = vector.load %arg2[%c232, %c0_145] : memref<296x128xf32, #tpu.memory_space<vmem>>, vector<27x13xf32>
    %890 = vector.extract_strided_slice %889 {offsets = [0, 0], sizes = [16, 13], strides = [1, 1]} : vector<27x13xf32> to vector<16x13xf32>
    %cst_146 = arith.constant dense<0.000000e+00> : vector<2x13xf32>
    %891 = tpu.matmul %873, %890, %cst_146 {dimension_numbers = #tpu.dot_dimension_numbers<[1], [0], [0], [1], [0, 0, 1, 1], [], []>} : vector<2x16xf32>, vector<16x13xf32>, vector<2x13xf32> -> vector<2x13xf32>
    %892 = vector.extract_strided_slice %889 {offsets = [16, 0], sizes = [11, 13], strides = [1, 1]} : vector<27x13xf32> to vector<11x13xf32>
    %cst_147 = arith.constant dense<0.000000e+00> : vector<2x13xf32>
    %893 = tpu.matmul %888, %892, %cst_147 {dimension_numbers = #tpu.dot_dimension_numbers<[1], [0], [0], [1], [0, 0, 1, 1], [], []>} : vector<2x11xf32>, vector<11x13xf32>, vector<2x13xf32> -> vector<2x13xf32>
    %894 = arith.addf %891, %893 : vector<2x13xf32>
    %c291 = arith.constant 291 : index
    %c0_148 = arith.constant 0 : index
    %895 = vector.load %arg2[%c291, %c0_148] : memref<296x128xf32, #tpu.memory_space<vmem>>, vector<1x13xf32>
    %896 = vector.broadcast %895 : vector<1x13xf32> to vector<2x13xf32>
    %897 = arith.addf %894, %896 : vector<2x13xf32>
    %cst_149 = arith.constant 0.000000e+00 : f32
    %898 = vector.broadcast %cst_149 : f32 to vector<2x13xf32>
    %899 = arith.maximumf %897, %898 : vector<2x13xf32>
    %c264 = arith.constant 264 : index
    %c0_150 = arith.constant 0 : index
    %900 = vector.load %arg2[%c264, %c0_150] : memref<296x128xf32, #tpu.memory_space<vmem>>, vector<13x2xf32>
    %cst_151 = arith.constant dense<0.000000e+00> : vector<2x2xf32>
    %901 = tpu.matmul %899, %900, %cst_151 {dimension_numbers = #tpu.dot_dimension_numbers<[1], [0], [0], [1], [0, 0, 1, 1], [], []>} : vector<2x13xf32>, vector<13x2xf32>, vector<2x2xf32> -> vector<2x2xf32>
    %c292 = arith.constant 292 : index
    %c0_152 = arith.constant 0 : index
    %902 = vector.load %arg2[%c292, %c0_152] : memref<296x128xf32, #tpu.memory_space<vmem>>, vector<1x2xf32>
    %903 = vector.broadcast %902 : vector<1x2xf32> to vector<2x2xf32>
    %904 = arith.addf %901, %903 : vector<2x2xf32>
    %c0_153 = arith.constant 0 : index
    %c0_154 = arith.constant 0 : index
    %905 = vector.load %arg3[%c0_153, %c0_154] : memref<2x2xf32, #tpu.memory_space<vmem>>, vector<2x2xf32>
    tpu.vector_store %arg3[%c0_153, %c0_154], %904 {strides = array<i32>} : memref<2x2xf32, #tpu.memory_space<vmem>>, vector<2x2xf32>,
    return
  }
}

</mosaic_0001>

<bundles_post_ra>
// kernel: forward.1
= control target key start
LH: loop header
LB: loop body
LE: loop exit
PB: predicated region body
PF: predicated region fallthrough
CT: control target
= control target key end

     0   :  { %8 = vsyncpa [#allocation3], 0  ;;  %s4964_s0 = inlined_call_operand.hbm [shape: f32[16,31], index: 0, kind: input, shape index: {}]   ;;  %s4965_s1 = inlined_call_operand.vmem [shape: f32[2,47], index: 1, kind: input, shape index: {}]   ;;  %s4966_s2 = inlined_call_operand.hbm [shape: f32[296,128], index: 2, kind: input, shape index: {}]   ;;  %s4967_s3 = inlined_call_operand.hbm [shape: f32[2,2], index: 3, kind: output, shape index: {}]  }
   0x1   :  { %9 = vsyncpa [#allocation6], 0 }
   0x2   :  { %10 = vsyncpa [#allocation4], 0  ;;  %s4393_s12 = smov [#allocation2]   ;;  %s4321_s16 = scalar_lea.hbm %s4964_s0, 256 }
   0x3   :  { %s16_s13 = sshll.u32 %s4393_s12, 4  ;;  %p4322_p0 = scmp.ne.s32.totalorder %s4964_s0, %s4321_s16  ;;  %s17_s13 = int_to_ptr.vmem [resolvable:$true] %s16_s13 }
   0x4   :  { %p4325_p1 = scmp.lt.u32.totalorder %s4321_s16, %s4964_s0 }
   0x6   :  { %p4327_p2 = pnand %p4325_p1, %p4322_p0 }
   0x8   :  { %4330 = shalt.err (!%p4327_p2)
}
   0x9   :  { %s4331_s21 = scalar_lea.vmem %s17_s13, 256  ;;  %p4336_p4 = scmp.lt.s32.totalorder %s17_s13, %s17_s13 }
   0xa   :  { %p4332_p3 = scmp.ne.s32.totalorder %s17_s13, %s4331_s21  ;;  %p4337_p5 = scmp.lt.s32.totalorder %s4331_s21, %s4331_s21 }
   0xc   :  { %p4338_p6 = por %p4337_p5, %p4336_p4 }
   0xe   :  { %p4339_p7 = pnand %p4338_p6, %p4332_p3 }
  0x10   :  { %4342 = shalt.err (!%p4339_p7)
}
  0x11   :  { %s4394_s22 = smov 128   ;;  %s4395_s23 = smov 8  }
  0x12   :  { %22 = dma.hbm_to_vmem [thread:$0]  %s4964_s0, 256, %s17_s13, [#allocation3], %s4394_s22, %s4394_s22, %s4395_s23  }
  0x13   :  { %s4396_s26 = smov [#allocation5]   ;;  %s4343_s30 = scalar_lea.hbm %s4966_s2, 4736 }
  0x14   :  { %s30_s27 = sshll.u32 %s4396_s26, 4  ;;  %p4344_p8 = scmp.ne.s32.totalorder %s4966_s2, %s4343_s30  ;;  %s31_s27 = int_to_ptr.vmem [resolvable:$true] %s30_s27 }
  0x15   :  { %p4347_p9 = scmp.lt.u32.totalorder %s4343_s30, %s4966_s2 }
  0x17   :  { %p4349_p10 = pnand %p4347_p9, %p4344_p8 }
  0x19   :  { %4352 = shalt.err (!%p4349_p10)
}
  0x1a   :  { %s4353_s8 = scalar_lea.vmem %s31_s27, 4736  ;;  %p4358_p12 = scmp.lt.s32.totalorder %s31_s27, %s31_s27 }
  0x1b   :  { %p4354_p11 = scmp.ne.s32.totalorder %s31_s27, %s4353_s8  ;;  %p4359_p13 = scmp.lt.s32.totalorder %s4353_s8, %s4353_s8 }
  0x1d   :  { %p4360_p0 = por %p4359_p13, %p4358_p12 }
  0x1f   :  { %p4361_p1 = pnand %p4360_p0, %p4354_p11 }
  0x21   :  { %4364 = shalt.err (!%p4361_p1)
}
  0x22   :  { %36 = dma.hbm_to_vmem [thread:$0]  %s4966_s2, 4736, %s31_s27, [#allocation6], %s4394_s22, %s4394_s22, %s4395_s23  }
  0x23   :  { %4387 = dma.done.wait [#allocation3], 256  }
  0x24   :  { %4388 = vsyncadd [#allocation3], 4294967040 }
  0x25   :  { %4389 = dma.done.wait [#allocation6], 4736  }
  0x26   :  { %4390 = vsyncadd [#allocation6], 4294962560  ;;  %v4397_v0 = vmov 0.0|0.0   ;;  %vm4398_vm0 = vmmov 0   ;;  %v4399_v1 = vmov 0.0   ;;  %vm61_vm1 = vcmask 1046528  }
  0x27   :  { %4036 = vmatprep.subr.bf16.mxu1 %v4397_v0  ;;  %3788 = vmatprep.mubr.msk.f32.mxu1 %vm4398_vm0, %v4399_v1  ;;  %vm4400_vm2 = vmmov 1   ;;  %v45_v3 = vld [vmem:[#allocation5] sm:$0xff]  ;;  %v46_v4 = vld [vmem:[#allocation5 + $0x8] sm:$0xff]  ;;  %vm54_vm4 = vcmask 252928   ;;  %v47_v8 = vld [vmem:[#allocation5 + $0x10] sm:$0xff]  ;;  %s4401_s2 = smov 16  }
  0x28   :  { %vm4458_vm3 = vmpackc.low %vm61_vm1, %vm4400_vm2  ;;  %v141_v5 = vld [vmem:[#allocation5 + $0x20] sm:$0xff]  ;;  %v4026_v6 = vpack.c.bf16 %v46_v4, %v45_v3  ;;  %v142_v7 = vld [vmem:[#allocation5 + $0x28] sm:$0xff]  ;;  %s4402_s10 = smov 48   ;;  %vm292_vm5 = vcmask 1040384   ;;  %s4403_s11 = smov 32   ;;  %vm145_vm6 = vcmask 130048  }
  0x29   :  { %v48_v9 = vld [vmem:[#allocation5 + $0x18] sm:$0x7f]  ;;  %v4462_v10 = vpack.c.bf16 %v142_v7, %v141_v5  ;;  %v143_v12 = vld [vmem:[#allocation5 + $0x30] sm:$0xff]  ;;  %s4404_s12 = smov 96   ;;  %s4405_s13 = smov 112   ;;  %vm1915_vm7 = vcmask 1041408  }
  0x2a   :  { %v4030_v11 = vpack.c.bf16 %v48_v9, %v47_v8  ;;  %v144_v13 = vld [vmem:[#allocation5 + $0x38] sm:$0xff]  ;;  %v43_v14 = vld [vmem:[#allocation2] sm:$0xff]  ;;  %4027 = vmatprep.subr.bf16.mxu0 %v4026_v6  ;;  %s4406_s14 = smov 64   ;;  %s4407_s15 = smov 80   ;;  %vm1917_vm8 = vcmask 1043456   ;;  %vm1919_vm9 = vcmask 1045504  }
  0x2b   :  { %3781 = vmatprep.mubr.msk.f32.mxu0 %vm54_vm4, %v43_v14  ;;  %v3592_v15 = vld [vmem:[#allocation5 + $0x119] ss:$0 sm:$0xff]  ;;  %4038 = vmatpush3.bf16.msra.mxu1 %v4462_v10  ;;  %v4466_v16 = vpack.c.bf16 %v144_v13, %v143_v12  ;;  %v3587_v21 = vld [vmem:[#allocation5 + $0x118] ss:$0 sm:$0xff]  ;;  %vm1924_vm10 = vcmask 261120   ;;  %vm3158_vm11 = vcmask 384000  }
  0x2c   :  { %4029 = vmatpush3.bf16.msra.mxu0 %v4026_v6  ;;  %4039 = vmatprep.subr.bf16.mxu1 %v4397_v0  ;;  %v44_v17 = vld [vmem:[#allocation2 + $0x8] sm:$0xff]  ;;  %vm3038_vm12 = vcmask 261126   ;;  %vm3244_vm13 = vcmask 187392   ;;  %vm3330_vm14 = vcmask 1042432  }
  0x2d   :  { %4032 = vmatprep.subr.msk.bf16.mxu0 %vm4458_vm3, %v4030_v11  ;;  %346 = vrot.lane.b32.xlu0 %v3592_v15, %s4401_s2  ;;  %vm4140_vm15 = vmpackc.low %vm3330_vm14, %vm4400_vm2 }
  0x2e   :  { %3789 = vmatmul.mubr.f32.vlgmr.msra.gmra.mrb[0].mxu1 %v4399_v1 }
  0x2f   :  { %4041 = vmatpush3.bf16.msra.mxu1 %v4466_v16  ;;  %3795 = vmatprep.mubr.msk.f32.mxu1 %vm4398_vm0, %v4399_v1 }
  0x30   :  { %4035 = vmatpush3.bf16.msk.msra.mxu0 %vm4458_vm3, %v4030_v11  ;;  %4045 = vmatprep.subr.bf16.mxu1 %v4397_v0 }
  0x31   :  { %4042 = vmatprep.subr.bf16.mxu0 %v4397_v0 }
  0x32   :  { %3796 = vmatmul.mubr.f32.vlgmr.msra.gmra.mrb[2].mxu1 %v4399_v1 }
  0x33   :  { %3782 = vmatmul.mubr.msk.f32.vlgmr.msra.gmra.mrb[0].mxu0 %vm54_vm4, %v44_v17  ;;  %4047 = vmatpush3.bf16.msra.mxu1 %v4466_v16 }
  0x34   :  { %3809 = vmatprep.mubr.msk.f32.mxu1 %vm4398_vm0, %v4399_v1  ;;  %4044 = vmatpush3.bf16.msra.mxu0 %v4462_v10 }
  0x35   :  { %3802 = vmatprep.mubr.msk.f32.mxu0 %vm4398_vm0, %v4399_v1  ;;  %4051 = vmatprep.subr.bf16.mxu1 %v4397_v0 }
  0x36   :  { %4048 = vmatprep.subr.bf16.mxu0 %v4397_v0 }
  0x9f   :  { %v4490_v20 = vpop.permute.xlu0 %346 }
 0x101   :  { %v215_v18 = vpop.f32.mrb[0].mxu1 }
 0x102   :  { %v3790_v19 = vpop.f32.mrb[1].mxu1 }
 0x105   :  { %v285_v22 = vpop.f32.mrb[2].mxu1 }
 0x106   :  { %v3783_v23 = vpop.f32.mrb[0].mxu0  ;;  %v3797_v24 = vpop.f32.mrb[3].mxu1  ;;  %336 = vrot.lane.b32.xlu0 %v285_v22, %s4402_s10  ;;  %v349_v26 = vadd.f32 %v4490_v20, %v285_v22 }
 0x107   :  { %v137_v25 = vadd.f32 %v3783_v23, %v3587_v21  ;;  %v131_v27 = vpop.f32.mrb[1].mxu0 }
 0x108   :  { %v132_v28 = vadd.f32 %v3587_v21, %v131_v27  ;;  %351 = vrot.lane.b32.xlu1 %v349_v26, %s4401_s2 }
 0x109   :  { %v290_v29 = vrot.slane %v137_v25, 7  ;;  %v332_v30 = vrot.slane %v137_v25, 6  ;;  %v551_v31 = vrot.slane %v137_v25, 5  ;;  %v769_v32 = vrot.slane %v137_v25, 4 }
 0x10a   :  { %v330_v33 = vrot.slane %v132_v28, 7  ;;  %v549_v34 = vrot.slane %v132_v28, 6  ;;  %v519_v35 = vrot.slane %v132_v28, 1  ;;  %v767_v36 = vrot.slane %v132_v28, 5  ;;  %306 = vrot.lane.b32.xlu0 %v3592_v15, %s4403_s11 }
 0x10b   :  { %v4497_v37 = vsel %vm292_vm5, %v132_v28, %v290_v29  ;;  %v735_v38 = vrot.slane %v132_v28, 2  ;;  %v737_v39 = vrot.slane %v137_v25, 1  ;;  %v953_v40 = vrot.slane %v132_v28, 3 }
 0x10c   :  { %v4500_v41 = vsel %vm292_vm5, %v330_v33, %v332_v30  ;;  %v4503_v42 = vsel %vm292_vm5, %v549_v34, %v551_v31  ;;  %v4506_v43 = vsel %vm292_vm5, %v519_v35, %v137_v25  ;;  %v4509_v44 = vsel %vm292_vm5, %v767_v36, %v769_v32 }
 0x10d   :  { %v4512_v45 = vsel %vm292_vm5, %v735_v38, %v737_v39  ;;  %v955_v46 = vrot.slane %v137_v25, 2  ;;  %v985_v47 = vrot.slane %v132_v28, 4  ;;  %v987_v48 = vrot.slane %v137_v25, 3 }
 0x10e   :  { %v294_v61 = vadd.f32 %v4497_v37, %v215_v18 }
 0x10f   :  { %v4515_v49 = vsel %vm292_vm5, %v953_v40, %v955_v46  ;;  %v4518_v50 = vsel %vm292_vm5, %v985_v47, %v987_v48  ;;  %vm3491_vm5 = vcmask 105472  }
 0x110   :  { %v3591_v62 = vmul.f32 -1.442695, %v294_v61 }
 0x178   :  { %v337_v51 = vpop.permute.xlu0 %336 }
 0x179   :  { %v339_v52 = vadd.f32 %v337_v51, %v4500_v41 }
 0x17a   :  { %v352_v59 = vpop.permute.xlu1 %351 }
 0x17b   :  { %v3593_v53 = vmul.f32 -1.442695, %v339_v52 }
 0x17c   :  { %v4521_v54 = vpop.permute.xlu0 %306 }
 0x17d   :  { %4165 = vpow2.f32 %v3593_v53  ;;  %v309_v55 = vadd.f32 %v4521_v54, %v215_v18 }
 0x17f   :  { %311 = vrot.lane.b32.xlu0 %v309_v55, %s4404_s12 }
 0x187   :  { %v4166_v56 = vpop.eup %4165 }
 0x188   :  { %v343_v57 = vadd.f32 1.0, %v4166_v56 }
 0x18a   :  { %4167 = vrcp.f32 %v343_v57 }
 0x18b   :  { %4169 = vpow2.f32 %v3591_v62 }
 0x194   :  { %v4168_v58 = vpop.eup %4167 }
 0x195   :  { %v354_v60 = vmul.f32 %v4168_v58, %v352_v59  ;;  %v4170_v63 = vpop.eup %4169  ;;  %v361_v13 = vsub.f32 1.0, %v4168_v58  ;;  %v367_v15 = vmul.f32 0.0, %v4168_v58 }
 0x196   :  { %v298_v3 = vadd.f32 1.0, %v4170_v63 }
 0x197   :  { %356 = vrot.lane.b32.xlu1 %v354_v60, %s4403_s11 }
 0x198   :  { %4171 = vrcp.f32 %v298_v3 }
 0x1a2   :  { %v4172_v4 = vpop.eup %4171 }
 0x1a3   :  { %v321_v22 = vsub.f32 1.0, %v4172_v4  ;;  %v327_v24 = vmul.f32 0.0, %v4172_v4 }
 0x1f1   :  { %v312_v5 = vpop.permute.xlu0 %311 }
 0x1f2   :  { %v314_v6 = vmul.f32 %v4172_v4, %v312_v5 }
 0x1f4   :  { %316 = vrot.lane.b32.xlu0 %v314_v6, %s4403_s11 }
 0x209   :  { %v357_v7 = vpop.permute.xlu1 %356 }
 0x20a   :  { %v359_v8 = vadd.f32 %v357_v7, %v4500_v41 }
 0x20c   :  { %4173 = vtanh.f32 %v359_v8 }
 0x216   :  { %v4174_v9 = vpop.eup %4173 }
 0x217   :  { %363 = vrot.lane.b32.xlu1 %v4174_v9, %s4405_s13 }
 0x266   :  { %v317_v11 = vpop.permute.xlu0 %316 }
 0x267   :  { %v319_v12 = vadd.f32 %v317_v11, %v4497_v37 }
 0x269   :  { %4175 = vtanh.f32 %v319_v12 }
 0x273   :  { %v4176_v19 = vpop.eup %4175 }
 0x289   :  { %v364_v14 = vpop.permute.xlu1 %363 }
 0x28a   :  { %v366_v17 = vmul.f32 %v364_v14, %v361_v13 }
 0x28c   :  { %v4531_v18 = vadd.f32 %v367_v15, %v366_v17 }
 0x28e   :  { %445 = vrot.lane.b32.xlu1 %v4531_v18, %s4406_s14 }
 0x292   :  { %323 = vrot.lane.b32.xlu1 %v4176_v19, %s4405_s13 }
 0x300   :  { %v446_v21 = vpop.permute.xlu1 %445 }
 0x301   :  { %3810 = vmatmul.mubr.msk.f32.vlgmr.msra.gmra.mrb[4].mxu1 %vm145_vm6, %v446_v21 }
 0x302   :  { %4053 = vmatpush3.bf16.msra.mxu1 %v4466_v16  ;;  %3823 = vmatprep.mubr.msk.f32.mxu1 %vm4398_vm0, %v4399_v1 }
 0x303   :  { %4057 = vmatprep.subr.bf16.mxu1 %v4397_v0 }
 0x304   :  { %v324_v23 = vpop.permute.xlu1 %323 }
 0x305   :  { %v326_v25 = vmul.f32 %v324_v23, %v321_v22 }
 0x307   :  { %v328_v26 = vadd.f32 %v327_v24, %v326_v25 }
 0x309   :  { %370 = vrot.lane.b32.xlu0 %v328_v26, %s4405_s13 }
 0x37b   :  { %v4542_v27 = vpop.permute.xlu0 %370 }
 0x37c   :  { %3803 = vmatmul.mubr.msk.f32.vlgmr.msra.gmra.mrb[2].mxu0 %vm145_vm6, %v4542_v27 }
 0x37d   :  { %4050 = vmatpush3.bf16.msra.mxu0 %v4462_v10  ;;  %3816 = vmatprep.mubr.msk.f32.mxu0 %vm4398_vm0, %v4399_v1 }
 0x37e   :  { %4054 = vmatprep.subr.bf16.mxu0 %v4397_v0 }
 0x3d4   :  { %v515_v28 = vpop.f32.mrb[4].mxu1 }
 0x3d5   :  { %v565_v29 = vadd.f32 %v515_v28, %v4490_v20  ;;  %v3811_v30 = vpop.f32.mrb[5].mxu1  ;;  %555 = vrot.lane.b32.xlu1 %v515_v28, %s4402_s10 }
 0x3d7   :  { %567 = vrot.lane.b32.xlu0 %v565_v29, %s4401_s2 }
 0x447   :  { %v556_v31 = vpop.permute.xlu1 %555 }
 0x448   :  { %v558_v32 = vadd.f32 %v556_v31, %v4503_v42 }
 0x449   :  { %v568_v40 = vpop.permute.xlu0 %567 }
 0x44a   :  { %v3597_v33 = vmul.f32 -1.442695, %v558_v32 }
 0x44c   :  { %4177 = vpow2.f32 %v3597_v33 }
 0x44f   :  { %v440_v34 = vpop.f32.mrb[2].mxu0 }
 0x450   :  { %v3804_v35 = vpop.f32.mrb[3].mxu0  ;;  %v529_v47 = vadd.f32 %v440_v34, %v4521_v54  ;;  %v522_v48 = vadd.f32 %v4506_v43, %v440_v34 }
 0x452   :  { %v3596_v51 = vmul.f32 -1.442695, %v522_v48 }
 0x456   :  { %v4178_v36 = vpop.eup %4177 }
 0x457   :  { %v562_v38 = vadd.f32 1.0, %v4178_v36 }
 0x459   :  { %4179 = vrcp.f32 %v562_v38 }
 0x45a   :  { %4181 = vpow2.f32 %v3596_v51 }
 0x463   :  { %v4180_v39 = vpop.eup %4179 }
 0x464   :  { %v570_v46 = vmul.f32 %v4180_v39, %v568_v40  ;;  %v4182_v52 = vpop.eup %4181  ;;  %v577_v63 = vsub.f32 1.0, %v4180_v39  ;;  %v583_v4 = vmul.f32 %v4180_v39, %v4531_v18 }
 0x465   :  { %v526_v53 = vadd.f32 1.0, %v4182_v52 }
 0x466   :  { %572 = vrot.lane.b32.xlu1 %v570_v46, %s4403_s11 }
 0x467   :  { %4183 = vrcp.f32 %v526_v53 }
 0x46a   :  { %531 = vrot.lane.b32.xlu1 %v529_v47, %s4404_s12 }
 0x471   :  { %v4184_v57 = vpop.eup %4183 }
 0x472   :  { %v541_v9 = vsub.f32 1.0, %v4184_v57  ;;  %v547_v12 = vmul.f32 %v4184_v57, %v328_v26 }
 0x4d8   :  { %v573_v55 = vpop.permute.xlu1 %572 }
 0x4d9   :  { %v575_v56 = vadd.f32 %v573_v55, %v4503_v42 }
 0x4db   :  { %4185 = vtanh.f32 %v575_v56 }
 0x4dc   :  { %v532_v58 = vpop.permute.xlu1 %531 }
 0x4dd   :  { %v534_v59 = vmul.f32 %v4184_v57, %v532_v58 }
 0x4df   :  { %536 = vrot.lane.b32.xlu1 %v534_v59, %s4403_s11 }
 0x4e5   :  { %v4186_v60 = vpop.eup %4185 }
 0x4e6   :  { %579 = vrot.lane.b32.xlu0 %v4186_v60, %s4405_s13 }
 0x551   :  { %v537_v61 = vpop.permute.xlu1 %536 }
 0x552   :  { %v539_v62 = vadd.f32 %v537_v61, %v4506_v43 }
 0x554   :  { %4187 = vtanh.f32 %v539_v62 }
 0x558   :  { %v580_v3 = vpop.permute.xlu0 %579 }
 0x559   :  { %v582_v5 = vmul.f32 %v580_v3, %v577_v63 }
 0x55b   :  { %v4563_v6 = vadd.f32 %v583_v4, %v582_v5 }
 0x55d   :  { %661 = vrot.lane.b32.xlu0 %v4563_v6, %s4406_s14 }
 0x55e   :  { %v4188_v7 = vpop.eup %4187 }
 0x561   :  { %543 = vrot.lane.b32.xlu0 %v4188_v7, %s4405_s13 }
 0x5cf   :  { %v662_v8 = vpop.permute.xlu0 %661 }
 0x5d0   :  { %3824 = vmatmul.mubr.msk.f32.vlgmr.msra.gmra.mrb[6].mxu1 %vm145_vm6, %v662_v8 }
 0x5d1   :  { %4059 = vmatpush3.bf16.msra.mxu1 %v4466_v16  ;;  %3837 = vmatprep.mubr.msk.f32.mxu1 %vm4398_vm0, %v4399_v1 }
 0x5d2   :  { %4063 = vmatprep.subr.bf16.mxu1 %v4397_v0 }
 0x5d3   :  { %v544_v11 = vpop.permute.xlu0 %543 }
 0x5d4   :  { %v546_v13 = vmul.f32 %v544_v11, %v541_v9 }
 0x5d6   :  { %v548_v14 = vadd.f32 %v547_v12, %v546_v13 }
 0x5d8   :  { %586 = vrot.lane.b32.xlu1 %v548_v14, %s4405_s13 }
 0x64a   :  { %v4574_v15 = vpop.permute.xlu1 %586 }
 0x64b   :  { %3817 = vmatmul.mubr.msk.f32.vlgmr.msra.gmra.mrb[4].mxu0 %vm145_vm6, %v4574_v15 }
 0x64c   :  { %4056 = vmatpush3.bf16.msra.mxu0 %v4462_v10  ;;  %3830 = vmatprep.mubr.msk.f32.mxu0 %vm4398_vm0, %v4399_v1 }
 0x64d   :  { %4060 = vmatprep.subr.bf16.mxu0 %v4397_v0 }
 0x6a3   :  { %v731_v17 = vpop.f32.mrb[6].mxu1 }
 0x6a4   :  { %v783_v19 = vadd.f32 %v731_v17, %v4490_v20  ;;  %v3825_v21 = vpop.f32.mrb[7].mxu1  ;;  %773 = vrot.lane.b32.xlu0 %v731_v17, %s4402_s10 }
 0x6a6   :  { %785 = vrot.lane.b32.xlu1 %v783_v19, %s4401_s2 }
 0x716   :  { %v774_v22 = vpop.permute.xlu0 %773 }
 0x717   :  { %v776_v23 = vadd.f32 %v774_v22, %v4509_v44 }
 0x718   :  { %v786_v32 = vpop.permute.xlu1 %785 }
 0x719   :  { %v3601_v24 = vmul.f32 -1.442695, %v776_v23 }
 0x71b   :  { %4189 = vpow2.f32 %v3601_v24 }
 0x71e   :  { %v656_v25 = vpop.f32.mrb[4].mxu0 }
 0x71f   :  { %v747_v26 = vadd.f32 %v656_v25, %v4521_v54  ;;  %v3818_v28 = vpop.f32.mrb[5].mxu0  ;;  %v740_v34 = vadd.f32 %v4512_v45, %v656_v25 }
 0x721   :  { %749 = vrot.lane.b32.xlu1 %v747_v26, %s4404_s12  ;;  %v3600_v35 = vmul.f32 -1.442695, %v740_v34 }
 0x725   :  { %v4190_v29 = vpop.eup %4189 }
 0x726   :  { %v780_v30 = vadd.f32 1.0, %v4190_v29 }
 0x728   :  { %4191 = vrcp.f32 %v780_v30 }
 0x729   :  { %4193 = vpow2.f32 %v3600_v35 }
 0x732   :  { %v4192_v31 = vpop.eup %4191 }
 0x733   :  { %v788_v33 = vmul.f32 %v4192_v31, %v786_v32  ;;  %v4194_v36 = vpop.eup %4193  ;;  %v795_v56 = vsub.f32 1.0, %v4192_v31  ;;  %v801_v58 = vmul.f32 %v4192_v31, %v4563_v6 }
 0x734   :  { %v744_v38 = vadd.f32 1.0, %v4194_v36 }
 0x735   :  { %790 = vrot.lane.b32.xlu0 %v788_v33, %s4403_s11 }
 0x736   :  { %4195 = vrcp.f32 %v744_v38 }
 0x740   :  { %v4196_v39 = vpop.eup %4195 }
 0x741   :  { %v759_v61 = vsub.f32 1.0, %v4196_v39  ;;  %v765_v63 = vmul.f32 %v4196_v39, %v548_v14 }
 0x793   :  { %v750_v40 = vpop.permute.xlu1 %749 }
 0x794   :  { %v752_v46 = vmul.f32 %v4196_v39, %v750_v40 }
 0x796   :  { %754 = vrot.lane.b32.xlu1 %v752_v46, %s4403_s11 }
 0x7a7   :  { %v791_v47 = vpop.permute.xlu0 %790 }
 0x7a8   :  { %v793_v48 = vadd.f32 %v791_v47, %v4509_v44 }
 0x7aa   :  { %4197 = vtanh.f32 %v793_v48 }
 0x7b4   :  { %v4198_v51 = vpop.eup %4197 }
 0x7b5   :  { %797 = vrot.lane.b32.xlu0 %v4198_v51, %s4405_s13 }
 0x808   :  { %v755_v52 = vpop.permute.xlu1 %754 }
 0x809   :  { %v757_v53 = vadd.f32 %v755_v52, %v4512_v45 }
 0x80b   :  { %4199 = vtanh.f32 %v757_v53 }
 0x815   :  { %v4200_v55 = vpop.eup %4199 }
 0x816   :  { %761 = vrot.lane.b32.xlu1 %v4200_v55, %s4405_s13 }
 0x827   :  { %v798_v57 = vpop.permute.xlu0 %797 }
 0x828   :  { %v800_v59 = vmul.f32 %v798_v57, %v795_v56 }
 0x82a   :  { %v4596_v60 = vadd.f32 %v801_v58, %v800_v59 }
 0x82c   :  { %879 = vrot.lane.b32.xlu0 %v4596_v60, %s4406_s14 }
 0x888   :  { %v762_v62 = vpop.permute.xlu1 %761 }
 0x889   :  { %v764_v3 = vmul.f32 %v762_v62, %v759_v61 }
 0x88b   :  { %v766_v4 = vadd.f32 %v765_v63, %v764_v3 }
 0x88d   :  { %804 = vrot.lane.b32.xlu0 %v766_v4, %s4405_s13 }
 0x89e   :  { %v880_v5 = vpop.permute.xlu0 %879 }
 0x89f   :  { %3838 = vmatmul.mubr.msk.f32.vlgmr.msra.gmra.mrb[8].mxu1 %vm145_vm6, %v880_v5 }
 0x8a0   :  { %4065 = vmatpush3.bf16.msra.mxu1 %v4466_v16  ;;  %3851 = vmatprep.mubr.msk.f32.mxu1 %vm4398_vm0, %v4399_v1 }
 0x8a1   :  { %4069 = vmatprep.subr.bf16.mxu1 %v4397_v0 }
 0x8ff   :  { %v4606_v7 = vpop.permute.xlu0 %804 }
 0x900   :  { %3831 = vmatmul.mubr.msk.f32.vlgmr.msra.gmra.mrb[6].mxu0 %vm145_vm6, %v4606_v7 }
 0x901   :  { %4062 = vmatpush3.bf16.msra.mxu0 %v4462_v10  ;;  %3844 = vmatprep.mubr.msk.f32.mxu0 %vm4398_vm0, %v4399_v1 }
 0x902   :  { %4066 = vmatprep.subr.bf16.mxu0 %v4397_v0 }
 0x972   :  { %v949_v8 = vpop.f32.mrb[8].mxu1 }
 0x973   :  { %v1001_v9 = vadd.f32 %v949_v8, %v4490_v20  ;;  %991 = vrot.lane.b32.xlu1 %v949_v8, %s4402_s10  ;;  %v3839_v11 = vpop.f32.mrb[9].mxu1 }
 0x975   :  { %1003 = vrot.lane.b32.xlu0 %v1001_v9, %s4401_s2 }
 0x9d3   :  { %v874_v12 = vpop.f32.mrb[6].mxu0 }
 0x9d4   :  { %v965_v13 = vadd.f32 %v874_v12, %v4521_v54  ;;  %v3832_v14 = vpop.f32.mrb[7].mxu0  ;;  %v958_v28 = vadd.f32 %v4515_v49, %v874_v12 }
 0x9d6   :  { %967 = vrot.lane.b32.xlu0 %v965_v13, %s4404_s12  ;;  %v3604_v29 = vmul.f32 -1.442695, %v958_v28 }
 0x9e5   :  { %v992_v17 = vpop.permute.xlu1 %991 }
 0x9e6   :  { %v994_v19 = vadd.f32 %v992_v17, %v4518_v50 }
 0x9e7   :  { %v1004_v25 = vpop.permute.xlu0 %1003 }
 0x9e8   :  { %v3605_v21 = vmul.f32 -1.442695, %v994_v19 }
 0x9ea   :  { %4201 = vpow2.f32 %v3605_v21 }
 0x9f4   :  { %v4202_v22 = vpop.eup %4201 }
 0x9f5   :  { %v998_v23 = vadd.f32 1.0, %v4202_v22 }
 0x9f7   :  { %4203 = vrcp.f32 %v998_v23 }
 0x9f8   :  { %4205 = vpow2.f32 %v3604_v29 }
 0xa01   :  { %v4204_v24 = vpop.eup %4203 }
 0xa02   :  { %v1006_v26 = vmul.f32 %v4204_v24, %v1004_v25  ;;  %v4206_v30 = vpop.eup %4205  ;;  %v1013_v47 = vsub.f32 1.0, %v4204_v24  ;;  %v1019_v51 = vmul.f32 %v4204_v24, %v4596_v60 }
 0xa03   :  { %v962_v31 = vadd.f32 1.0, %v4206_v30 }
 0xa04   :  { %1008 = vrot.lane.b32.xlu1 %v1006_v26, %s4403_s11 }
 0xa05   :  { %4207 = vrcp.f32 %v962_v31 }
 0xa0f   :  { %v4208_v32 = vpop.eup %4207 }
 0xa10   :  { %v977_v55 = vsub.f32 1.0, %v4208_v32  ;;  %v983_v57 = vmul.f32 %v4208_v32, %v766_v4 }
 0xa48   :  { %v968_v33 = vpop.permute.xlu0 %967 }
 0xa49   :  { %v970_v34 = vmul.f32 %v4208_v32, %v968_v33 }
 0xa4b   :  { %972 = vrot.lane.b32.xlu0 %v970_v34, %s4403_s11 }
 0xa76   :  { %v1009_v35 = vpop.permute.xlu1 %1008 }
 0xa77   :  { %v1011_v36 = vadd.f32 %v1009_v35, %v4518_v50 }
 0xa79   :  { %4209 = vtanh.f32 %v1011_v36 }
 0xa83   :  { %v4210_v38 = vpop.eup %4209 }
 0xa84   :  { %1015 = vrot.lane.b32.xlu1 %v4210_v38, %s4405_s13 }
 0xabd   :  { %v973_v39 = vpop.permute.xlu0 %972 }
 0xabe   :  { %v975_v40 = vadd.f32 %v973_v39, %v4515_v49 }
 0xac0   :  { %4211 = vtanh.f32 %v975_v40 }
 0xaca   :  { %v4212_v46 = vpop.eup %4211 }
 0xacb   :  { %979 = vrot.lane.b32.xlu0 %v4212_v46, %s4405_s13 }
 0xaf6   :  { %v1016_v48 = vpop.permute.xlu1 %1015 }
 0xaf7   :  { %v1018_v52 = vmul.f32 %v1016_v48, %v1013_v47 }
 0xaf9   :  { %v4628_v53 = vadd.f32 %v1019_v51, %v1018_v52 }
 0xafb   :  { %1097 = vrot.lane.b32.xlu1 %v4628_v53, %s4406_s14 }
 0xb3d   :  { %v980_v56 = vpop.permute.xlu0 %979 }
 0xb3e   :  { %v982_v58 = vmul.f32 %v980_v56, %v977_v55 }
 0xb40   :  { %v984_v59 = vadd.f32 %v983_v57, %v982_v58 }
 0xb42   :  { %1022 = vrot.lane.b32.xlu1 %v984_v59, %s4405_s13 }
 0xb6d   :  { %v1098_v61 = vpop.permute.xlu1 %1097 }
 0xb6e   :  { %3852 = vmatmul.mubr.msk.f32.vlgmr.msra.gmra.mrb[10].mxu1 %vm145_vm6, %v1098_v61 }
 0xb6f   :  { %4071 = vmatpush3.bf16.msra.mxu1 %v4466_v16  ;;  %3865 = vmatprep.mubr.msk.f32.mxu1 %vm4398_vm0, %v4399_v1 }
 0xb70   :  { %4075 = vmatprep.subr.bf16.mxu1 %v4397_v0 }
 0xbb4   :  { %v4638_v62 = vpop.permute.xlu1 %1022 }
 0xbb5   :  { %3845 = vmatmul.mubr.msk.f32.vlgmr.msra.gmra.mrb[8].mxu0 %vm145_vm6, %v4638_v62 }
 0xbb6   :  { %4068 = vmatpush3.bf16.msra.mxu0 %v4462_v10  ;;  %3858 = vmatprep.mubr.msk.f32.mxu0 %vm4398_vm0, %v4399_v1 }
 0xbb7   :  { %4072 = vmatprep.subr.bf16.mxu0 %v4397_v0 }
 0xc41   :  { %v1167_v63 = vpop.f32.mrb[10].mxu1 }
 0xc42   :  { %v1209_v3 = vadd.f32 %v1167_v63, %v4490_v20  ;;  %v3853_v4 = vpop.f32.mrb[11].mxu1  ;;  %1199 = vrot.lane.b32.xlu0 %v1167_v63, %s4402_s10 }
 0xc44   :  { %1211 = vrot.lane.b32.xlu1 %v1209_v3, %s4401_s2 }
 0xc88   :  { %v1092_v5 = vpop.f32.mrb[8].mxu0 }
 0xc89   :  { %v1178_v8 = vadd.f32 %v1092_v5, %v4521_v54  ;;  %v3846_v9 = vpop.f32.mrb[9].mxu0  ;;  %v1171_v23 = vadd.f32 %v1092_v5, %v4518_v50 }
 0xc8b   :  { %1180 = vrot.lane.b32.xlu1 %v1178_v8, %s4404_s12  ;;  %v3608_v24 = vmul.f32 -1.442695, %v1171_v23 }
 0xcb4   :  { %v1200_v11 = vpop.permute.xlu0 %1199 }
 0xcb5   :  { %v1202_v12 = vadd.f32 %v1200_v11, %v4515_v49 }
 0xcb6   :  { %v1212_v21 = vpop.permute.xlu1 %1211 }
 0xcb7   :  { %v3609_v13 = vmul.f32 -1.442695, %v1202_v12 }
 0xcb9   :  { %4213 = vpow2.f32 %v3609_v13 }
 0xcc3   :  { %v4214_v14 = vpop.eup %4213 }
 0xcc4   :  { %v1206_v17 = vadd.f32 1.0, %v4214_v14 }
 0xcc6   :  { %4215 = vrcp.f32 %v1206_v17 }
 0xcc7   :  { %4217 = vpow2.f32 %v3608_v24 }
 0xcd0   :  { %v4216_v19 = vpop.eup %4215 }
 0xcd1   :  { %v1214_v22 = vmul.f32 %v4216_v19, %v1212_v21  ;;  %v4218_v25 = vpop.eup %4217  ;;  %v1221_v38 = vsub.f32 1.0, %v4216_v19  ;;  %v1227_v40 = vmul.f32 %v4216_v19, %v4628_v53 }
 0xcd2   :  { %v1175_v26 = vadd.f32 1.0, %v4218_v25 }
 0xcd3   :  { %1216 = vrot.lane.b32.xlu0 %v1214_v22, %s4403_s11 }
 0xcd4   :  { %4219 = vrcp.f32 %v1175_v26 }
 0xcde   :  { %v4220_v28 = vpop.eup %4219 }
 0xcdf   :  { %v1196_v51 = vmul.f32 %v4220_v28, %v984_v59 }
 0xcfd   :  { %v1181_v29 = vpop.permute.xlu1 %1180 }
 0xcfe   :  { %v1183_v30 = vmul.f32 %v4220_v28, %v1181_v29 }
 0xd00   :  { %1185 = vrot.lane.b32.xlu1 %v1183_v30, %s4403_s11 }
 0xd45   :  { %v1217_v31 = vpop.permute.xlu0 %1216 }
 0xd46   :  { %v1219_v32 = vadd.f32 %v1217_v31, %v4515_v49  ;;  %v1190_v49 = vsub.f32 1.0, %v4220_v28 }
 0xd48   :  { %4221 = vtanh.f32 %v1219_v32 }
 0xd52   :  { %v4222_v33 = vpop.eup %4221 }
 0xd53   :  { %1223 = vrot.lane.b32.xlu0 %v4222_v33, %s4405_s13 }
 0xd72   :  { %v1186_v34 = vpop.permute.xlu1 %1185 }
 0xd73   :  { %v1188_v35 = vadd.f32 %v1186_v34, %v4518_v50 }
 0xd75   :  { %4223 = vtanh.f32 %v1188_v35 }
 0xd7f   :  { %v4224_v36 = vpop.eup %4223 }
 0xd80   :  { %1192 = vrot.lane.b32.xlu1 %v4224_v36, %s4405_s13 }
 0xdc5   :  { %v1224_v39 = vpop.permute.xlu0 %1223 }
 0xdc6   :  { %v1226_v46 = vmul.f32 %v1224_v39, %v1221_v38 }
 0xdc8   :  { %v4660_v47 = vadd.f32 %v1227_v40, %v1226_v46 }
 0xdca   :  { %1305 = vrot.lane.b32.xlu0 %v4660_v47, %s4406_s14 }
 0xdf2   :  { %v1193_v48 = vpop.permute.xlu1 %1192 }
 0xdf3   :  { %v1195_v52 = vmul.f32 %v1193_v48, %v1190_v49 }
 0xdf5   :  { %v1197_v55 = vadd.f32 %v1196_v51, %v1195_v52 }
 0xdf7   :  { %1230 = vrot.lane.b32.xlu0 %v1197_v55, %s4405_s13 }
 0xe3c   :  { %v1306_v50 = vpop.permute.xlu0 %1305 }
 0xe3d   :  { %3866 = vmatmul.mubr.msk.f32.vlgmr.msra.gmra.mrb[12].mxu1 %vm145_vm6, %v1306_v50 }
 0xe3e   :  { %4077 = vmatpush3.bf16.msra.mxu1 %v4466_v16  ;;  %3879 = vmatprep.mubr.msk.f32.mxu1 %vm4398_vm0, %v4399_v1 }
 0xe3f   :  { %4081 = vmatprep.subr.bf16.mxu1 %v4397_v0 }
 0xe69   :  { %v4670_v56 = vpop.permute.xlu0 %1230 }
 0xe6a   :  { %3859 = vmatmul.mubr.msk.f32.vlgmr.msra.gmra.mrb[10].mxu0 %vm145_vm6, %v4670_v56 }
 0xe6b   :  { %4074 = vmatpush3.bf16.msra.mxu0 %v4462_v10  ;;  %3872 = vmatprep.mubr.msk.f32.mxu0 %vm4398_vm0, %v4399_v1 }
 0xe6c   :  { %4078 = vmatprep.subr.bf16.mxu0 %v4397_v0 }
 0xf10   :  { %v1375_v57 = vpop.f32.mrb[12].mxu1 }
 0xf11   :  { %v1417_v58 = vadd.f32 %v1375_v57, %v4490_v20  ;;  %1407 = vrot.lane.b32.xlu1 %v1375_v57, %s4402_s10  ;;  %v3867_v59 = vpop.f32.mrb[13].mxu1 }
 0xf13   :  { %1419 = vrot.lane.b32.xlu0 %v1417_v58, %s4401_s2 }
 0xf3d   :  { %v1300_v61 = vpop.f32.mrb[10].mxu0 }
 0xf3e   :  { %v1386_v63 = vadd.f32 %v1300_v61, %v4521_v54  ;;  %v3860_v3 = vpop.f32.mrb[11].mxu0  ;;  %v1379_v9 = vadd.f32 %v1300_v61, %v4509_v44 }
 0xf40   :  { %1388 = vrot.lane.b32.xlu1 %v1386_v63, %s4404_s12  ;;  %v3612_v12 = vmul.f32 -1.442695, %v1379_v9 }
 0xf83   :  { %v1408_v4 = vpop.permute.xlu1 %1407 }
 0xf84   :  { %v1410_v5 = vadd.f32 %v1408_v4, %v4512_v45 }
 0xf85   :  { %v1420_v17 = vpop.permute.xlu0 %1419 }
 0xf86   :  { %v3613_v8 = vmul.f32 -1.442695, %v1410_v5 }
 0xf88   :  { %4225 = vpow2.f32 %v3613_v8 }
 0xf92   :  { %v4226_v11 = vpop.eup %4225 }
 0xf93   :  { %v1414_v13 = vadd.f32 1.0, %v4226_v11 }
 0xf95   :  { %4227 = vrcp.f32 %v1414_v13 }
 0xf96   :  { %4229 = vpow2.f32 %v3612_v12 }
 0xf9f   :  { %v4228_v14 = vpop.eup %4227 }
 0xfa0   :  { %v1422_v19 = vmul.f32 %v4228_v14, %v1420_v17  ;;  %v4230_v21 = vpop.eup %4229  ;;  %v1429_v33 = vsub.f32 1.0, %v4228_v14  ;;  %v1435_v35 = vmul.f32 %v4228_v14, %v4660_v47 }
 0xfa1   :  { %v1383_v22 = vadd.f32 1.0, %v4230_v21 }
 0xfa2   :  { %1424 = vrot.lane.b32.xlu0 %v1422_v19, %s4403_s11 }
 0xfa3   :  { %4231 = vrcp.f32 %v1383_v22 }
 0xfad   :  { %v4232_v23 = vpop.eup %4231 }
 0xfae   :  { %v1404_v40 = vmul.f32 %v4232_v23, %v1197_v55 }
 0xfb2   :  { %v1389_v24 = vpop.permute.xlu1 %1388 }
 0xfb3   :  { %v1391_v25 = vmul.f32 %v4232_v23, %v1389_v24 }
 0xfb5   :  { %1393 = vrot.lane.b32.xlu1 %v1391_v25, %s4403_s11 }
0x1014   :  { %v1425_v26 = vpop.permute.xlu0 %1424 }
0x1015   :  { %v1427_v28 = vadd.f32 %v1425_v26, %v4512_v45  ;;  %v1398_v45 = vsub.f32 1.0, %v4232_v23 }
0x1017   :  { %4233 = vtanh.f32 %v1427_v28 }
0x1021   :  { %v4234_v29 = vpop.eup %4233 }
0x1022   :  { %1431 = vrot.lane.b32.xlu0 %v4234_v29, %s4405_s13 }
0x1027   :  { %v1394_v30 = vpop.permute.xlu1 %1393 }
0x1028   :  { %v1396_v31 = vadd.f32 %v1394_v30, %v4509_v44 }
0x102a   :  { %4235 = vtanh.f32 %v1396_v31 }
0x1034   :  { %v4236_v32 = vpop.eup %4235 }
0x1035   :  { %1400 = vrot.lane.b32.xlu1 %v4236_v32, %s4405_s13 }
0x1094   :  { %v1432_v34 = vpop.permute.xlu0 %1431 }
0x1095   :  { %v1434_v36 = vmul.f32 %v1432_v34, %v1429_v33 }
0x1097   :  { %v4692_v38 = vadd.f32 %v1435_v35, %v1434_v36 }
0x1099   :  { %1513 = vrot.lane.b32.xlu0 %v4692_v38, %s4406_s14 }
0x10a7   :  { %v1401_v39 = vpop.permute.xlu1 %1400 }
0x10a8   :  { %v1403_v46 = vmul.f32 %v1401_v39, %v1398_v45 }
0x10aa   :  { %v1405_v49 = vadd.f32 %v1404_v40, %v1403_v46 }
0x10ac   :  { %1438 = vrot.lane.b32.xlu1 %v1405_v49, %s4405_s13 }
0x110b   :  { %v1514_v44 = vpop.permute.xlu0 %1513 }
0x110c   :  { %3880 = vmatmul.mubr.msk.f32.vlgmr.msra.gmra.mrb[14].mxu1 %vm145_vm6, %v1514_v44 }
0x110d   :  { %4083 = vmatpush3.bf16.msra.mxu1 %v4466_v16  ;;  %3893 = vmatprep.mubr.msk.f32.mxu1 %vm4398_vm0, %v4399_v1 }
0x110e   :  { %4092 = vmatprep.subr.bf16.mxu1 %v4397_v0 }
0x111e   :  { %v4702_v48 = vpop.permute.xlu1 %1438 }
0x111f   :  { %3873 = vmatmul.mubr.msk.f32.vlgmr.msra.gmra.mrb[12].mxu0 %vm145_vm6, %v4702_v48 }
0x1120   :  { %4080 = vmatpush3.bf16.msra.mxu0 %v4462_v10  ;;  %3886 = vmatprep.mubr.msk.f32.mxu0 %vm4398_vm0, %v4399_v1 }
0x11df   :  { %v1583_v51 = vpop.f32.mrb[14].mxu1 }
0x11e0   :  { %v1625_v52 = vadd.f32 %v1583_v51, %v4490_v20  ;;  %1615 = vrot.lane.b32.xlu0 %v1583_v51, %s4402_s10  ;;  %v3881_v16 = vpop.f32.mrb[15].mxu1 }
0x11e2   :  { %1627 = vrot.lane.b32.xlu1 %v1625_v52, %s4401_s2 }
0x11f2   :  { %v1508_v55 = vpop.f32.mrb[12].mxu0 }
0x11f3   :  { %v1594_v50 = vadd.f32 %v1508_v55, %v4521_v54  ;;  %v3874_v57 = vpop.f32.mrb[13].mxu0  ;;  %v1587_v58 = vadd.f32 %v1508_v55, %v4503_v42 }
0x11f5   :  { %1596 = vrot.lane.b32.xlu0 %v1594_v50, %s4404_s12  ;;  %v3616_v10 = vmul.f32 -1.442695, %v1587_v58 }
0x11f7   :  { %4237 = vpow2.f32 %v3616_v10 }
0x1201   :  { %v4238_v3 = vpop.eup %4237 }
0x1202   :  { %v1591_v4 = vadd.f32 1.0, %v4238_v3 }
0x1252   :  { %v1616_v59 = vpop.permute.xlu0 %1615 }
0x1253   :  { %v1618_v61 = vadd.f32 %v1616_v59, %v4506_v43 }
0x1254   :  { %v1628_v14 = vpop.permute.xlu1 %1627 }
0x1255   :  { %v3617_v63 = vmul.f32 -1.442695, %v1618_v61 }
0x1257   :  { %4239 = vpow2.f32 %v3617_v63 }
0x1258   :  { %4241 = vrcp.f32 %v1591_v4 }
0x1261   :  { %v4240_v5 = vpop.eup %4239 }
0x1262   :  { %v1622_v8 = vadd.f32 1.0, %v4240_v5  ;;  %v4242_v9 = vpop.eup %4241 }
0x1263   :  { %v1606_v26 = vsub.f32 1.0, %v4242_v9  ;;  %v1612_v29 = vmul.f32 %v4242_v9, %v1405_v49 }
0x1264   :  { %4243 = vrcp.f32 %v1622_v8 }
0x1267   :  { %v1597_v11 = vpop.permute.xlu0 %1596 }
0x1268   :  { %v1599_v12 = vmul.f32 %v4242_v9, %v1597_v11 }
0x126a   :  { %1601 = vrot.lane.b32.xlu0 %v1599_v12, %s4403_s11 }
0x126e   :  { %v4244_v13 = vpop.eup %4243 }
0x126f   :  { %v1630_v17 = vmul.f32 %v4244_v13, %v1628_v14 }
0x1271   :  { %1632 = vrot.lane.b32.xlu1 %v1630_v17, %s4403_s11 }
0x12dc   :  { %v1602_v19 = vpop.permute.xlu0 %1601 }
0x12dd   :  { %v1604_v21 = vadd.f32 %v1602_v19, %v4503_v42  ;;  %v1637_v42 = vsub.f32 1.0, %v4244_v13 }
0x12df   :  { %4245 = vtanh.f32 %v1604_v21 }
0x12e3   :  { %v1633_v22 = vpop.permute.xlu1 %1632 }
0x12e4   :  { %v1635_v23 = vadd.f32 %v1633_v22, %v4506_v43  ;;  %v1643_v43 = vmul.f32 %v4244_v13, %v4692_v38 }
0x12e6   :  { %4247 = vtanh.f32 %v1635_v23 }
0x12e9   :  { %v4246_v24 = vpop.eup %4245 }
0x12ea   :  { %1608 = vrot.lane.b32.xlu0 %v4246_v24, %s4405_s13 }
0x12f0   :  { %v4248_v25 = vpop.eup %4247 }
0x12f1   :  { %1639 = vrot.lane.b32.xlu1 %v4248_v25, %s4405_s13 }
0x135c   :  { %v1609_v28 = vpop.permute.xlu0 %1608 }
0x135d   :  { %v1611_v30 = vmul.f32 %v1609_v28, %v1606_v26 }
0x135f   :  { %v4722_v31 = vadd.f32 %v1612_v29, %v1611_v30 }
0x1361   :  { %1646 = vrot.lane.b32.xlu0 %v4722_v31, %s4405_s13 }
0x1363   :  { %v1640_v32 = vpop.permute.xlu1 %1639 }
0x1364   :  { %v1642_v33 = vmul.f32 %v1640_v32, %v1637_v42 }
0x1366   :  { %v1644_v34 = vadd.f32 %v1643_v43, %v1642_v33 }
0x1368   :  { %1721 = vrot.lane.b32.xlu1 %v1644_v34, %s4406_s14 }
0x13d3   :  { %v4728_v35 = vpop.permute.xlu0 %1646 }
0x13d4   :  { %3887 = vmatmul.mubr.msk.f32.vlgmr.msra.gmra.mrb[14].mxu0 %vm145_vm6, %v4728_v35 }
0x13da   :  { %v1722_v36 = vpop.permute.xlu1 %1721 }
0x13db   :  { %3894 = vmatmul.mubr.msk.f32.vlgmr.msra.gmra.mrb[16].mxu1 %vm145_vm6, %v1722_v36 }
0x13dc   :  { %3911 = vmatprep.mubr.msk.f32.mxu1 %vm4398_vm0, %v4399_v1 }
0x14a7   :  { %v1716_v45 = vpop.f32.mrb[14].mxu0 }
0x14a8   :  { %v3888_v39 = vpop.f32.mrb[15].mxu0  ;;  %v1802_v44 = vadd.f32 %v1716_v45, %v4521_v54  ;;  %v1795_v51 = vadd.f32 %v1716_v45, %v4500_v41 }
0x14aa   :  { %v3620_v52 = vmul.f32 -1.442695, %v1795_v51 }
0x14ac   :  { %4249 = vpow2.f32 %v3620_v52  ;;  %v2043_v52 = vld [vmem:[#allocation5 + $0x60] sm:$0xff] }
0x14ae   :  { %v1791_v40 = vpop.f32.mrb[16].mxu1 }
0x14af   :  { %v1833_v46 = vadd.f32 %v1791_v40, %v4490_v20  ;;  %1823 = vrot.lane.b32.xlu1 %v1791_v40, %s4402_s10  ;;  %v3895_v49 = vpop.f32.mrb[17].mxu1 }
0x14b1   :  { %1835 = vrot.lane.b32.xlu0 %v1833_v46, %s4401_s2 }
0x14b3   :  { %1804 = vrot.lane.b32.xlu1 %v1802_v44, %s4404_s12 }
0x14b6   :  { %v4250_v16 = vpop.eup %4249 }
0x14b7   :  { %v1799_v55 = vadd.f32 1.0, %v4250_v16  ;;  %v2044_v16 = vld [vmem:[#allocation5 + $0x68] sm:$0xff] }
0x14b9   :  { %4251 = vrcp.f32 %v1799_v55  ;;  %v4785_v55 = vpack.c.bf16 %v2044_v16, %v2043_v52 }
0x14bb   :  { %4094 = vmatpush3.bf16.msra.mxu1 %v4785_v55 }
0x14bc   :  { %4095 = vmatprep.subr.bf16.mxu1 %v4397_v0 }
0x14be   :  { %3912 = vmatmul.mubr.f32.vlgmr.msra.gmra.mrb[18].mxu1 %v4399_v1 }
0x14bf   :  { %3918 = vmatprep.mubr.msk.f32.mxu1 %vm4398_vm0, %v4399_v1 }
0x14c3   :  { %v4252_v58 = vpop.eup %4251 }
0x14c4   :  { %v1820_v22 = vmul.f32 %v4252_v58, %v4722_v31 }
0x1521   :  { %v1824_v50 = vpop.permute.xlu1 %1823 }
0x1522   :  { %v1826_v57 = vadd.f32 %v1824_v50, %v4497_v37 }
0x1523   :  { %v1836_v3 = vpop.permute.xlu0 %1835 }
0x1524   :  { %v3621_v20 = vmul.f32 -1.442695, %v1826_v57 }
0x1525   :  { %v1805_v10 = vpop.permute.xlu1 %1804 }
0x1526   :  { %4253 = vpow2.f32 %v3621_v20  ;;  %v1807_v59 = vmul.f32 %v4252_v58, %v1805_v10 }
0x1528   :  { %1809 = vrot.lane.b32.xlu1 %v1807_v59, %s4403_s11 }
0x1530   :  { %v4254_v54 = vpop.eup %4253 }
0x1531   :  { %v1830_v61 = vadd.f32 1.0, %v4254_v54 }
0x1533   :  { %4255 = vrcp.f32 %v1830_v61 }
0x153d   :  { %v4256_v63 = vpop.eup %4255 }
0x153e   :  { %v1838_v4 = vmul.f32 %v4256_v63, %v1836_v3  ;;  %v1851_v14 = vmul.f32 %v4256_v63, %v1644_v34 }
0x1540   :  { %1840 = vrot.lane.b32.xlu0 %v1838_v4, %s4403_s11  ;;  %v1952_v4 = vld [vmem:[#allocation5 + $0x40] sm:$0xff] }
0x159a   :  { %v1810_v5 = vpop.permute.xlu1 %1809 }
0x159b   :  { %v1812_v8 = vadd.f32 %v1810_v5, %v4500_v41  ;;  %v1845_v41 = vsub.f32 1.0, %v4256_v63  ;;  %v1953_v5 = vld [vmem:[#allocation5 + $0x48] sm:$0xff] }
0x159d   :  { %4257 = vtanh.f32 %v1812_v8  ;;  %v1954_v8 = vld [vmem:[#allocation5 + $0x50] sm:$0xff] }
0x15a7   :  { %v4258_v9 = vpop.eup %4257 }
0x15a8   :  { %1816 = vrot.lane.b32.xlu1 %v4258_v9, %s4405_s13  ;;  %v4084_v9 = vpack.c.bf16 %v1953_v5, %v1952_v4 }
0x15aa   :  { %4085 = vmatprep.subr.bf16.mxu0 %v4084_v9 }
0x15ab   :  { %4087 = vmatpush3.bf16.msra.mxu0 %v4084_v9 }
0x15ac   :  { %1865 = vrot.lane.b32.xlu1 %v4692_v38, %s4407_s15  ;;  %v1814_v38 = vsub.f32 1.0, %v4252_v58 }
0x15b0   :  { %1885 = vrot.lane.b32.xlu1 %v4563_v6, %s4407_s15 }
0x15b2   :  { %v1841_v11 = vpop.permute.xlu0 %1840 }
0x15b3   :  { %v1843_v12 = vadd.f32 %v1841_v11, %v4497_v37  ;;  %v1955_v11 = vld [vmem:[#allocation5 + $0x58] sm:$0xff] }
0x15b5   :  { %4259 = vtanh.f32 %v1843_v12  ;;  %v4088_v12 = vpack.c.bf16 %v1955_v11, %v1954_v8 }
0x15b7   :  { %4089 = vmatprep.subr.bf16.mxu0 %v4088_v12 }
0x15b8   :  { %4091 = vmatpush3.bf16.msra.mxu0 %v4088_v12 }
0x15b9   :  { %4098 = vmatprep.subr.bf16.mxu0 %v4397_v0 }
0x15bf   :  { %v4260_v13 = vpop.eup %4259 }
0x15c0   :  { %1847 = vrot.lane.b32.xlu0 %v4260_v13, %s4405_s13  ;;  %v4795_v13 = vld [vmem:[#allocation5 + $0x11b] ss:$0 sm:$0xff] }
0x15c4   :  { %1860 = vrot.lane.b32.xlu0 %v1644_v34, %s4407_s15 }
0x15c8   :  { %1880 = vrot.lane.b32.xlu0 %v4596_v60, %s4407_s15 }
0x15cc   :  { %1870 = vrot.lane.b32.xlu0 %v4660_v47, %s4407_s15 }
0x15d0   :  { %1875 = vrot.lane.b32.xlu0 %v4628_v53, %s4407_s15 }
0x15d4   :  { %1893 = vrot.lane.b32.xlu0 %v4531_v18, %s4407_s15 }
0x161a   :  { %v1817_v37 = vpop.permute.xlu1 %1816 }
0x161b   :  { %v1819_v19 = vmul.f32 %v1817_v37, %v1814_v38 }
0x161d   :  { %v1821_v60 = vadd.f32 %v1820_v22, %v1819_v19 }
0x161e   :  { %v1866_v23 = vpop.permute.xlu1 %1865 }
0x161f   :  { %v1868_v25 = vsel %vm145_vm6, %v4606_v7, %v1866_v23 }
0x1620   :  { %v1901_v31 = vrot.slane %v1868_v25, 4 }
0x1622   :  { %v1886_v18 = vpop.permute.xlu1 %1885 }
0x1623   :  { %v1888_v43 = vsel %vm145_vm6, %v4728_v35, %v1886_v18  ;;  %v3622_v18 = vld [vmem:[#allocation5 + $0x11a] ss:$0 sm:$0xff] }
0x1624   :  { %v1910_v46 = vrot.slane %v1888_v43, 4 }
0x1632   :  { %v1848_v6 = vpop.permute.xlu0 %1847 }
0x1633   :  { %v1850_v17 = vmul.f32 %v1848_v6, %v1845_v41  ;;  %v2113_v41 = vpop.f32.mrb[18].mxu1 }
0x1634   :  { %v3913_v37 = vpop.f32.mrb[19].mxu1 }
0x1635   :  { %v1852_v21 = vadd.f32 %v1851_v14, %v1850_v17 }
0x1636   :  { %v1861_v47 = vpop.permute.xlu0 %1860 }
0x1637   :  { %1855 = vrot.lane.b32.xlu1 %v1852_v21, %s4407_s15  ;;  %v1863_v26 = vsel %vm145_vm6, %v4574_v15, %v1861_v47 }
0x1638   :  { %v1898_v42 = vrot.slane %v1863_v26, 6 }
0x163a   :  { %v1881_v53 = vpop.permute.xlu0 %1880 }
0x163b   :  { %1890 = vrot.lane.b32.xlu1 %v1821_v60, %s4405_s13  ;;  %v1883_v29 = vsel %vm145_vm6, %v4702_v48, %v1881_v53 }
0x163c   :  { %v1907_v33 = vrot.slane %v1883_v29, 6 }
0x163e   :  { %v1871_v24 = vpop.permute.xlu0 %1870 }
0x163f   :  { %v1873_v30 = vsel %vm145_vm6, %v4638_v62, %v1871_v24 }
0x1640   :  { %v1904_v48 = vrot.slane %v1873_v30, 2 }
0x1642   :  { %v1876_v28 = vpop.permute.xlu0 %1875 }
0x1643   :  { %v1878_v7 = vsel %vm145_vm6, %v4670_v56, %v1876_v28 }
0x1644   :  { %v1921_v36 = vsel %vm1915_vm7, %v1878_v7, %v1907_v33 }
0x1646   :  { %v1894_v45 = vpop.permute.xlu0 %1893 }
0x16a9   :  { %v1856_v32 = vpop.permute.xlu1 %1855 }
0x16aa   :  { %v1858_v15 = vsel %vm145_vm6, %v4542_v27, %v1856_v32  ;;  %v1922_v27 = vsel %vm1917_vm8, %v1921_v36, %v1910_v46 }
0x16ab   :  { %v1916_v34 = vsel %vm1915_vm7, %v1858_v15, %v1898_v42 }
0x16ac   :  { %v1918_v62 = vsel %vm1917_vm8, %v1916_v34, %v1901_v31 }
0x16ad   :  { %v1891_v39 = vpop.permute.xlu1 %1890  ;;  %v1920_v40 = vsel %vm1919_vm9, %v1918_v62, %v1904_v48 }
0x16ae   :  { %v1896_v35 = vsel %vm145_vm6, %v1891_v39, %v1894_v45  ;;  %v1925_v56 = vsel %vm1924_vm10, %v1920_v40, 0.0 }
0x16af   :  { %v1913_v49 = vrot.slane %v1896_v35, 2  ;;  %1926 = vadd.xlane.f32.xlu1 %v1925_v56 }
0x16b1   :  { %v1923_v44 = vsel %vm1919_vm9, %v1922_v27, %v1913_v49 }
0x16b2   :  { %v1928_v51 = vsel %vm1924_vm10, %v1923_v44, 0.0 }
0x16b3   :  { %1929 = vadd.xlane.f32.xlu0 %v1928_v51 }
0x173c   :  { %v1927_v50 = vpop.xlane.xlu1 %1926 }
0x173d   :  { %v1932_v57 = vmul.f32 0.03125, %v1927_v50 }
0x173f   :  { %v1934_v20 = vsub.f32 %v1920_v40, %v1932_v57 }
0x1740   :  { %v1930_v58 = vpop.xlane.xlu0 %1929 }
0x1741   :  { %v1933_v10 = vmul.f32 0.03125, %v1930_v58  ;;  %v1936_v59 = vmul.f32 %v1934_v20, %v1934_v20 }
0x1743   :  { %v1935_v54 = vsub.f32 %v1923_v44, %v1933_v10  ;;  %v1938_v61 = vsel %vm1924_vm10, %v1936_v59, 0.0 }
0x1744   :  { %1939 = vadd.xlane.f32.xlu0 %v1938_v61  ;;  %v2046_v61 = vld [vmem:[#allocation5 + $0x78] sm:$0xff] }
0x1745   :  { %v1937_v63 = vmul.f32 %v1935_v54, %v1935_v54 }
0x1747   :  { %v1941_v3 = vsel %vm1924_vm10, %v1937_v63, 0.0 }
0x1748   :  { %1942 = vadd.xlane.f32.xlu1 %v1941_v3 }
0x175a   :  { %2199 = vrot.lane.b32.xlu0 %v4795_v13, %s4403_s11 }
0x17d1   :  { %v1940_v6 = vpop.xlane.xlu0 %1939 }
0x17d2   :  { %v1944_v38 = vmul.f32 0.03125, %v1940_v6 }
0x17d4   :  { %v1946_v14 = vadd.f32 1e-05, %v1944_v38 }
0x17d5   :  { %v1943_v17 = vpop.xlane.xlu1 %1942  ;;  %v4799_v22 = vpop.permute.xlu0 %2199 }
0x17d6   :  { %4261 = vrsqrt.f32 %v1946_v14  ;;  %v1945_v19 = vmul.f32 0.03125, %v1943_v17  ;;  %v2202_v60 = vadd.f32 %v4799_v22, %v2113_v41 }
0x17d8   :  { %v1947_v21 = vadd.f32 1e-05, %v1945_v19  ;;  %2204 = vrot.lane.b32.xlu1 %v2202_v60, %s4404_s12 }
0x17da   :  { %4263 = vrsqrt.f32 %v1947_v21 }
0x17e0   :  { %v4262_v47 = vpop.eup %4261 }
0x17e1   :  { %v1950_v53 = vmul.f32 %v4262_v47, %v1934_v20 }
0x17e3   :  { %3904 = vmatprep.mubr.msk.f32.mxu0 %vm1924_vm10, %v1950_v53 }
0x17e4   :  { %v4264_v23 = vpop.eup %4263 }
0x17e5   :  { %v4804_v24 = vmul.f32 %v4264_v23, %v1935_v54  ;;  %v2045_v54 = vld [vmem:[#allocation5 + $0x70] sm:$0xff] }
0x17e6   :  { %v4096_v63 = vpack.c.bf16 %v2046_v61, %v2045_v54 }
0x17e7   :  { %3905 = vmatmul.mubr.msk.f32.vlgmr.msra.gmra.mrb[16].mxu0 %vm1924_vm10, %v4804_v24 }
0x17e8   :  { %4100 = vmatpush3.bf16.msra.mxu0 %v4785_v55  ;;  %3925 = vmatprep.mubr.msk.f32.mxu0 %vm4398_vm0, %v4399_v1 }
0x17e9   :  { %4104 = vmatprep.subr.bf16.mxu0 %v4397_v0  ;;  %4097 = vmatpush3.bf16.msra.mxu1 %v4096_v63 }
0x17ea   :  { %4101 = vmatprep.subr.bf16.mxu1 %v4397_v0 }
0x17ec   :  { %3919 = vmatmul.mubr.f32.vlgmr.msra.gmra.mrb[20].mxu1 %v4399_v1 }
0x17ed   :  { %4103 = vmatpush3.bf16.msra.mxu1 %v4785_v55  ;;  %3932 = vmatprep.mubr.msk.f32.mxu1 %vm4398_vm0, %v4399_v1 }
0x17ee   :  { %4107 = vmatprep.subr.bf16.mxu1 %v4397_v0 }
0x184a   :  { %v2205_v43 = vpop.permute.xlu1 %2204 }
0x18ba   :  { %v3906_v25 = vpop.f32.mrb[16].mxu0 }
0x18bb   :  { %v4812_v26 = vadd.f32 %v3906_v25, %v3622_v18  ;;  %v2033_v28 = vpop.f32.mrb[17].mxu0 }
0x18bc   :  { %v4814_v29 = vadd.f32 %v3622_v18, %v2033_v28 }
0x18be   :  { %v2187_v30 = vadd.f32 %v2113_v41, %v4814_v29 }
0x18bf   :  { %v4839_v37 = vpop.f32.mrb[20].mxu1 }
0x18c0   :  { %v3625_v31 = vmul.f32 -1.442695, %v2187_v30  ;;  %v3920_v6 = vpop.f32.mrb[21].mxu1 }
0x18c2   :  { %4265 = vpow2.f32 %v3625_v31 }
0x18cc   :  { %v4266_v42 = vpop.eup %4265 }
0x18cd   :  { %v2191_v32 = vadd.f32 1.0, %v4266_v42 }
0x18cf   :  { %4267 = vrcp.f32 %v2191_v32 }
0x18d9   :  { %v4268_v7 = vpop.eup %4267 }
0x18da   :  { %v2207_v15 = vmul.f32 %v4268_v7, %v2205_v43  ;;  %v2214_v62 = vsub.f32 1.0, %v4268_v7  ;;  %v2220_v45 = vmul.f32 0.0, %v4268_v7 }
0x18dc   :  { %2209 = vrot.lane.b32.xlu1 %v2207_v15, %s4403_s11 }
0x194e   :  { %v2210_v33 = vpop.permute.xlu1 %2209 }
0x194f   :  { %v2212_v48 = vadd.f32 %v2210_v33, %v4814_v29 }
0x1951   :  { %4269 = vtanh.f32 %v2212_v48 }
0x195b   :  { %v4270_v34 = vpop.eup %4269 }
0x195c   :  { %2216 = vrot.lane.b32.xlu0 %v4270_v34, %s4405_s13 }
0x19ce   :  { %v2217_v36 = vpop.permute.xlu0 %2216 }
0x19cf   :  { %v2219_v39 = vmul.f32 %v2217_v36, %v2214_v62 }
0x19d1   :  { %v2221_v40 = vadd.f32 %v2220_v45, %v2219_v39 }
0x19d3   :  { %2259 = vrot.lane.b32.xlu1 %v2221_v40, %s4405_s13  ;;  %v2362_v4 = vrot.slane %v2221_v40, 6 }
0x1a45   :  { %v2260_v46 = vpop.permute.xlu1 %2259 }
0x1a46   :  { %3926 = vmatmul.mubr.msk.f32.vlgmr.msra.gmra.mrb[18].mxu0 %vm145_vm6, %v2260_v46 }
0x1a47   :  { %4106 = vmatpush3.bf16.msra.mxu0 %v4785_v55  ;;  %3939 = vmatprep.mubr.msk.f32.mxu0 %vm4398_vm0, %v4399_v1 }
0x1a48   :  { %4110 = vmatprep.subr.bf16.mxu0 %v4397_v0 }
0x1b19   :  { %v2329_v35 = vpop.f32.mrb[18].mxu0 }
0x1b1a   :  { %v2343_v56 = vadd.f32 %v2329_v35, %v4799_v22  ;;  %v3927_v49 = vpop.f32.mrb[19].mxu0  ;;  %v2334_v44 = vrot.slane %v2329_v35, 6 }
0x1b1c   :  { %v2345_v27 = vrot.slane %v2343_v56, 6  ;;  %v2336_v51 = vadd.f32 %v2334_v44, %v4814_v29 }
0x1b1e   :  { %2346 = vrot.lane.b32.xlu0 %v2345_v27, %s4404_s12  ;;  %v3629_v52 = vmul.f32 -1.442695, %v2336_v51 }
0x1b20   :  { %4271 = vpow2.f32 %v3629_v52 }
0x1b2a   :  { %v4272_v16 = vpop.eup %4271 }
0x1b2b   :  { %v2340_v50 = vadd.f32 1.0, %v4272_v16 }
0x1b2d   :  { %4273 = vrcp.f32 %v2340_v50 }
0x1b37   :  { %v4274_v57 = vpop.eup %4273 }
0x1b38   :  { %v2356_v5 = vsub.f32 1.0, %v4274_v57  ;;  %v2364_v11 = vmul.f32 %v4274_v57, %v2362_v4 }
0x1b90   :  { %v2347_v20 = vpop.permute.xlu0 %2346 }
0x1b91   :  { %v2349_v58 = vmul.f32 %v4274_v57, %v2347_v20 }
0x1b93   :  { %2351 = vrot.lane.b32.xlu1 %v2349_v58, %s4403_s11 }
0x1c05   :  { %v2352_v10 = vpop.permute.xlu1 %2351 }
0x1c06   :  { %v2354_v59 = vadd.f32 %v2352_v10, %v4814_v29 }
0x1c08   :  { %4275 = vtanh.f32 %v2354_v59 }
0x1c12   :  { %v4276_v3 = vpop.eup %4275 }
0x1c13   :  { %2358 = vrot.lane.b32.xlu0 %v4276_v3, %s4405_s13 }
0x1c85   :  { %v2359_v8 = vpop.permute.xlu0 %2358 }
0x1c86   :  { %v2361_v9 = vmul.f32 %v2359_v8, %v2356_v5 }
0x1c88   :  { %v2365_v12 = vadd.f32 %v2364_v11, %v2361_v9 }
0x1c8a   :  { %v2367_v41 = vrot.slane %v2365_v12, 2  ;;  %v2471_v43 = vrot.slane %v2365_v12, 6 }
0x1c8c   :  { %2368 = vrot.lane.b32.xlu1 %v2367_v41, %s4405_s13 }
0x1cfe   :  { %v2369_v38 = vpop.permute.xlu1 %2368 }
0x1cff   :  { %3933 = vmatmul.mubr.msk.f32.vlgmr.msra.gmra.mrb[22].mxu1 %vm145_vm6, %v2369_v38 }
0x1d00   :  { %4109 = vmatpush3.bf16.msra.mxu1 %v4785_v55  ;;  %3946 = vmatprep.mubr.msk.f32.mxu1 %vm4398_vm0, %v4399_v1 }
0x1d01   :  { %4113 = vmatprep.subr.bf16.mxu1 %v4397_v0 }
0x1dd2   :  { %v2438_v14 = vpop.f32.mrb[22].mxu1 }
0x1dd3   :  { %v2452_v17 = vadd.f32 %v2438_v14, %v4799_v22  ;;  %v3934_v19 = vpop.f32.mrb[23].mxu1  ;;  %v2443_v60 = vrot.slane %v2438_v14, 4 }
0x1dd5   :  { %v2454_v21 = vrot.slane %v2452_v17, 4  ;;  %v2445_v47 = vadd.f32 %v2443_v60, %v4814_v29 }
0x1dd7   :  { %2455 = vrot.lane.b32.xlu0 %v2454_v21, %s4404_s12  ;;  %v3631_v53 = vmul.f32 -1.442695, %v2445_v47 }
0x1dd9   :  { %4277 = vpow2.f32 %v3631_v53 }
0x1de3   :  { %v4278_v23 = vpop.eup %4277 }
0x1de4   :  { %v2449_v18 = vadd.f32 1.0, %v4278_v23 }
0x1de6   :  { %4279 = vrcp.f32 %v2449_v18 }
0x1df0   :  { %v4280_v25 = vpop.eup %4279 }
0x1df1   :  { %v2465_v7 = vsub.f32 1.0, %v4280_v25  ;;  %v2473_v33 = vmul.f32 %v4280_v25, %v2471_v43 }
0x1e49   :  { %v2456_v28 = vpop.permute.xlu0 %2455 }
0x1e4a   :  { %v2458_v30 = vmul.f32 %v4280_v25, %v2456_v28 }
0x1e4c   :  { %2460 = vrot.lane.b32.xlu1 %v2458_v30, %s4403_s11 }
0x1ebe   :  { %v2461_v31 = vpop.permute.xlu1 %2460 }
0x1ebf   :  { %v2463_v42 = vadd.f32 %v2461_v31, %v4814_v29 }
0x1ec1   :  { %4281 = vtanh.f32 %v2463_v42 }
0x1ecb   :  { %v4282_v32 = vpop.eup %4281 }
0x1ecc   :  { %2467 = vrot.lane.b32.xlu0 %v4282_v32, %s4405_s13 }
0x1f3e   :  { %v2468_v15 = vpop.permute.xlu0 %2467 }
0x1f3f   :  { %v2470_v48 = vmul.f32 %v2468_v15, %v2465_v7 }
0x1f41   :  { %v2474_v34 = vadd.f32 %v2473_v33, %v2470_v48 }
0x1f43   :  { %v2476_v62 = vrot.slane %v2474_v34, 4  ;;  %v2580_v58 = vrot.slane %v2474_v34, 6 }
0x1f45   :  { %2477 = vrot.lane.b32.xlu1 %v2476_v62, %s4405_s13 }
0x1fb7   :  { %v2478_v36 = vpop.permute.xlu1 %2477 }
0x1fb8   :  { %3940 = vmatmul.mubr.msk.f32.vlgmr.msra.gmra.mrb[20].mxu0 %vm145_vm6, %v2478_v36 }
0x1fb9   :  { %4112 = vmatpush3.bf16.msra.mxu0 %v4785_v55  ;;  %3953 = vmatprep.mubr.msk.f32.mxu0 %vm4398_vm0, %v4399_v1 }
0x1fba   :  { %4116 = vmatprep.subr.bf16.mxu0 %v4397_v0 }
0x208b   :  { %v2547_v45 = vpop.f32.mrb[20].mxu0 }
0x208c   :  { %v2561_v39 = vadd.f32 %v2547_v45, %v4799_v22  ;;  %v3941_v40 = vpop.f32.mrb[21].mxu0  ;;  %v2552_v35 = vrot.slane %v2547_v45, 2 }
0x208e   :  { %v2563_v46 = vrot.slane %v2561_v39, 2  ;;  %v2554_v56 = vadd.f32 %v2552_v35, %v4814_v29 }
0x2090   :  { %2564 = vrot.lane.b32.xlu0 %v2563_v46, %s4404_s12  ;;  %v3633_v49 = vmul.f32 -1.442695, %v2554_v56 }
0x2092   :  { %4283 = vpow2.f32 %v3633_v49 }
0x209c   :  { %v4284_v27 = vpop.eup %4283 }
0x209d   :  { %v2558_v44 = vadd.f32 1.0, %v4284_v27 }
0x209f   :  { %4285 = vrcp.f32 %v2558_v44 }
0x20a9   :  { %v4286_v51 = vpop.eup %4285 }
0x20aa   :  { %v2574_v10 = vsub.f32 1.0, %v4286_v51  ;;  %v2582_v54 = vmul.f32 %v4286_v51, %v2580_v58 }
0x2102   :  { %v2565_v52 = vpop.permute.xlu0 %2564 }
0x2103   :  { %v2567_v16 = vmul.f32 %v4286_v51, %v2565_v52 }
0x2105   :  { %2569 = vrot.lane.b32.xlu1 %v2567_v16, %s4403_s11 }
0x2177   :  { %v2570_v50 = vpop.permute.xlu1 %2569 }
0x2178   :  { %v2572_v57 = vadd.f32 %v2570_v50, %v4814_v29 }
0x217a   :  { %4287 = vtanh.f32 %v2572_v57 }
0x2184   :  { %v4288_v20 = vpop.eup %4287 }
0x2185   :  { %2576 = vrot.lane.b32.xlu0 %v4288_v20, %s4405_s13 }
0x21f7   :  { %v2577_v59 = vpop.permute.xlu0 %2576 }
0x21f8   :  { %v2579_v61 = vmul.f32 %v2577_v59, %v2574_v10 }
0x21fa   :  { %v2583_v63 = vadd.f32 %v2582_v54, %v2579_v61 }
0x21fc   :  { %v2585_v3 = vrot.slane %v2583_v63, 6 }
0x21fe   :  { %2586 = vrot.lane.b32.xlu1 %v2585_v3, %s4405_s13 }
0x2270   :  { %v2587_v4 = vpop.permute.xlu1 %2586 }
0x2271   :  { %3947 = vmatmul.mubr.msk.f32.vlgmr.msra.gmra.mrb[24].mxu1 %vm145_vm6, %v2587_v4 }
0x2272   :  { %4115 = vmatpush3.bf16.msra.mxu1 %v4785_v55  ;;  %3960 = vmatprep.mubr.msk.f32.mxu1 %vm4398_vm0, %v4399_v1 }
0x2273   :  { %4119 = vmatprep.subr.bf16.mxu1 %v4397_v0 }
0x2344   :  { %v2656_v29 = vpop.f32.mrb[24].mxu1 }
0x2345   :  { %v2667_v5 = vadd.f32 %v2656_v29, %v4799_v22  ;;  %v3948_v8 = vpop.f32.mrb[25].mxu1  ;;  %v2660_v9 = vadd.f32 %v2656_v29, %v4812_v26 }
0x2347   :  { %2669 = vrot.lane.b32.xlu0 %v2667_v5, %s4404_s12  ;;  %v3635_v11 = vmul.f32 -1.442695, %v2660_v9 }
0x2349   :  { %4289 = vpow2.f32 %v3635_v11 }
0x2353   :  { %v4290_v12 = vpop.eup %4289 }
0x2354   :  { %v2664_v41 = vadd.f32 1.0, %v4290_v12 }
0x2356   :  { %4291 = vrcp.f32 %v2664_v41 }
0x2360   :  { %v4292_v6 = vpop.eup %4291 }
0x2361   :  { %v2679_v60 = vsub.f32 1.0, %v4292_v6  ;;  %v2686_v53 = vmul.f32 %v4292_v6, %v2585_v3 }
0x23b9   :  { %v2670_v38 = vpop.permute.xlu0 %2669 }
0x23ba   :  { %v2672_v14 = vmul.f32 %v4292_v6, %v2670_v38 }
0x23bc   :  { %2674 = vrot.lane.b32.xlu1 %v2672_v14, %s4403_s11 }
0x242e   :  { %v2675_v17 = vpop.permute.xlu1 %2674 }
0x242f   :  { %v2677_v19 = vadd.f32 %v2675_v17, %v4812_v26 }
0x2431   :  { %4293 = vtanh.f32 %v2677_v19  ;;  %v2223_v19 = vrot.slane %v4839_v37, 2 }
0x243b   :  { %v4294_v21 = vpop.eup %4293 }
0x243c   :  { %2681 = vrot.lane.b32.xlu0 %v4294_v21, %s4405_s13 }
0x24ae   :  { %v2682_v47 = vpop.permute.xlu0 %2681 }
0x24af   :  { %v2684_v23 = vmul.f32 %v2682_v47, %v2679_v60 }
0x24b1   :  { %v2687_v18 = vadd.f32 %v2686_v53, %v2684_v23 }
0x24b3   :  { %2689 = vrot.lane.b32.xlu1 %v2687_v18, %s4405_s13  ;;  %v2792_v39 = vrot.slane %v2687_v18, 6 }
0x2525   :  { %v2690_v25 = vpop.permute.xlu1 %2689 }
0x2526   :  { %3954 = vmatmul.mubr.msk.f32.vlgmr.msra.gmra.mrb[22].mxu0 %vm145_vm6, %v2690_v25 }
0x2527   :  { %4118 = vmatpush3.bf16.msra.mxu0 %v4785_v55  ;;  %3967 = vmatprep.mubr.msk.f32.mxu0 %vm4398_vm0, %v4399_v1 }
0x2528   :  { %4125 = vmatprep.subr.bf16.mxu0 %v4397_v0 }
0x25f9   :  { %v2759_v28 = vpop.f32.mrb[22].mxu0 }
0x25fa   :  { %v2773_v30 = vadd.f32 %v2759_v28, %v4799_v22  ;;  %v3955_v31 = vpop.f32.mrb[23].mxu0  ;;  %v2764_v32 = vrot.slane %v2759_v28, 6 }
0x25fc   :  { %v2775_v42 = vrot.slane %v2773_v30, 6  ;;  %v2766_v43 = vadd.f32 %v2764_v32, %v4812_v26 }
0x25fe   :  { %2776 = vrot.lane.b32.xlu0 %v2775_v42, %s4404_s12  ;;  %v3637_v7 = vmul.f32 -1.442695, %v2766_v43 }
0x2600   :  { %4295 = vpow2.f32 %v3637_v7 }
0x260a   :  { %v4296_v15 = vpop.eup %4295 }
0x260b   :  { %v2770_v33 = vadd.f32 1.0, %v4296_v15 }
0x260d   :  { %4297 = vrcp.f32 %v2770_v33 }
0x2617   :  { %v4298_v55 = vpop.eup %4297 }
0x2618   :  { %v2786_v40 = vsub.f32 1.0, %v4298_v55  ;;  %v2794_v56 = vmul.f32 %v4298_v55, %v2792_v39 }
0x2670   :  { %v2777_v48 = vpop.permute.xlu0 %2776 }
0x2671   :  { %v2779_v34 = vmul.f32 %v4298_v55, %v2777_v48 }
0x2673   :  { %2781 = vrot.lane.b32.xlu1 %v2779_v34, %s4403_s11 }
0x26e5   :  { %v2782_v62 = vpop.permute.xlu1 %2781 }
0x26e6   :  { %v2784_v36 = vadd.f32 %v2782_v62, %v4812_v26 }
0x26e8   :  { %4299 = vtanh.f32 %v2784_v36 }
0x26f2   :  { %v4300_v45 = vpop.eup %4299 }
0x26f3   :  { %2788 = vrot.lane.b32.xlu0 %v4300_v45, %s4405_s13 }
0x2765   :  { %v2789_v46 = vpop.permute.xlu0 %2788 }
0x2766   :  { %v2791_v35 = vmul.f32 %v2789_v46, %v2786_v40 }
0x2768   :  { %v2795_v49 = vadd.f32 %v2794_v56, %v2791_v35 }
0x276a   :  { %v2797_v27 = vrot.slane %v2795_v49, 2  ;;  %v2901_v5 = vrot.slane %v2795_v49, 6 }
0x276c   :  { %2798 = vrot.lane.b32.xlu1 %v2797_v27, %s4405_s13 }
0x27de   :  { %v2799_v44 = vpop.permute.xlu1 %2798 }
0x27df   :  { %3961 = vmatmul.mubr.msk.f32.vlgmr.msra.gmra.mrb[26].mxu1 %vm145_vm6, %v2799_v44  ;;  %v3147_v44 = vld [vmem:[#allocation5 + $0xa0] sm:$0xff] }
0x27e0   :  { %3978 = vmatprep.mubr.msk.f32.mxu1 %vm4398_vm0, %v4399_v1 }
0x28b2   :  { %v2868_v51 = vpop.f32.mrb[26].mxu1 }
0x28b3   :  { %v2882_v52 = vadd.f32 %v2868_v51, %v4799_v22  ;;  %v3962_v16 = vpop.f32.mrb[27].mxu1  ;;  %v2873_v57 = vrot.slane %v2868_v51, 4  ;;  %v3148_v51 = vld [vmem:[#allocation5 + $0xa8] sm:$0xff] }
0x28b4   :  { %v4126_v16 = vpack.c.bf16 %v3148_v51, %v3147_v44 }
0x28b5   :  { %v2884_v50 = vrot.slane %v2882_v52, 4  ;;  %v2875_v20 = vadd.f32 %v2873_v57, %v4812_v26  ;;  %v3149_v52 = vld [vmem:[#allocation5 + $0xb0] sm:$0xff] }
0x28b7   :  { %2885 = vrot.lane.b32.xlu0 %v2884_v50, %s4404_s12  ;;  %v3639_v58 = vmul.f32 -1.442695, %v2875_v20  ;;  %v3150_v50 = vld [vmem:[#allocation5 + $0xb8] sm:$0xff] }
0x28b9   :  { %4301 = vpow2.f32 %v3639_v58 }
0x28c3   :  { %v4302_v10 = vpop.eup %4301 }
0x28c4   :  { %v2879_v59 = vadd.f32 1.0, %v4302_v10  ;;  %v3151_v10 = vld [vmem:[#allocation5 + $0xc0] sm:$0xff] }
0x28c6   :  { %4303 = vrcp.f32 %v2879_v59  ;;  %v3152_v59 = vld [vmem:[#allocation5 + $0xc8] sm:$0x7f] }
0x28d0   :  { %v4304_v54 = vpop.eup %4303 }
0x28d1   :  { %v2895_v8 = vsub.f32 1.0, %v4304_v54  ;;  %v2903_v11 = vmul.f32 %v4304_v54, %v2901_v5 }
0x2929   :  { %v2886_v61 = vpop.permute.xlu0 %2885 }
0x292a   :  { %v2888_v63 = vmul.f32 %v4304_v54, %v2886_v61 }
0x292c   :  { %2890 = vrot.lane.b32.xlu1 %v2888_v63, %s4403_s11 }
0x299e   :  { %v2891_v3 = vpop.permute.xlu1 %2890 }
0x299f   :  { %v2893_v4 = vadd.f32 %v2891_v3, %v4812_v26  ;;  %v4132_v3 = vpack.c.bf16 %v3152_v59, %v3151_v10  ;;  %v3484_v10 = vld [vmem:[#allocation5 + $0x108] sm:$0xff]  ;;  %v3485_v59 = vld [vmem:[#allocation5 + $0x110] sm:$0x1f] }
0x29a1   :  { %4305 = vtanh.f32 %v2893_v4  ;;  %v3146_v4 = vld [vmem:[%s4965_s1] sm:$0x3]  ;;  %s4408_s1 = smov [#allocation7]  }
0x29a2   :  { %s3577_s18 = sshll.u32 %s4408_s1, 4  ;;  %s3578_s18 = int_to_ptr.vmem [resolvable:$true] %s3577_s18 }
0x29a3   :  { %s4365_s19 = scalar_lea.vmem %s3578_s18, 32  ;;  %p4370_p3 = scmp.lt.s32.totalorder %s3578_s18, %s3578_s18 }
0x29a4   :  { %p4366_p2 = scmp.ne.s32.totalorder %s3578_s18, %s4365_s19  ;;  %p4371_p4 = scmp.lt.s32.totalorder %s4365_s19, %s4365_s19 }
0x29a6   :  { %p4372_p5 = por %p4371_p4, %p4370_p3 }
0x29a8   :  { %p4373_p6 = pnand %p4372_p5, %p4366_p2 }
0x29ab   :  { %v4306_v29 = vpop.eup %4305 }
0x29ac   :  { %2897 = vrot.lane.b32.xlu0 %v4306_v29, %s4405_s13  ;;  %v3642_v29 = vld [vmem:[#allocation5 + $0x11c] ss:$0 sm:$0xff] }
0x29ad   :  { %v3028_v5 = vmul.f32 %v3642_v29, %v4804_v24  ;;  %v3064_v24 = vld [vmem:[#allocation5 + $0x90] sm:$0xff] }
0x29b0   :  { %2234 = vrot.lane.b32.xlu0 %v4795_v13, %s4401_s2 }
0x2a1e   :  { %v2898_v9 = vpop.permute.xlu0 %2897 }
0x2a1f   :  { %v2900_v12 = vmul.f32 %v2898_v9, %v2895_v8  ;;  %v3643_v8 = vld [vmem:[#allocation5 + $0x11d] ss:$0 sm:$0xff] }
0x2a21   :  { %v4900_v41 = vadd.f32 %v2903_v11, %v2900_v12  ;;  %v3034_v11 = vadd.f32 %v3643_v8, %v3028_v5 }
0x2a22   :  { %v2235_v6 = vpop.permute.xlu0 %2234 }
0x2a23   :  { %v2906_v38 = vrot.slane %v4900_v41, 4  ;;  %v2237_v14 = vadd.f32 %v2235_v6, %v4839_v37  ;;  %v3010_v57 = vrot.slane %v4900_v41, 6 }
0x2a25   :  { %v2239_v17 = vrot.slane %v2237_v14, 2  ;;  %2907 = vrot.lane.b32.xlu1 %v2906_v38, %s4405_s13 }
0x2a27   :  { %2240 = vrot.lane.b32.xlu0 %v2239_v17, %s4401_s2 }
0x2a29   :  { %2224 = vrot.lane.b32.xlu1 %v2223_v19, %s4402_s10 }
0x2a97   :  { %v2908_v13 = vpop.permute.xlu1 %2907 }
0x2a98   :  { %3968 = vmatmul.mubr.msk.f32.vlgmr.msra.gmra.mrb[24].mxu0 %vm145_vm6, %v2908_v13 }
0x2a99   :  { %3993 = vmatprep.mubr.msk.f32.mxu0 %vm4398_vm0, %v4399_v1  ;;  %v2241_v37 = vpop.permute.xlu0 %2240  ;;  %4127 = vmatpush3.bf16.msra.mxu0 %v4126_v16 }
0x2a9a   :  { %4128 = vmatprep.subr.bf16.mxu0 %v4397_v0 }
0x2a9b   :  { %v2225_v21 = vpop.permute.xlu1 %2224 }
0x2a9c   :  { %v2227_v60 = vadd.f32 %v2225_v21, %v4812_v26  ;;  %v3062_v21 = vld [vmem:[#allocation5 + $0x80] sm:$0xff] }
0x2a9e   :  { %v3627_v47 = vmul.f32 -1.442695, %v2227_v60  ;;  %v3063_v60 = vld [vmem:[#allocation5 + $0x88] sm:$0xff] }
0x2aa0   :  { %4307 = vpow2.f32 %v3627_v47  ;;  %v4120_v47 = vpack.c.bf16 %v3063_v60, %v3062_v21 }
0x2aa2   :  { %4121 = vmatpush3.bf16.msra.mxu1 %v4120_v47 }
0x2aa3   :  { %4122 = vmatprep.subr.bf16.mxu1 %v4397_v0 }
0x2aaa   :  { %v4308_v53 = vpop.eup %4307 }
0x2aab   :  { %v2231_v23 = vadd.f32 1.0, %v4308_v53  ;;  %v3065_v53 = vld [vmem:[#allocation5 + $0x98] sm:$0xff] }
0x2aad   :  { %4309 = vrcp.f32 %v2231_v23  ;;  %v4123_v23 = vpack.c.bf16 %v3065_v53, %v3064_v24 }
0x2aaf   :  { %4124 = vmatpush3.bf16.msra.mxu1 %v4123_v23 }
0x2ab0   :  { %4135 = vmatprep.subr.bf16.mxu1 %v4397_v0 }
0x2ab7   :  { %v4310_v18 = vpop.eup %4309 }
0x2ab8   :  { %v2243_v25 = vmul.f32 %v4310_v18, %v2241_v37  ;;  %v2250_v46 = vsub.f32 1.0, %v4310_v18  ;;  %v2256_v49 = vmul.f32 0.0, %v4310_v18 }
0x2aba   :  { %2245 = vrot.lane.b32.xlu0 %v2243_v25, %s4403_s11 }
0x2b2c   :  { %v2246_v28 = vpop.permute.xlu0 %2245 }
0x2b2d   :  { %v2248_v30 = vadd.f32 %v2246_v28, %v4812_v26 }
0x2b2f   :  { %4311 = vtanh.f32 %v2248_v30 }
0x2b39   :  { %v4312_v31 = vpop.eup %4311 }
0x2b3a   :  { %2252 = vrot.lane.b32.xlu0 %v4312_v31, %s4405_s13 }
0x2b6b   :  { %v2977_v42 = vpop.f32.mrb[24].mxu0 }
0x2b6c   :  { %v2991_v32 = vadd.f32 %v2977_v42, %v4799_v22  ;;  %v3969_v43 = vpop.f32.mrb[25].mxu0  ;;  %v2982_v15 = vrot.slane %v2977_v42, 2  ;;  %v3644_v42 = vld [vmem:[#allocation5 + $0x11e] ss:$0 sm:$0xff] }
0x2b6d   :  { %v3645_v43 = vld [vmem:[#allocation5 + $0x11f] ss:$0 sm:$0xff] }
0x2b6e   :  { %v2993_v7 = vrot.slane %v2991_v32, 2  ;;  %v2984_v33 = vadd.f32 %v2982_v15, %v4812_v26  ;;  %v3236_v15 = vld [vmem:[#allocation5 + $0xd0] sm:$0xff] }
0x2b70   :  { %2994 = vrot.lane.b32.xlu1 %v2993_v7, %s4404_s12  ;;  %v3641_v55 = vmul.f32 -1.442695, %v2984_v33  ;;  %v3237_v33 = vld [vmem:[#allocation5 + $0xd8] sm:$0xff] }
0x2b72   :  { %4313 = vpow2.f32 %v3641_v55  ;;  %v3648_v55 = vld [vmem:[#allocation5 + $0x121] ss:$0 sm:$0xff] }
0x2b7c   :  { %v4314_v48 = vpop.eup %4313 }
0x2b7d   :  { %v2988_v34 = vadd.f32 1.0, %v4314_v48 }
0x2b7f   :  { %4315 = vrcp.f32 %v2988_v34  ;;  %v4136_v34 = vpack.c.bf16 %v3237_v33, %v3236_v15 }
0x2b89   :  { %v4316_v62 = vpop.eup %4315 }
0x2b8a   :  { %v3004_v20 = vsub.f32 1.0, %v4316_v62  ;;  %v3012_v54 = vmul.f32 %v4316_v62, %v3010_v57 }
0x2bac   :  { %v2253_v40 = vpop.permute.xlu0 %2252 }
0x2bad   :  { %v2255_v35 = vmul.f32 %v2253_v40, %v2250_v46  ;;  %v3323_v40 = vld [vmem:[#allocation5 + $0xf0] sm:$0xff] }
0x2baf   :  { %v2257_v27 = vadd.f32 %v2256_v49, %v2255_v35  ;;  %v3324_v35 = vld [vmem:[#allocation5 + $0xf8] sm:$0xff] }
0x2be2   :  { %v2995_v36 = vpop.permute.xlu1 %2994 }
0x2be3   :  { %v2997_v45 = vmul.f32 %v4316_v62, %v2995_v36 }
0x2be5   :  { %2999 = vrot.lane.b32.xlu1 %v2997_v45, %s4403_s11 }
0x2c57   :  { %v3000_v39 = vpop.permute.xlu1 %2999 }
0x2c58   :  { %v3002_v22 = vadd.f32 %v3000_v39, %v4812_v26  ;;  %v4129_v26 = vpack.c.bf16 %v3150_v50, %v3149_v52  ;;  %v3238_v39 = vld [vmem:[#allocation5 + $0xe0] sm:$0x7f] }
0x2c59   :  { %v3651_v50 = vld [vmem:[#allocation5 + $0x122] ss:$0 sm:$0xff] }
0x2c5a   :  { %4317 = vtanh.f32 %v3002_v22  ;;  %4130 = vmatpush3.bf16.msra.mxu0 %v4129_v26  ;;  %v3322_v22 = vld [vmem:[#allocation5 + $0xe8] sm:$0xff] }
0x2c5b   :  { %4131 = vmatprep.subr.bf16.mxu0 %v4397_v0  ;;  %v4143_v46 = vpack.c.bf16 %v3323_v40, %v3322_v22 }
0x2c5e   :  { %4134 = vmatpush3.bf16.msk.msra.mxu0 %vm4458_vm3, %v4132_v3  ;;  %vm3495_vm3 = vcmask 1044480   ;;  %v3657_v3 = vld [vmem:[#allocation5 + $0x123] ss:$0 sm:$0xff] }
0x2c5f   :  { %4142 = vmatprep.subr.bf16.mxu0 %v4397_v0  ;;  %vm4147_vm4 = vmpackc.low %vm3495_vm3, %vm4400_vm2 }
0x2c61   :  { %3994 = vmatmul.mubr.msk.f32.vlgmr.msra.gmra.mrb[26].mxu0 %vm3158_vm11, %v3146_v4 }
0x2c62   :  { %4016 = vmatprep.mubr.msk.f32.mxu0 %vm4398_vm0, %v4399_v1  ;;  %4144 = vmatpush3.bf16.msra.mxu0 %v4143_v46 }
0x2c64   :  { %v4318_v56 = vpop.eup %4317 }
0x2c65   :  { %3006 = vrot.lane.b32.xlu1 %v4318_v56, %s4405_s13  ;;  %v3325_v56 = vld [vmem:[#allocation5 + $0x100] sm:$0x7] }
0x2c66   :  { %v4139_v49 = vpack.c.bf16 %v3325_v56, %v3324_v35 }
0x2c69   :  { %3019 = vrot.lane.b32.xlu1 %v2257_v27, %s4407_s15  ;;  %v3646_v27 = vld [vmem:[#allocation5 + $0x120] ss:$0 sm:$0xff] }
0x2cd7   :  { %v3007_v58 = vpop.permute.xlu1 %3006 }
0x2cd8   :  { %v3009_v61 = vmul.f32 %v3007_v58, %v3004_v20 }
0x2cda   :  { %v3013_v63 = vadd.f32 %v3012_v54, %v3009_v61 }
0x2cdb   :  { %v3020_v9 = vpop.permute.xlu1 %3019 }
0x2cdc   :  { %3015 = vrot.lane.b32.xlu0 %v3013_v63, %s4405_s13 }
0x2d34   :  { %v3231_v18 = vpop.f32.mrb[26].mxu0 }
0x2d35   :  { %v3995_v37 = vpop.f32.mrb[27].mxu0  ;;  %v3232_v36 = vadd.f32 %v3648_v55, %v3231_v18 }
0x2d37   :  { %v3235_v45 = vmax.f32 %v3232_v36, 0.0 }
0x2d4e   :  { %v3016_v12 = vpop.permute.xlu0 %3015 }
0x2d4f   :  { %v3022_v2 = vsel %vm145_vm6, %v3016_v12, %v3020_v9  ;;  %v3658_v9 = vld [vmem:[#allocation5 + $0x124] ss:$0 sm:$0xff] }
0x2d50   :  { %v3035_v41 = vadd.f32 %v3034_v11, %v3022_v2 }
0x2d52   :  { %v3039_v6 = vsel %vm3038_vm12, %v3035_v41, 0.0 }
0x2d53   :  { %3040 = vadd.xlane.f32.xlu0 %v3039_v6 }
0x2de0   :  { %v3041_v38 = vpop.xlane.xlu0 %3040 }
0x2de1   :  { %v3042_v14 = vmul.f32 0.03125, %v3041_v38 }
0x2de3   :  { %v3043_v17 = vsub.f32 %v3035_v41, %v3042_v14 }
0x2de5   :  { %v3044_v19 = vmul.f32 %v3043_v17, %v3043_v17 }
0x2de7   :  { %v3045_v13 = vsel %vm3038_vm12, %v3044_v19, 0.0 }
0x2de8   :  { %3046 = vadd.xlane.f32.xlu1 %v3045_v13 }
0x2e75   :  { %v3047_v25 = vpop.xlane.xlu1 %3046 }
0x2e76   :  { %v3048_v28 = vmul.f32 0.03125, %v3047_v25 }
0x2e78   :  { %v3049_v30 = vadd.f32 1e-05, %v3048_v28 }
0x2e7a   :  { %4319 = vrsqrt.f32 %v3049_v30 }
0x2e84   :  { %v4320_v31 = vpop.eup %4319 }
0x2e85   :  { %v3051_v32 = vmul.f32 %v4320_v31, %v3043_v17 }
0x2e87   :  { %v3056_v7 = vmul.f32 %v3644_v42, %v3051_v32 }
0x2e89   :  { %v3061_v48 = vadd.f32 %v3645_v43, %v3056_v7 }
0x2e8b   :  { %v3072_v62 = vrot.slane %v3061_v48, 6 }
0x2e8d   :  { %3979 = vmatmul.mubr.msk.f32.vlgmr.msra.gmra.mrb[28].mxu1 %vm1924_vm10, %v3072_v62 }
0x2e8e   :  { %4137 = vmatpush3.bf16.msra.mxu1 %v4136_v34  ;;  %4002 = vmatprep.mubr.msk.f32.mxu1 %vm4398_vm0, %v4399_v1 }
0x2e8f   :  { %4000 = vmatprep.subr.mxu1 %v4399_v1 }
0x2e92   :  { %4001 = vmatpush3.msk.msra.mxu1 %vm61_vm1, %v3238_v39  ;;  %vm3326_vm1 = vcmask 89088  }
0x2e93   :  { %4003 = vmatmul.mubr.msk.f32.vlgmr.msra.gmra.mrb[30].mxu1 %vm3244_vm13, %v3235_v45  ;;  %4138 = vmatprep.subr.bf16.mxu1 %v4397_v0 }
0x2e94   :  { %4009 = vmatprep.mubr.msk.f32.mxu1 %vm4398_vm0, %v4399_v1  ;;  %4141 = vmatpush3.bf16.msk.msra.mxu1 %vm4140_vm15, %v4139_v49 }
0x2e95   :  { %4145 = vmatprep.subr.bf16.mxu1 %v4397_v0  ;;  %v4146_v0 = vpack.c.bf16 %v3485_v59, %v3484_v10 }
0x2f60   :  { %v3141_v44 = vpop.f32.mrb[28].mxu1 }
0x2f61   :  { %v3142_v51 = vadd.f32 %v3646_v27, %v3141_v44  ;;  %v3980_v52 = vpop.f32.mrb[29].mxu1 }
0x2f63   :  { %v3145_v16 = vmax.f32 %v3142_v51, 0.0 }
0x2f65   :  { %4017 = vmatmul.mubr.msk.f32.vlgmr.msra.gmra.mrb[28].mxu0 %vm145_vm6, %v3145_v16 }
0x2f66   :  { %v3317_v57 = vpop.f32.mrb[30].mxu1 }
0x2f67   :  { %v3318_v20 = vadd.f32 %v3651_v50, %v3317_v57  ;;  %v4004_v26 = vpop.f32.mrb[31].mxu1 }
0x2f69   :  { %v3321_v58 = vmax.f32 %v3318_v20, 0.0 }
0x2f6b   :  { %4010 = vmatmul.mubr.msk.f32.vlgmr.msra.gmra.mrb[32].mxu1 %vm3326_vm1, %v3321_v58 }
0x2f6c   :  { %4023 = vmatprep.mubr.msk.f32.mxu1 %vm4398_vm0, %v4399_v1  ;;  %4148 = vmatpush3.bf16.msk.msra.mxu1 %vm4147_vm4, %v4146_v0  ;;  %vm3569_vm0 = vcmask 9216  }
0x3038   :  { %v3473_v54 = vpop.f32.mrb[28].mxu0 }
0x3039   :  { %v4018_v61 = vpop.f32.mrb[29].mxu0 }
0x303e   :  { %v3400_v63 = vpop.f32.mrb[32].mxu1 }
0x303f   :  { %v3474_v4 = vadd.f32 %v3473_v54, %v3400_v63  ;;  %v4011_v29 = vpop.f32.mrb[33].mxu1 }
0x3041   :  { %v3482_v5 = vadd.f32 %v3657_v3, %v3474_v4 }
0x3043   :  { %v3483_v8 = vmax.f32 %v3482_v5, 0.0 }
0x3045   :  { %4024 = vmatmul.mubr.msk.f32.vlgmr.msra.gmra.mrb[34].mxu1 %vm3491_vm5, %v3483_v8 }
0x3118   :  { %v3565_v1 = vpop.f32.mrb[34].mxu1 }
0x3119   :  { %v3566_v11 = vadd.f32 %v3658_v9, %v3565_v1  ;;  %v4025_v12 = vpop.f32.mrb[35].mxu1 }
0x311b   :  { %3570 = vst.msk [vmem:[#allocation7] sm:$0x3] %vm3569_vm0, %v3566_v11 }
0x311c   :  { %4376 = shalt.err (!%p4373_p6)
}
0x311d   :  { %s4377_s22 = scalar_lea.hbm %s4967_s3, 32 }
0x311e   :  { %p4378_p7 = scmp.ne.s32.totalorder %s4967_s3, %s4377_s22  ;;  %p4381_p8 = scmp.lt.u32.totalorder %s4377_s22, %s4967_s3 }
0x3120   :  { %p4383_p9 = pnand %p4381_p8, %p4378_p7 }
0x3122   :  { %4386 = shalt.err (!%p4383_p9)
}
0x3123   :  { %3580 = dma.vmem_to_hbm [thread:$0]  %s3578_s18, 32, %s4967_s3, [#allocation4]  }
0x3124   :  { %4391 = dma.done.wait [#allocation4], 32  }
0x3125   :  { %4392 = vsyncadd [#allocation4], 4294967264 }
0x3126   :  { %3584 = vsyncpa [#allocation3], 1 }
0x3127   :  { %3585 = vsyncpa [#allocation6], 1 }
0x3128   :  { %3586 = vsyncpa [#allocation4], 1 }

</bundles_post_ra>
